<compile_context>
chip_gen: v6e
topology: v6e:2x2x1
jax: 0.10.0
libtpu: 0.0.40
codegen_flags: <defaults>
</compile_context>

<pallas_src>
import functools

import jax
import jax.numpy as jnp
import numpy as np
from jax.experimental import pallas as pl
from jax.experimental.pallas import tpu as pltpu

MSG_EPS = 1e-7          # GENConv message epsilon
LN_EPS = 1e-5           # torch.nn.LayerNorm default eps
NEG_BIG = -1e30         # finite stand-in for -inf (running-max init / padded-edge mask)
OUT_PAD = 128           # lane-dense prediction-head width (sliced back to num_tasks outside)
# bf16 scatter operands (perf-review item): one-hot side is exact, the packed cast costs
# ~2^-9 relative error -> validate at 2e-2; set to jnp.float32 to pass 5e-4.
SCATTER_DTYPE = jnp.bfloat16


# ----------------------------------------------------------------------------- GENConv kernel
def _genconv_kernel(off_ref,                                   # scalar prefetch: per-tile chunk offsets (SMEM)
                    xsrc_ref, eemb_ref, ldst_ref,              # per-edge-chunk blocks
                    xdst_ref, wmlp_ref, bmlp_ref, t_ref,       # per-dst-tile / replicated blocks
                    out_ref,                                   # (TILE_N, H) per-dst-tile output
                    num_ref, den_ref, max_ref, packed_ref,     # VMEM scratch
                    *, tile_n, hidden):
    i = pl.program_id(0)                 # dst-node tile (parallel -> sharded across TCs)
    j = pl.program_id(1)                 # edge chunk within the tile (sequential reduction)
    n_chunks = off_ref[i + 1] - off_ref[i]

    @pl.when(j == 0)
    def _init():
        num_ref[...] = jnp.zeros_like(num_ref)
        den_ref[...] = jnp.zeros_like(den_ref)
        max_ref[...] = jnp.full(max_ref.shape, NEG_BIG, max_ref.dtype)

    @pl.when(j < n_chunks)
    def _accumulate():
        t = t_ref[0, 0]
        # GENConv message: relu(x_j + edge_emb) + eps.  Padded edges see x[0] + 0 (finite);
        # they are excluded from the aggregation by their all-zero scatter column below.
        msg = jnp.maximum(xsrc_ref[...] + eemb_ref[...], 0.0) + MSG_EPS          # (TE, H)
        z = t * msg
        # --- online softmax with a chunk-level per-channel max bound: exp arguments are
        #     always <= 0, and num/den are rescaled consistently when the bound rises, so
        #     the final num/den ratio equals the reference's segment-max softmax exactly.
        cmax = jnp.max(z, axis=0, keepdims=True)                                 # (1, H)
        m_new = jnp.maximum(max_ref[...], cmax)                                  # (TILE_N, H)
        alpha = jnp.exp(max_ref[...] - m_new)                                    # <= 1
        beta = jnp.exp(cmax - m_new)                                             # <= 1
        p = jnp.exp(z - cmax)                                                    # <= 1 (TE, H)
        # --- packed (msg*p | p) written straight into persistent VMEM scratch (no concat) ---
        packed_ref[:, :hidden] = (msg * p).astype(packed_ref.dtype)
        packed_ref[:, hidden:] = p.astype(packed_ref.dtype)
        # --- within-tile scatter: one-hot (TILE_N, TE) x packed (TE, 2H), bf16 in / f32 acc.
        #     local-dst sentinel (== tile_n) for padded edges -> all-zero column -> no weight.
        ldst = ldst_ref[...]                                                     # (1, TE)
        s_t = (jax.lax.broadcasted_iota(jnp.int32, (tile_n, ldst.shape[1]), 0)
               == ldst).astype(packed_ref.dtype)
        contrib = jnp.dot(s_t, packed_ref[...],
                          preferred_element_type=jnp.float32)                    # (TILE_N, 2H)
        num_ref[...] = num_ref[...] * alpha + contrib[:, :hidden] * beta
        den_ref[...] = den_ref[...] * alpha + contrib[:, hidden:] * beta
        max_ref[...] = m_new

    @pl.when(j == pl.num_programs(1) - 1)
    def _finalize():
        den = den_ref[...]
        den_safe = jnp.maximum(den, 1e-30)
        inv = pl.reciprocal(den_safe, approx=True)        # EUP slot
        inv = inv * (2.0 - den_safe * inv)                # one Newton step -> ~f32 accuracy
        m = jnp.where(den > 0.0, num_ref[...] * inv, 0.0) # isolated nodes -> 0
        hh = xdst_ref[...] + m
        # mlp_layers == 1 -> GENConv MLP is a single Linear
        out_ref[...] = (jnp.dot(hh, wmlp_ref[...], preferred_element_type=jnp.float32)
                        + bmlp_ref[...])


# ----------------------------------------------------------------------------- prediction head
def _head_kernel(h_ref, g_ref, b_ref, wp_ref, bp_ref, out_ref):
    x = h_ref[...]
    mu = jnp.mean(x, axis=1, keepdims=True)
    xc = x - mu
    var = jnp.mean(xc * xc, axis=1, keepdims=True)
    hn = jnp.maximum(xc * jax.lax.rsqrt(var + LN_EPS) * g_ref[...] + b_ref[...], 0.0)
    out_ref[...] = (jnp.dot(hn, wp_ref[...], preferred_element_type=jnp.float32)
                    + bp_ref[...])


# ----------------------------------------------------------------------------- pallas_call builders
def _build_conv_call(num_tiles, max_chunks, total_chunks, tile_n, tile_e, hidden,
                     e_pad, n_nodes):
    def edge_map(i, j, off):      # clamp keeps skipped (j >= n_chunks) DMAs in-bounds
        return (jnp.minimum(off[i] + j, total_chunks - 1), 0)

    def ldst_map(i, j, off):
        return (0, jnp.minimum(off[i] + j, total_chunks - 1))

    grid_spec = pltpu.PrefetchScalarGridSpec(
        num_scalar_prefetch=1,
        grid=(num_tiles, max_chunks),
        in_specs=[
            pl.BlockSpec((tile_e, hidden), edge_map),                  # x_src (gathered h[src])
            pl.BlockSpec((tile_e, hidden), edge_map),                  # edge_emb (sorted+padded)
            pl.BlockSpec((1, tile_e), ldst_map),                       # local dst ids (sentinel=tile_n)
            pl.BlockSpec((tile_n, hidden), lambda i, j, off: (i, 0)),  # x_dst tile (resident over j)
            pl.BlockSpec((hidden, hidden), lambda i, j, off: (0, 0)),  # W_mlp
            pl.BlockSpec((1, hidden), lambda i, j, off: (0, 0)),       # b_mlp
            pl.BlockSpec((1, 1), lambda i, j, off: (0, 0)),            # temperature t
        ],
        out_specs=pl.BlockSpec((tile_n, hidden), lambda i, j, off: (i, 0)),
        scratch_shapes=[pltpu.VMEM((tile_n, hidden), jnp.float32),     # num accumulator
                        pltpu.VMEM((tile_n, hidden), jnp.float32),     # den accumulator
                        pltpu.VMEM((tile_n, hidden), jnp.float32),     # running max
                        pltpu.VMEM((tile_e, 2 * hidden), SCATTER_DTYPE)],  # packed (msg*p | p)
    )

    flops = int(2 * e_pad * tile_n * 2 * hidden + 2 * n_nodes * hidden * hidden)
    transcendentals = int(e_pad * hidden
                          + num_tiles * max_chunks * 2 * tile_n * hidden
                          + n_nodes * hidden)
    bytes_accessed = int(4 * (2 * e_pad * hidden + 3 * n_nodes * hidden + hidden * hidden))

    # VMEM budget (per grid step, double-buffered inputs): ~1.3 MiB at TILE_N=128/TILE_E=256;
    # 32 MiB leaves ample headroom under v7x's 64 MiB physical VMEM.  Re-derive if tiles grow.
    return pl.pallas_call(
        functools.partial(_genconv_kernel, tile_n=tile_n, hidden=hidden),
        out_shape=jax.ShapeDtypeStruct((n_nodes, hidden), jnp.float32),
        grid_spec=grid_spec,
        compiler_params=pltpu.CompilerParams(
            dimension_semantics=("parallel", "arbitrary"),
            vmem_limit_bytes=32 * 1024 * 1024),
        cost_estimate=pl.CostEstimate(flops=flops, transcendentals=transcendentals,
                                      bytes_accessed=bytes_accessed),
    )


def _build_head_call(num_tiles, tile_n, hidden, n_nodes):
    return pl.pallas_call(
        _head_kernel,
        out_shape=jax.ShapeDtypeStruct((n_nodes, OUT_PAD), jnp.float32),
        grid=(num_tiles,),
        in_specs=[pl.BlockSpec((tile_n, hidden), lambda i: (i, 0)),
                  pl.BlockSpec((1, hidden), lambda i: (0, 0)),
                  pl.BlockSpec((1, hidden), lambda i: (0, 0)),
                  pl.BlockSpec((hidden, OUT_PAD), lambda i: (0, 0)),
                  pl.BlockSpec((1, OUT_PAD), lambda i: (0, 0))],
        out_specs=pl.BlockSpec((tile_n, OUT_PAD), lambda i: (i, 0)),
        compiler_params=pltpu.CompilerParams(dimension_semantics=("parallel",)),
    )


# ----------------------------------------------------------------------------- edge preprocessing
def prepare_edges(src, dst, num_nodes, tile_n, tile_e):
    """Sort edges by dst, group per dst tile, pad each tile's segment to a multiple of tile_e."""
    src = np.asarray(src, np.int64)
    dst = np.asarray(dst, np.int64)
    e = int(src.shape[0])
    assert e > 0
    assert num_nodes % tile_n == 0
    num_tiles = num_nodes // tile_n

    order = np.argsort(dst, kind="stable")
    dst_s = dst[order]
    counts = np.bincount(dst_s // tile_n, minlength=num_tiles)
    chunks = (counts + tile_e - 1) // tile_e
    chunk_off = np.zeros(num_tiles + 1, np.int32)
    chunk_off[1:] = np.cumsum(chunks).astype(np.int32)
    total_chunks = int(chunk_off[-1])
    assert total_chunks >= 1
    max_chunks = max(int(chunks.max()), 1)
    e_pad = total_chunks * tile_e

    perm = np.zeros(e_pad, np.int64)
    valid = np.zeros(e_pad, bool)
    ldst = np.full(e_pad, tile_n, np.int32)          # sentinel -> zero scatter column
    estart = np.zeros(num_tiles + 1, np.int64)
    estart[1:] = np.cumsum(counts)
    for tidx in range(num_tiles):
        c = int(counts[tidx])
        if c == 0:
            continue
        o = int(chunk_off[tidx]) * tile_e
        sel = order[estart[tidx]:estart[tidx] + c]
        perm[o:o + c] = sel
        valid[o:o + c] = True
        ldst[o:o + c] = (dst_s[estart[tidx]:estart[tidx] + c] - tidx * tile_n).astype(np.int32)
    src_pad = np.where(valid, src[perm], 0).astype(np.int32)

    return dict(perm=jnp.asarray(perm.astype(np.int32)),
                valid=jnp.asarray(valid),
                src_pad=jnp.asarray(src_pad),
                ldst_row=jnp.asarray(ldst.reshape(1, -1)),
                chunk_off=jnp.asarray(chunk_off),
                num_tiles=num_tiles, max_chunks=max_chunks,
                total_chunks=total_chunks, e_pad=e_pad)


# ----------------------------------------------------------------------------- forward wrapper
def deeper_gcn_forward(params, nf1, x_onehot, edge_attr,
                       src_pad, perm, edge_valid, ldst_row, chunk_off,
                       *, num_layers, hidden, tile_n, tile_e,
                       num_tiles, max_chunks, total_chunks, num_tasks):
    n_nodes = x_onehot.shape[0]
    e_pad = int(src_pad.shape[0])

    # ---- tiny K=8 encoders hoisted to XLA; node_one_hot_encoder folded into
    #      node_features_encoder: h = nf1@W[:8] + xoh@(W_ohe@W[8:]) + (b_ohe@W[8:] + b) ----
    w_nf1 = params["w_nfe"][:8]
    w_fold = params["w_ohe"] @ params["w_nfe"][8:]
    b_fold = params["b_ohe"] @ params["w_nfe"][8:] + params["b_nfe"]
    h = nf1 @ w_nf1 + x_onehot @ w_fold + b_fold                       # (N, H)
    eemb = edge_attr @ params["w_ee"] + params["b_ee"]                 # (E, H)
    eemb_pad = jnp.where(edge_valid[:, None], eemb[perm], 0.0)         # (E_pad, H) dst-sorted

    conv = _build_conv_call(num_tiles, max_chunks, total_chunks,
                            tile_n, tile_e, hidden, e_pad, n_nodes)
    head = _build_head_call(num_tiles, tile_n, hidden, n_nodes)

    def layer_norm(x, g, b):
        mu = jnp.mean(x, axis=1, keepdims=True)
        xc = x - mu
        var = jnp.mean(xc * xc, axis=1, keepdims=True)
        return xc * jax.lax.rsqrt(var + LN_EPS) * g + b

    # ---- block == 'res+' (F.dropout is identity in eval mode) ----
    # TODO(synk): for 28-112 layer configs, stack the per-layer weights and lax.scan this loop.
    for layer in range(num_layers):
        if layer == 0:
            x_in = h
        else:
            x_in = jnp.maximum(layer_norm(h, params["ln_g"][layer - 1][None, :],
                                          params["ln_b"][layer - 1][None, :]), 0.0)
        # TODO(synk): at ogbn-proteins scale do this gather in-kernel with per-chunk DMA
        #             instead of materializing (E_pad, H) in HBM per layer.
        x_src = x_in[src_pad]                                           # (E_pad, H)
        y = conv(chunk_off, x_src, eemb_pad, ldst_row, x_in,
                 params["w_mlp"][layer], params["b_mlp"][layer][None, :],
                 params["t"][layer].reshape(1, 1))
        h = y if layer == 0 else h + y

    # final LN + ReLU + prediction head (lane-dense 128-padded output, sliced outside)
    w_pred_pad = jnp.pad(params["w_pred"], ((0, 0), (0, OUT_PAD - num_tasks)))
    b_pred_pad = jnp.pad(params["b_pred"], ((0, 0), (0, OUT_PAD - num_tasks)))
    out = head(h, params["ln_g"][num_layers - 1][None, :],
               params["ln_b"][num_layers - 1][None, :], w_pred_pad, b_pred_pad)
    return out[:, :num_tasks]


# ----------------------------------------------------------------------------- pure-JAX reference
def _ref_forward(params, nf1, x_onehot, edge_attr, src, dst, *, num_layers):
    n = x_onehot.shape[0]
    nf2 = x_onehot @ params["w_ohe"] + params["b_ohe"]
    h = jnp.concatenate([nf1, nf2], axis=1) @ params["w_nfe"] + params["b_nfe"]
    eemb = edge_attr @ params["w_ee"] + params["b_ee"]

    def layer_norm(x, g, b):
        mu = jnp.mean(x, axis=1, keepdims=True)
        var = jnp.mean((x - mu) ** 2, axis=1, keepdims=True)
        return (x - mu) / jnp.sqrt(var + LN_EPS) * g + b

    def gen(x, layer):
        t = params["t"][layer]
        msg = jnp.maximum(x[src] + eemb, 0.0) + MSG_EPS
        z = t * msg
        zmax = jax.ops.segment_max(z, dst, num_segments=n)
        zmax = jnp.where(jnp.isfinite(zmax), zmax, 0.0)
        ex = jnp.exp(z - zmax[dst])
        den = jax.ops.segment_sum(ex, dst, num_segments=n)
        alpha = ex / den[dst]
        m = jax.ops.segment_sum(msg * alpha, dst, num_segments=n)
        return (x + m) @ params["w_mlp"][layer] + params["b_mlp"][layer]

    h = gen(h, 0)
    for layer in range(1, num_layers):
        h1 = layer_norm(h, params["ln_g"][layer - 1], params["ln_b"][layer - 1])
        h = gen(jnp.maximum(h1, 0.0), layer) + h
    h = jnp.maximum(layer_norm(h, params["ln_g"][num_layers - 1],
                               params["ln_b"][num_layers - 1]), 0.0)
    return h @ params["w_pred"] + params["b_pred"]


# ----------------------------------------------------------------------------- params
def init_params(key, hidden, num_layers, num_tasks):
    ks = jax.random.split(key, 8)

    def lin(k, fan_in, fan_out):
        bound = 1.0 / np.sqrt(fan_in)
        kw, kb = jax.random.split(k)
        w = jax.random.uniform(kw, (fan_in, fan_out), jnp.float32, -bound, bound)
        b = jax.random.uniform(kb, (1, fan_out), jnp.float32, -bound, bound)
        return w, b

    w_ohe, b_ohe = lin(ks[0], 8, 8)
    w_nfe, b_nfe = lin(ks[1], 16, hidden)
    w_ee, b_ee = lin(ks[2], 8, hidden)
    w_pred, b_pred = lin(ks[3], hidden, num_tasks)

    mlp_ks = jax.random.split(ks[4], num_layers)
    w_mlp = jnp.stack([lin(k, hidden, hidden)[0] for k in mlp_ks])           # (L, H, H)
    b_mlp = jnp.stack([lin(k, hidden, hidden)[1][0] for k in mlp_ks])        # (L, H)

    return dict(w_ohe=w_ohe, b_ohe=b_ohe, w_nfe=w_nfe, b_nfe=b_nfe,
                w_ee=w_ee, b_ee=b_ee, w_mlp=w_mlp, b_mlp=b_mlp,
                t=jnp.ones((num_layers,), jnp.float32),                      # learn_t init t=1.0
                ln_g=jnp.ones((num_layers, hidden), jnp.float32),
                ln_b=jnp.zeros((num_layers, hidden), jnp.float32),
                w_pred=w_pred, b_pred=b_pred)


# ----------------------------------------------------------------------------- main
if __name__ == "__main__":
    HIDDEN = 128         # full 128-lane vregs; packed scatter buffer is 2H = 256 lanes
    NUM_LAYERS = 3
    NUM_TASKS = 8
    N_NODES = 256        # 2 dst tiles of TILE_N -> exercises the "parallel" tile axis
    N_EDGES = 1024
    TABLE_ROWS = 500     # synthetic stand-in for args.nf_path node-feature table
    TILE_N = 128         # dst-node tile (use >=256 on v6e/v7x at real sizes to fill the 2x256 MXU)
    TILE_E = 256         # edge chunk (multiple of 256 -> full MXU contraction, lane-aligned)

    key = jax.random.PRNGKey(0)
    k_tab, k_idx, k_spec, k_ea, k_ei, k_par = jax.random.split(key, 6)

    node_feature_table = jax.random.normal(k_tab, (TABLE_ROWS, 8), jnp.float32)
    node_index = jax.random.randint(k_idx, (N_NODES,), 0, TABLE_ROWS)
    x_onehot = jax.nn.one_hot(jax.random.randint(k_spec, (N_NODES,), 0, 8), 8, dtype=jnp.float32)
    edge_attr = jax.random.normal(k_ea, (N_EDGES, 8), jnp.float32)
    edge_index = jax.random.randint(k_ei, (2, N_EDGES), 0, N_NODES)
    src, dst = edge_index[0], edge_index[1]   # PyG: row 0 = source (x_j), row 1 = target (aggregate)

    params = init_params(k_par, HIDDEN, NUM_LAYERS, NUM_TASKS)

    # torch.load(nf_path)[node_index] — table gather done as glue in plain JAX
    nf1 = node_feature_table[node_index]

    ep = prepare_edges(np.asarray(src), np.asarray(dst), N_NODES, TILE_N, TILE_E)

    fwd = jax.jit(functools.partial(
        deeper_gcn_forward,
        num_layers=NUM_LAYERS, hidden=HIDDEN, tile_n=TILE_N, tile_e=TILE_E,
        num_tiles=ep["num_tiles"], max_chunks=ep["max_chunks"],
        total_chunks=ep["total_chunks"], num_tasks=NUM_TASKS))

    out = fwd(params, nf1, x_onehot, edge_attr,
              ep["src_pad"], ep["perm"], ep["valid"], ep["ldst_row"], ep["chunk_off"])
    out = jax.block_until_ready(out)

    ref = _ref_forward(params, nf1, x_onehot, edge_attr, src, dst, num_layers=NUM_LAYERS)

    assert out.shape == (N_NODES, NUM_TASKS)
    assert np.all(np.isfinite(np.asarray(out)))
    # bf16 scatter operands (requested by the perf review) cost ~2^-9 relative rounding on the
    # packed buffer; the f32 variant (SCATTER_DTYPE=jnp.float32) passes 5e-4.
    tol = 5e-4 if SCATTER_DTYPE == jnp.float32 else 2e-2
    np.testing.assert_allclose(np.asarray(out), np.asarray(ref), rtol=tol, atol=tol)

    print("KERNEL_OK")
</pallas_src>

<mosaic_0001>
module attributes {stable_mosaic.version = 11 : i64} {
  func.func @_genconv_kernel(%arg0: i32, %arg1: i32, %arg2: memref<3xi32, #tpu.memory_space<smem>>, %arg3: memref<256x128xf32, #tpu.memory_space<vmem>>, %arg4: memref<256x128xf32, #tpu.memory_space<vmem>>, %arg5: memref<1x256xi32, #tpu.memory_space<vmem>>, %arg6: memref<128x128xf32, #tpu.memory_space<vmem>>, %arg7: memref<128x128xf32, #tpu.memory_space<vmem>>, %arg8: memref<1x128xf32, #tpu.memory_space<vmem>>, %arg9: memref<1x1xf32, #tpu.memory_space<vmem>>, %arg10: memref<128x128xf32, #tpu.memory_space<vmem>>, %arg11: memref<128x128xf32, #tpu.memory_space<vmem>>, %arg12: memref<128x128xf32, #tpu.memory_space<vmem>>, %arg13: memref<128x128xf32, #tpu.memory_space<vmem>>, %arg14: memref<256x256xbf16, #tpu.memory_space<vmem>>) attributes {dimension_semantics = [#tpu.dimension_semantics<parallel>, #tpu.dimension_semantics<arbitrary>], iteration_bounds = array<i64: 2, 3>, scalar_prefetch = 1 : i64, scratch_operands = 4 : i64, tpu.core_type = #tpu.core_type<tc>, window_params = [{transform_indices = @transform_0, window_bounds = array<i64: 256, 128>}, {transform_indices = @transform_1, window_bounds = array<i64: 256, 128>}, {transform_indices = @transform_2, window_bounds = array<i64: 1, 256>}, {transform_indices = @transform_3, window_bounds = array<i64: 128, 128>}, {pipeline_mode = #tpu.pipeline_mode<synchronous>, transform_indices = @transform_4, window_bounds = array<i64: 128, 128>}, {pipeline_mode = #tpu.pipeline_mode<synchronous>, transform_indices = @transform_5, window_bounds = array<i64: 1, 128>}, {pipeline_mode = #tpu.pipeline_mode<synchronous>, transform_indices = @transform_6, window_bounds = array<i64: 1, 1>}, {transform_indices = @transform_7, window_bounds = array<i64: 128, 128>}]} {
    %c1_i32 = arith.constant 1 : i32
    %0 = arith.addi %arg0, %c1_i32 : i32
    %1 = arith.index_cast %0 : i32 to index
    %2 = memref.load %arg2[%1] : memref<3xi32, #tpu.memory_space<smem>>
    %3 = arith.index_cast %arg0 : i32 to index
    %4 = memref.load %arg2[%3] : memref<3xi32, #tpu.memory_space<smem>>
    %5 = arith.subi %2, %4 : i32
    %c0_i32 = arith.constant 0 : i32
    %6 = arith.cmpi eq, %arg1, %c0_i32 : i32
    %7 = arith.extui %6 : i1 to i32
    %c0_i32_0 = arith.constant 0 : i32
    %8 = arith.cmpi ne, %7, %c0_i32_0 : i32
    scf.if %8 {
      %cst = arith.constant 0.000000e+00 : f32
      %15 = vector.broadcast %cst : f32 to vector<128x128xf32>
      %c0 = arith.constant 0 : index
      %c0_3 = arith.constant 0 : index
      %16 = vector.load %arg11[%c0, %c0_3] : memref<128x128xf32, #tpu.memory_space<vmem>>, vector<128x128xf32>
      tpu.vector_store %arg11[%c0, %c0_3], %15 {strides = array<i32>} : memref<128x128xf32, #tpu.memory_space<vmem>>, vector<128x128xf32>,
      %cst_4 = arith.constant 0.000000e+00 : f32
      %17 = vector.broadcast %cst_4 : f32 to vector<128x128xf32>
      %c0_5 = arith.constant 0 : index
      %c0_6 = arith.constant 0 : index
      %18 = vector.load %arg12[%c0_5, %c0_6] : memref<128x128xf32, #tpu.memory_space<vmem>>, vector<128x128xf32>
      tpu.vector_store %arg12[%c0_5, %c0_6], %17 {strides = array<i32>} : memref<128x128xf32, #tpu.memory_space<vmem>>, vector<128x128xf32>,
      %cst_7 = arith.constant -1.000000e+30 : f32
      %19 = vector.broadcast %cst_7 : f32 to vector<128x128xf32>
      %c0_8 = arith.constant 0 : index
      %c0_9 = arith.constant 0 : index
      %20 = vector.load %arg13[%c0_8, %c0_9] : memref<128x128xf32, #tpu.memory_space<vmem>>, vector<128x128xf32>
      tpu.vector_store %arg13[%c0_8, %c0_9], %19 {strides = array<i32>} : memref<128x128xf32, #tpu.memory_space<vmem>>, vector<128x128xf32>,
    } else {
    }
    %9 = arith.cmpi slt, %arg1, %5 : i32
    %10 = arith.extui %9 : i1 to i32
    %c0_i32_1 = arith.constant 0 : i32
    %11 = arith.cmpi ne, %10, %c0_i32_1 : i32
    scf.if %11 {
      %c0 = arith.constant 0 : index
      %c0_3 = arith.constant 0 : index
      %15 = vector.load %arg9[%c0, %c0_3] : memref<1x1xf32, #tpu.memory_space<vmem>>, vector<1x1xf32>
      %16 = vector.extract %15[0, 0] : f32 from vector<1x1xf32>
      %c0_4 = arith.constant 0 : index
      %c0_5 = arith.constant 0 : index
      %17 = vector.load %arg3[%c0_4, %c0_5] : memref<256x128xf32, #tpu.memory_space<vmem>>, vector<256x128xf32>
      %c0_6 = arith.constant 0 : index
      %c0_7 = arith.constant 0 : index
      %18 = vector.load %arg4[%c0_6, %c0_7] : memref<256x128xf32, #tpu.memory_space<vmem>>, vector<256x128xf32>
      %19 = arith.addf %17, %18 : vector<256x128xf32>
      %cst = arith.constant 0.000000e+00 : f32
      %20 = vector.broadcast %cst : f32 to vector<256x128xf32>
      %21 = arith.maximumf %19, %20 : vector<256x128xf32>
      %cst_8 = arith.constant 1.000000e-07 : f32
      %22 = vector.broadcast %cst_8 : f32 to vector<256x128xf32>
      %23 = arith.addf %21, %22 : vector<256x128xf32>
      %24 = vector.broadcast %16 : f32 to vector<256x128xf32>
      %25 = arith.mulf %24, %23 : vector<256x128xf32>
      %cst_9 = arith.constant dense<0xFF800000> : vector<128xf32>
      %26 = vector.multi_reduction <maximumf>, %25, %cst_9 [0] : vector<256x128xf32> to vector<128xf32>
      %27 = vector.shape_cast %26 : vector<128xf32> to vector<1x128xf32>
      %c0_10 = arith.constant 0 : index
      %c0_11 = arith.constant 0 : index
      %28 = vector.load %arg13[%c0_10, %c0_11] : memref<128x128xf32, #tpu.memory_space<vmem>>, vector<128x128xf32>
      %29 = vector.broadcast %27 : vector<1x128xf32> to vector<128x128xf32>
      %30 = arith.maximumf %28, %29 : vector<128x128xf32>
      %c0_12 = arith.constant 0 : index
      %c0_13 = arith.constant 0 : index
      %31 = vector.load %arg13[%c0_12, %c0_13] : memref<128x128xf32, #tpu.memory_space<vmem>>, vector<128x128xf32>
      %32 = arith.subf %31, %30 : vector<128x128xf32>
      %33 = math.exp %32 : vector<128x128xf32>
      %34 = vector.broadcast %27 : vector<1x128xf32> to vector<128x128xf32>
      %35 = arith.subf %34, %30 : vector<128x128xf32>
      %36 = math.exp %35 : vector<128x128xf32>
      %37 = vector.broadcast %27 : vector<1x128xf32> to vector<256x128xf32>
      %38 = arith.subf %25, %37 : vector<256x128xf32>
      %39 = math.exp %38 : vector<256x128xf32>
      %40 = arith.mulf %23, %39 : vector<256x128xf32>
      %41 = arith.truncf %40 : vector<256x128xf32> to vector<256x128xbf16>
      %c0_14 = arith.constant 0 : index
      %c0_15 = arith.constant 0 : index
      %42 = vector.load %arg14[%c0_14, %c0_15] : memref<256x256xbf16, #tpu.memory_space<vmem>>, vector<256x128xbf16>
      tpu.vector_store %arg14[%c0_14, %c0_15], %41 {strides = array<i32>} : memref<256x256xbf16, #tpu.memory_space<vmem>>, vector<256x128xbf16>,
      %43 = arith.truncf %39 : vector<256x128xf32> to vector<256x128xbf16>
      %c0_16 = arith.constant 0 : index
      %c128 = arith.constant 128 : index
      %44 = vector.load %arg14[%c0_16, %c128] : memref<256x256xbf16, #tpu.memory_space<vmem>>, vector<256x128xbf16>
      tpu.vector_store %arg14[%c0_16, %c128], %43 {strides = array<i32>} : memref<256x256xbf16, #tpu.memory_space<vmem>>, vector<256x128xbf16>,
      %c0_17 = arith.constant 0 : index
      %c0_18 = arith.constant 0 : index
      %45 = vector.load %arg5[%c0_17, %c0_18] : memref<1x256xi32, #tpu.memory_space<vmem>>, vector<1x256xi32>
      %46 = tpu.iota {dimensions = array<i32: 0>} : vector<128x256xi32>
      %47 = vector.broadcast %45 : vector<1x256xi32> to vector<128x256xi32>
      %48 = arith.cmpi eq, %46, %47 : vector<128x256xi32>
      %49 = arith.extui %48 : vector<128x256xi1> to vector<128x256xi32>
      %50 = arith.sitofp %49 : vector<128x256xi32> to vector<128x256xf32>
      %51 = arith.truncf %50 : vector<128x256xf32> to vector<128x256xbf16>
      %c0_19 = arith.constant 0 : index
      %c0_20 = arith.constant 0 : index
      %52 = vector.load %arg14[%c0_19, %c0_20] : memref<256x256xbf16, #tpu.memory_space<vmem>>, vector<256x256xbf16>
      %cst_21 = arith.constant dense<0.000000e+00> : vector<128x256xf32>
      %53 = tpu.matmul %51, %52, %cst_21 {dimension_numbers = #tpu.dot_dimension_numbers<[1], [0], [0], [1], [0, 0, 1, 1], [], []>} : vector<128x256xbf16>, vector<256x256xbf16>, vector<128x256xf32> -> vector<128x256xf32>
      %c0_22 = arith.constant 0 : index
      %c0_23 = arith.constant 0 : index
      %54 = vector.load %arg11[%c0_22, %c0_23] : memref<128x128xf32, #tpu.memory_space<vmem>>, vector<128x128xf32>
      %55 = arith.mulf %54, %33 : vector<128x128xf32>
      %56 = vector.extract_strided_slice %53 {offsets = [0, 0], sizes = [128, 128], strides = [1, 1]} : vector<128x256xf32> to vector<128x128xf32>
      %57 = arith.mulf %56, %36 : vector<128x128xf32>
      %58 = arith.addf %55, %57 : vector<128x128xf32>
      %c0_24 = arith.constant 0 : index
      %c0_25 = arith.constant 0 : index
      %59 = vector.load %arg11[%c0_24, %c0_25] : memref<128x128xf32, #tpu.memory_space<vmem>>, vector<128x128xf32>
      tpu.vector_store %arg11[%c0_24, %c0_25], %58 {strides = array<i32>} : memref<128x128xf32, #tpu.memory_space<vmem>>, vector<128x128xf32>,
      %c0_26 = arith.constant 0 : index
      %c0_27 = arith.constant 0 : index
      %60 = vector.load %arg12[%c0_26, %c0_27] : memref<128x128xf32, #tpu.memory_space<vmem>>, vector<128x128xf32>
      %61 = arith.mulf %60, %33 : vector<128x128xf32>
      %62 = vector.extract_strided_slice %53 {offsets = [0, 128], sizes = [128, 128], strides = [1, 1]} : vector<128x256xf32> to vector<128x128xf32>
      %63 = arith.mulf %62, %36 : vector<128x128xf32>
      %64 = arith.addf %61, %63 : vector<128x128xf32>
      %c0_28 = arith.constant 0 : index
      %c0_29 = arith.constant 0 : index
      %65 = vector.load %arg12[%c0_28, %c0_29] : memref<128x128xf32, #tpu.memory_space<vmem>>, vector<128x128xf32>
      tpu.vector_store %arg12[%c0_28, %c0_29], %64 {strides = array<i32>} : memref<128x128xf32, #tpu.memory_space<vmem>>, vector<128x128xf32>,
      %c0_30 = arith.constant 0 : index
      %c0_31 = arith.constant 0 : index
      %66 = vector.load %arg13[%c0_30, %c0_31] : memref<128x128xf32, #tpu.memory_space<vmem>>, vector<128x128xf32>
      tpu.vector_store %arg13[%c0_30, %c0_31], %30 {strides = array<i32>} : memref<128x128xf32, #tpu.memory_space<vmem>>, vector<128x128xf32>,
    } else {
    }
    %c2_i32 = arith.constant 2 : i32
    %12 = arith.cmpi eq, %arg1, %c2_i32 : i32
    %13 = arith.extui %12 : i1 to i32
    %c0_i32_2 = arith.constant 0 : i32
    %14 = arith.cmpi ne, %13, %c0_i32_2 : i32
    scf.if %14 {
      %c0 = arith.constant 0 : index
      %c0_3 = arith.constant 0 : index
      %15 = vector.load %arg12[%c0, %c0_3] : memref<128x128xf32, #tpu.memory_space<vmem>>, vector<128x128xf32>
      %cst = arith.constant 1.000000e-30 : f32
      %16 = vector.broadcast %cst : f32 to vector<128x128xf32>
      %17 = arith.maximumf %15, %16 : vector<128x128xf32>
      %18 = tpu.reciprocal %17 {approx = true} : vector<128x128xf32> -> vector<128x128xf32>
      %19 = arith.mulf %17, %18 : vector<128x128xf32>
      %cst_4 = arith.constant 2.000000e+00 : f32
      %20 = vector.broadcast %cst_4 : f32 to vector<128x128xf32>
      %21 = arith.subf %20, %19 : vector<128x128xf32>
      %22 = arith.mulf %18, %21 : vector<128x128xf32>
      %cst_5 = arith.constant 0.000000e+00 : f32
      %23 = vector.broadcast %cst_5 : f32 to vector<128x128xf32>
      %24 = arith.cmpf ogt, %15, %23 : vector<128x128xf32>
      %c0_6 = arith.constant 0 : index
      %c0_7 = arith.constant 0 : index
      %25 = vector.load %arg11[%c0_6, %c0_7] : memref<128x128xf32, #tpu.memory_space<vmem>>, vector<128x128xf32>
      %26 = arith.mulf %25, %22 : vector<128x128xf32>
      %cst_8 = arith.constant 0.000000e+00 : f32
      %27 = vector.broadcast %cst_8 : f32 to vector<128x128xf32>
      %28 = arith.select %24, %26, %27 : vector<128x128xi1>, vector<128x128xf32>
      %c0_9 = arith.constant 0 : index
      %c0_10 = arith.constant 0 : index
      %29 = vector.load %arg6[%c0_9, %c0_10] : memref<128x128xf32, #tpu.memory_space<vmem>>, vector<128x128xf32>
      %30 = arith.addf %29, %28 : vector<128x128xf32>
      %c0_11 = arith.constant 0 : index
      %c0_12 = arith.constant 0 : index
      %31 = vector.load %arg7[%c0_11, %c0_12] : memref<128x128xf32, #tpu.memory_space<vmem>>, vector<128x128xf32>
      %cst_13 = arith.constant dense<0.000000e+00> : vector<128x128xf32>
      %32 = tpu.matmul %30, %31, %cst_13 {dimension_numbers = #tpu.dot_dimension_numbers<[1], [0], [0], [1], [0, 0, 1, 1], [], []>} : vector<128x128xf32>, vector<128x128xf32>, vector<128x128xf32> -> vector<128x128xf32>
      %c0_14 = arith.constant 0 : index
      %c0_15 = arith.constant 0 : index
      %33 = vector.load %arg8[%c0_14, %c0_15] : memref<1x128xf32, #tpu.memory_space<vmem>>, vector<1x128xf32>
      %34 = vector.broadcast %33 : vector<1x128xf32> to vector<128x128xf32>
      %35 = arith.addf %32, %34 : vector<128x128xf32>
      %c0_16 = arith.constant 0 : index
      %c0_17 = arith.constant 0 : index
      %36 = vector.load %arg10[%c0_16, %c0_17] : memref<128x128xf32, #tpu.memory_space<vmem>>, vector<128x128xf32>
      tpu.vector_store %arg10[%c0_16, %c0_17], %35 {strides = array<i32>} : memref<128x128xf32, #tpu.memory_space<vmem>>, vector<128x128xf32>,
    } else {
    }
    return
  }
  func.func @transform_0(%arg0: i32, %arg1: i32, %arg2: memref<3xi32, #tpu.memory_space<smem>>) -> (i32, i32) {
    %0 = arith.index_cast %arg0 : i32 to index
    %1 = memref.load %arg2[%0] : memref<3xi32, #tpu.memory_space<smem>>
    %2 = arith.addi %1, %arg1 : i32
    %c4_i32 = arith.constant 4 : i32
    %3 = arith.minsi %2, %c4_i32 : i32
    %c0_i32 = arith.constant 0 : i32
    %c0_i32_0 = arith.constant 0 : i32
    return %3, %c0_i32 : i32, i32
  }
  func.func @transform_1(%arg0: i32, %arg1: i32, %arg2: memref<3xi32, #tpu.memory_space<smem>>) -> (i32, i32) {
    %0 = arith.index_cast %arg0 : i32 to index
    %1 = memref.load %arg2[%0] : memref<3xi32, #tpu.memory_space<smem>>
    %2 = arith.addi %1, %arg1 : i32
    %c4_i32 = arith.constant 4 : i32
    %3 = arith.minsi %2, %c4_i32 : i32
    %c0_i32 = arith.constant 0 : i32
    %c0_i32_0 = arith.constant 0 : i32
    return %3, %c0_i32 : i32, i32
  }
  func.func @transform_2(%arg0: i32, %arg1: i32, %arg2: memref<3xi32, #tpu.memory_space<smem>>) -> (i32, i32) {
    %0 = arith.index_cast %arg0 : i32 to index
    %1 = memref.load %arg2[%0] : memref<3xi32, #tpu.memory_space<smem>>
    %2 = arith.addi %1, %arg1 : i32
    %c4_i32 = arith.constant 4 : i32
    %3 = arith.minsi %2, %c4_i32 : i32
    %c0_i32 = arith.constant 0 : i32
    %c0_i32_0 = arith.constant 0 : i32
    return %c0_i32, %3 : i32, i32
  }
  func.func @transform_3(%arg0: i32, %arg1: i32, %arg2: memref<3xi32, #tpu.memory_space<smem>>) -> (i32, i32) {
    %c0_i32 = arith.constant 0 : i32
    %c0_i32_0 = arith.constant 0 : i32
    return %arg0, %c0_i32 : i32, i32
  }
  func.func @transform_4(%arg0: i32, %arg1: i32, %arg2: memref<3xi32, #tpu.memory_space<smem>>) -> (i32, i32) {
    %c0_i32 = arith.constant 0 : i32
    %c0_i32_0 = arith.constant 0 : i32
    %c0_i32_1 = arith.constant 0 : i32
    return %c0_i32, %c0_i32_0 : i32, i32
  }
  func.func @transform_5(%arg0: i32, %arg1: i32, %arg2: memref<3xi32, #tpu.memory_space<smem>>) -> (i32, i32) {
    %c0_i32 = arith.constant 0 : i32
    %c0_i32_0 = arith.constant 0 : i32
    %c0_i32_1 = arith.constant 0 : i32
    return %c0_i32, %c0_i32_0 : i32, i32
  }
  func.func @transform_6(%arg0: i32, %arg1: i32, %arg2: memref<3xi32, #tpu.memory_space<smem>>) -> (i32, i32) {
    %c0_i32 = arith.constant 0 : i32
    %c0_i32_0 = arith.constant 0 : i32
    %c0_i32_1 = arith.constant 0 : i32
    return %c0_i32, %c0_i32_0 : i32, i32
  }
  func.func @transform_7(%arg0: i32, %arg1: i32, %arg2: memref<3xi32, #tpu.memory_space<smem>>) -> (i32, i32) {
    %c0_i32 = arith.constant 0 : i32
    %c0_i32_0 = arith.constant 0 : i32
    return %arg0, %c0_i32 : i32, i32
  }
}

module attributes {stable_mosaic.version = 11 : i64} {
  func.func @_head_kernel(%arg0: i32, %arg1: memref<128x128xf32, #tpu.memory_space<vmem>>, %arg2: memref<1x128xf32, #tpu.memory_space<vmem>>, %arg3: memref<1x128xf32, #tpu.memory_space<vmem>>, %arg4: memref<128x128xf32, #tpu.memory_space<vmem>>, %arg5: memref<1x128xf32, #tpu.memory_space<vmem>>, %arg6: memref<128x128xf32, #tpu.memory_space<vmem>>) attributes {dimension_semantics = [#tpu.dimension_semantics<parallel>], iteration_bounds = array<i64: 2>, scalar_prefetch = 0 : i64, scratch_operands = 0 : i64, tpu.core_type = #tpu.core_type<tc>, window_params = [{transform_indices = @transform_0, window_bounds = array<i64: 128, 128>}, {pipeline_mode = #tpu.pipeline_mode<synchronous>, transform_indices = @transform_1, window_bounds = array<i64: 1, 128>}, {pipeline_mode = #tpu.pipeline_mode<synchronous>, transform_indices = @transform_2, window_bounds = array<i64: 1, 128>}, {pipeline_mode = #tpu.pipeline_mode<synchronous>, transform_indices = @transform_3, window_bounds = array<i64: 128, 128>}, {pipeline_mode = #tpu.pipeline_mode<synchronous>, transform_indices = @transform_4, window_bounds = array<i64: 1, 128>}, {transform_indices = @transform_5, window_bounds = array<i64: 128, 128>}]} {
    %c0 = arith.constant 0 : index
    %c0_0 = arith.constant 0 : index
    %0 = vector.load %arg1[%c0, %c0_0] : memref<128x128xf32, #tpu.memory_space<vmem>>, vector<128x128xf32>
    %cst = arith.constant dense<0.000000e+00> : vector<128xf32>
    %1 = vector.multi_reduction <add>, %0, %cst [1] : vector<128x128xf32> to vector<128xf32>
    %2 = vector.shape_cast %1 : vector<128xf32> to vector<128x1xf32>
    %cst_1 = arith.constant 1.280000e+02 : f32
    %3 = vector.broadcast %cst_1 : f32 to vector<128x1xf32>
    %4 = arith.divf %2, %3 : vector<128x1xf32>
    %5 = vector.broadcast %4 : vector<128x1xf32> to vector<128x128xf32>
    %6 = arith.subf %0, %5 : vector<128x128xf32>
    %7 = arith.mulf %6, %6 : vector<128x128xf32>
    %cst_2 = arith.constant dense<0.000000e+00> : vector<128xf32>
    %8 = vector.multi_reduction <add>, %7, %cst_2 [1] : vector<128x128xf32> to vector<128xf32>
    %9 = vector.shape_cast %8 : vector<128xf32> to vector<128x1xf32>
    %cst_3 = arith.constant 1.280000e+02 : f32
    %10 = vector.broadcast %cst_3 : f32 to vector<128x1xf32>
    %11 = arith.divf %9, %10 : vector<128x1xf32>
    %cst_4 = arith.constant 9.99999974E-6 : f32
    %12 = vector.broadcast %cst_4 : f32 to vector<128x1xf32>
    %13 = arith.addf %11, %12 : vector<128x1xf32>
    %14 = math.rsqrt %13 : vector<128x1xf32>
    %15 = vector.broadcast %14 : vector<128x1xf32> to vector<128x128xf32>
    %16 = arith.mulf %6, %15 : vector<128x128xf32>
    %c0_5 = arith.constant 0 : index
    %c0_6 = arith.constant 0 : index
    %17 = vector.load %arg2[%c0_5, %c0_6] : memref<1x128xf32, #tpu.memory_space<vmem>>, vector<1x128xf32>
    %18 = vector.broadcast %17 : vector<1x128xf32> to vector<128x128xf32>
    %19 = arith.mulf %16, %18 : vector<128x128xf32>
    %c0_7 = arith.constant 0 : index
    %c0_8 = arith.constant 0 : index
    %20 = vector.load %arg3[%c0_7, %c0_8] : memref<1x128xf32, #tpu.memory_space<vmem>>, vector<1x128xf32>
    %21 = vector.broadcast %20 : vector<1x128xf32> to vector<128x128xf32>
    %22 = arith.addf %19, %21 : vector<128x128xf32>
    %cst_9 = arith.constant 0.000000e+00 : f32
    %23 = vector.broadcast %cst_9 : f32 to vector<128x128xf32>
    %24 = arith.maximumf %22, %23 : vector<128x128xf32>
    %c0_10 = arith.constant 0 : index
    %c0_11 = arith.constant 0 : index
    %25 = vector.load %arg4[%c0_10, %c0_11] : memref<128x128xf32, #tpu.memory_space<vmem>>, vector<128x128xf32>
    %cst_12 = arith.constant dense<0.000000e+00> : vector<128x128xf32>
    %26 = tpu.matmul %24, %25, %cst_12 {dimension_numbers = #tpu.dot_dimension_numbers<[1], [0], [0], [1], [0, 0, 1, 1], [], []>} : vector<128x128xf32>, vector<128x128xf32>, vector<128x128xf32> -> vector<128x128xf32>
    %c0_13 = arith.constant 0 : index
    %c0_14 = arith.constant 0 : index
    %27 = vector.load %arg5[%c0_13, %c0_14] : memref<1x128xf32, #tpu.memory_space<vmem>>, vector<1x128xf32>
    %28 = vector.broadcast %27 : vector<1x128xf32> to vector<128x128xf32>
    %29 = arith.addf %26, %28 : vector<128x128xf32>
    %c0_15 = arith.constant 0 : index
    %c0_16 = arith.constant 0 : index
    %30 = vector.load %arg6[%c0_15, %c0_16] : memref<128x128xf32, #tpu.memory_space<vmem>>, vector<128x128xf32>
    tpu.vector_store %arg6[%c0_15, %c0_16], %29 {strides = array<i32>} : memref<128x128xf32, #tpu.memory_space<vmem>>, vector<128x128xf32>,
    return
  }
  func.func @transform_0(%arg0: i32) -> (i32, i32) {
    %c0_i32 = arith.constant 0 : i32
    %c0_i32_0 = arith.constant 0 : i32
    return %arg0, %c0_i32 : i32, i32
  }
  func.func @transform_1(%arg0: i32) -> (i32, i32) {
    %c0_i32 = arith.constant 0 : i32
    %c0_i32_0 = arith.constant 0 : i32
    %c0_i32_1 = arith.constant 0 : i32
    return %c0_i32, %c0_i32_0 : i32, i32
  }
  func.func @transform_2(%arg0: i32) -> (i32, i32) {
    %c0_i32 = arith.constant 0 : i32
    %c0_i32_0 = arith.constant 0 : i32
    %c0_i32_1 = arith.constant 0 : i32
    return %c0_i32, %c0_i32_0 : i32, i32
  }
  func.func @transform_3(%arg0: i32) -> (i32, i32) {
    %c0_i32 = arith.constant 0 : i32
    %c0_i32_0 = arith.constant 0 : i32
    %c0_i32_1 = arith.constant 0 : i32
    return %c0_i32, %c0_i32_0 : i32, i32
  }
  func.func @transform_4(%arg0: i32) -> (i32, i32) {
    %c0_i32 = arith.constant 0 : i32
    %c0_i32_0 = arith.constant 0 : i32
    %c0_i32_1 = arith.constant 0 : i32
    return %c0_i32, %c0_i32_0 : i32, i32
  }
  func.func @transform_5(%arg0: i32) -> (i32, i32) {
    %c0_i32 = arith.constant 0 : i32
    %c0_i32_0 = arith.constant 0 : i32
    return %arg0, %c0_i32 : i32, i32
  }
}

</mosaic_0001>

<bundles_post_ra>
// kernel: deeper_gcn_forward.7
= control target key start
LH: loop header
LB: loop body
LE: loop exit
PB: predicated region body
PF: predicated region fallthrough
CT: control target
= control target key end

     0   :  { %s935_s18 = smov 0   ;;  %s1182_s0 = inlined_call_operand.vmem [shape: f32[256,128], index: 0, kind: input, shape index: {}]   ;;  %s1183_s1 = inlined_call_operand.vmem [shape: f32[1,128], index: 1, kind: input, shape index: {}]   ;;  %s1184_s2 = inlined_call_operand.vmem [shape: f32[1,128], index: 2, kind: input, shape index: {}]   ;;  %s1185_s3 = inlined_call_operand.vmem [shape: f32[128,128], index: 3, kind: input, shape index: {}]   ;;  %s1186_s4 = inlined_call_operand.vmem [shape: f32[1,128], index: 4, kind: input, shape index: {}]   ;;  %s1187_s5 = inlined_call_operand.vmem [shape: f32[256,128], index: 5, kind: output, shape index: {}]  }
   0x1 LB: > { %s723_s19 = sadd.s32 4294967295, %s903_s18   ;;  %p727_p0 = scmp.ge.s32.totalorder %s903_s18, 1  ;;  %s903_s18 = sphi %s935_s18, %s15_s18  }
   0x2   : > { %p188_p1 = scmp.lt.s32.totalorder %s903_s18, 3 }
   0x4   : > { %p189_p2 = pnand %p727_p0, %p188_p1 }
   0x5   : > { %s728_s20 = sshll.u32 (!%p189_p2), %s723_s19, 4 }
   0x6   : > { %192 = sbr.rel (%p189_p2) target bundleno = 553 (0x229), region = 40  ;;  %p217_p3 = scmp.lt.s32.totalorder (!%p189_p2), %s728_s20, 31 }
   0xb   : > { %s1189_s20 = smov (!%p217_p3, %s728_s20), 31  ;;  %v498_v16 = vld [vmem:[%s1185_s3 + $0x78] sm:$0xff]  ;;  %v497_v49 = vld [vmem:[%s1185_s3 + $0x70] sm:$0xff]  ;;  %v496_v53 = vld [vmem:[%s1185_s3 + $0x68] sm:$0xff] }
   0xc   : > { %s729_s21 = sshll.u32 %s1189_s20, 3  ;;  %769 = vmatprep.subr.mxu0 %v498_v16  ;;  %825 = vmatprep.subr.mxu1 %v498_v16  ;;  %v495_v62 = vld [vmem:[%s1185_s3 + $0x60] sm:$0xff] }
   0xd   : > { %s220_s24 = scalar_lea.vmem %s1182_s0, %s729_s21  ;;  %770 = vmatpush3.msra.mxu0 %v498_v16  ;;  %841 = vmatpush3.msra.mxu1 %v498_v16  ;;  %v492_v16 = vld [vmem:[%s1185_s3 + $0x48] sm:$0xff]  ;;  %s1161_s19 = scalar_lea.vmem %s1187_s5, %s729_s21 }
   0xe   : > { %v228_v0 = vld [vmem:[%s220_s24] sm:$0xff]  ;;  %v229_v1 = vld [vmem:[%s220_s24 + $0x8] sm:$0xff]  ;;  %v230_v4 = vld [vmem:[%s220_s24 + $0x10] sm:$0xff]  ;;  %771 = vmatprep.subr.mxu0 %v497_v49  ;;  %826 = vmatprep.subr.mxu1 %v497_v49 }
   0xf   : > { %244 = vadd.xlane.f32.xlu0 %v228_v0  ;;  %246 = vadd.xlane.f32.xlu1 %v229_v1  ;;  %v236_v2 = vld [vmem:[%s220_s24 + $0x40] sm:$0xff]  ;;  %v237_v3 = vld [vmem:[%s220_s24 + $0x48] sm:$0xff]  ;;  %v238_v5 = vld [vmem:[%s220_s24 + $0x50] sm:$0xff] }
  0x10   : > { %v231_v6 = vld [vmem:[%s220_s24 + $0x18] sm:$0xff]  ;;  %v951_v8 = vld [vmem:[%s220_s24 + $0x20] sm:$0xff]  ;;  %v957_v10 = vld [vmem:[%s220_s24 + $0x28] sm:$0xff]  ;;  %772 = vmatpush3.msra.mxu0 %v497_v49  ;;  %842 = vmatpush3.msra.mxu1 %v497_v49 }
  0x11   : > { %v239_v7 = vld [vmem:[%s220_s24 + $0x58] sm:$0xff]  ;;  %v953_v9 = vld [vmem:[%s220_s24 + $0x60] sm:$0xff]  ;;  %v959_v11 = vld [vmem:[%s220_s24 + $0x68] sm:$0xff]  ;;  %773 = vmatprep.subr.mxu0 %v496_v53  ;;  %827 = vmatprep.subr.mxu1 %v496_v53 }
  0x12   : > { %v963_v12 = vld [vmem:[%s220_s24 + $0x30] sm:$0xff]  ;;  %v969_v14 = vld [vmem:[%s220_s24 + $0x38] sm:$0xff]  ;;  %774 = vmatpush3.msra.mxu0 %v496_v53  ;;  %843 = vmatpush3.msra.mxu1 %v496_v53 }
  0x13   : > { %260 = vadd.xlane.f32.xlu0 %v236_v2  ;;  %262 = vadd.xlane.f32.xlu1 %v237_v3  ;;  %v965_v13 = vld [vmem:[%s220_s24 + $0x70] sm:$0xff]  ;;  %v971_v15 = vld [vmem:[%s220_s24 + $0x78] sm:$0xff] }
  0x14   : > { %775 = vmatprep.subr.mxu0 %v495_v62  ;;  %828 = vmatprep.subr.mxu1 %v495_v62 }
  0x15   : > { %776 = vmatpush3.msra.mxu0 %v495_v62  ;;  %844 = vmatpush3.msra.mxu1 %v495_v62 }
  0x17   : > { %248 = vadd.xlane.f32.xlu0 %v230_v4  ;;  %264 = vadd.xlane.f32.xlu1 %v238_v5 }
  0x1b   : > { %250 = vadd.xlane.f32.xlu0 %v231_v6  ;;  %266 = vadd.xlane.f32.xlu1 %v239_v7 }
  0x1f   : > { %252 = vadd.xlane.f32.xlu0 %v951_v8  ;;  %268 = vadd.xlane.f32.xlu1 %v953_v9 }
  0x23   : > { %254 = vadd.xlane.f32.xlu0 %v957_v10  ;;  %270 = vadd.xlane.f32.xlu1 %v959_v11 }
  0x27   : > { %256 = vadd.xlane.f32.xlu0 %v963_v12  ;;  %272 = vadd.xlane.f32.xlu1 %v965_v13 }
  0x2b   : > { %258 = vadd.xlane.f32.xlu0 %v969_v14  ;;  %274 = vadd.xlane.f32.xlu1 %v971_v15 }
  0x98   : > { %v245_v17 = vpop.xlane.xlu0 %244  ;;  %v247_v18 = vpop.xlane.xlu1 %246 }
  0x99   : > { %v277_v19 = vmul.f32 0.0078125, %v245_v17  ;;  %v278_v20 = vmul.f32 0.0078125, %v247_v18 }
  0x9b   : > { %v978_v21 = vsub.f32 %v228_v0, %v277_v19  ;;  %v980_v22 = vsub.f32 %v229_v1, %v278_v20 }
  0x9c   : > { %v261_v23 = vpop.xlane.xlu0 %260  ;;  %v263_v24 = vpop.xlane.xlu1 %262 }
  0x9d   : > { %v285_v25 = vmul.f32 0.0078125, %v261_v23  ;;  %v309_v26 = vmul.f32 %v978_v21, %v978_v21  ;;  %v286_v27 = vmul.f32 0.0078125, %v263_v24  ;;  %v310_v30 = vmul.f32 %v980_v22, %v980_v22 }
  0x9f   : > { %v984_v28 = vsub.f32 %v236_v2, %v285_v25  ;;  %325 = vadd.xlane.f32.xlu0 %v309_v26  ;;  %v986_v29 = vsub.f32 %v237_v3, %v286_v27  ;;  %v494_v2 = vld [vmem:[%s1185_s3 + $0x58] sm:$0xff] }
  0xa0   : > { %v249_v31 = vpop.xlane.xlu0 %248  ;;  %v265_v32 = vpop.xlane.xlu1 %264  ;;  %777 = vmatprep.subr.mxu0 %v494_v2  ;;  %829 = vmatprep.subr.mxu1 %v494_v2  ;;  %v490_v27 = vld [vmem:[%s1185_s3 + $0x38] sm:$0xff] }
  0xa1   : > { %v279_v33 = vmul.f32 0.0078125, %v249_v31  ;;  %v317_v34 = vmul.f32 %v984_v28, %v984_v28  ;;  %v287_v35 = vmul.f32 0.0078125, %v265_v32  ;;  %v318_v38 = vmul.f32 %v986_v29, %v986_v29  ;;  %778 = vmatpush3.msra.mxu0 %v494_v2  ;;  %845 = vmatpush3.msra.mxu1 %v494_v2  ;;  %v487_v31 = vld [vmem:[%s1185_s3 + $0x20] sm:$0xff]  ;;  %v486_v32 = vld [vmem:[%s1185_s3 + $0x18] sm:$0xff] }
  0xa3   : > { %v992_v36 = vsub.f32 %v230_v4, %v279_v33  ;;  %327 = vadd.xlane.f32.xlu0 %v310_v30  ;;  %341 = vadd.xlane.f32.xlu1 %v317_v34  ;;  %v994_v37 = vsub.f32 %v238_v5, %v287_v35  ;;  %v488_v30 = vld [vmem:[%s1185_s3 + $0x28] sm:$0xff]  ;;  %v485_v33 = vld [vmem:[%s1185_s3 + $0x10] sm:$0xff]  ;;  %v483_v35 = vld [vmem:[%s1185_s3] sm:$0xff] }
  0xa4   : > { %v251_v39 = vpop.xlane.xlu0 %250  ;;  %v267_v40 = vpop.xlane.xlu1 %266  ;;  %v484_v34 = vld [vmem:[%s1185_s3 + $0x8] sm:$0xff] }
  0xa5   : > { %v280_v41 = vmul.f32 0.0078125, %v251_v39  ;;  %v311_v42 = vmul.f32 %v992_v36, %v992_v36  ;;  %v288_v43 = vmul.f32 0.0078125, %v267_v40  ;;  %v319_v46 = vmul.f32 %v994_v37, %v994_v37 }
  0xa7   : > { %v1000_v44 = vsub.f32 %v231_v6, %v280_v41  ;;  %343 = vadd.xlane.f32.xlu1 %v318_v38  ;;  %329 = vadd.xlane.f32.xlu0 %v311_v42  ;;  %v1002_v45 = vsub.f32 %v239_v7, %v288_v43 }
  0xa8   : > { %v253_v47 = vpop.xlane.xlu0 %252  ;;  %v269_v48 = vpop.xlane.xlu1 %268 }
  0xa9   : > { %v281_v50 = vmul.f32 0.0078125, %v253_v47  ;;  %v312_v51 = vmul.f32 %v1000_v44, %v1000_v44  ;;  %v289_v52 = vmul.f32 0.0078125, %v269_v48  ;;  %v320_v56 = vmul.f32 %v1002_v45, %v1002_v45 }
  0xab   : > { %v1015_v54 = vsub.f32 %v951_v8, %v281_v50  ;;  %345 = vadd.xlane.f32.xlu1 %v319_v46  ;;  %331 = vadd.xlane.f32.xlu0 %v312_v51  ;;  %v1018_v55 = vsub.f32 %v953_v9, %v289_v52  ;;  %v493_v8 = vld [vmem:[%s1185_s3 + $0x50] sm:$0xff] }
  0xac   : > { %v255_v57 = vpop.xlane.xlu0 %254  ;;  %v271_v58 = vpop.xlane.xlu1 %270  ;;  %779 = vmatprep.subr.mxu0 %v493_v8  ;;  %830 = vmatprep.subr.mxu1 %v493_v8 }
  0xad   : > { %v282_v59 = vmul.f32 0.0078125, %v255_v57  ;;  %v313_v60 = vmul.f32 %v1015_v54, %v1015_v54  ;;  %v290_v61 = vmul.f32 0.0078125, %v271_v58  ;;  %v321_v1 = vmul.f32 %v1018_v55, %v1018_v55  ;;  %780 = vmatpush3.msra.mxu0 %v493_v8  ;;  %846 = vmatpush3.msra.mxu1 %v493_v8 }
  0xae   : > { %781 = vmatprep.subr.mxu0 %v492_v16  ;;  %831 = vmatprep.subr.mxu1 %v492_v16 }
  0xaf   : > { %v1028_v63 = vsub.f32 %v957_v10, %v282_v59  ;;  %347 = vadd.xlane.f32.xlu1 %v320_v56  ;;  %333 = vadd.xlane.f32.xlu0 %v313_v60  ;;  %v1031_v0 = vsub.f32 %v959_v11, %v290_v61 }
  0xb0   : > { %v257_v3 = vpop.xlane.xlu0 %256  ;;  %v273_v4 = vpop.xlane.xlu1 %272  ;;  %782 = vmatpush3.msra.mxu0 %v492_v16  ;;  %847 = vmatpush3.msra.mxu1 %v492_v16 }
  0xb1   : > { %v283_v5 = vmul.f32 0.0078125, %v257_v3  ;;  %v314_v6 = vmul.f32 %v1028_v63, %v1028_v63  ;;  %v291_v7 = vmul.f32 0.0078125, %v273_v4  ;;  %v322_v11 = vmul.f32 %v1031_v0, %v1031_v0 }
  0xb3   : > { %v1044_v9 = vsub.f32 %v963_v12, %v283_v5  ;;  %349 = vadd.xlane.f32.xlu1 %v321_v1  ;;  %335 = vadd.xlane.f32.xlu0 %v314_v6  ;;  %v1047_v10 = vsub.f32 %v965_v13, %v291_v7  ;;  %v491_v13 = vld [vmem:[%s1185_s3 + $0x40] sm:$0xff] }
  0xb4   : > { %v259_v17 = vpop.xlane.xlu0 %258  ;;  %v275_v18 = vpop.xlane.xlu1 %274  ;;  %783 = vmatprep.subr.mxu0 %v491_v13  ;;  %832 = vmatprep.subr.mxu1 %v491_v13  ;;  %v1098_v6 = vld [vmem:[%s1183_s1] ss:$0 sm:$0xff] }
  0xb5   : > { %v284_v19 = vmul.f32 0.0078125, %v259_v17  ;;  %v315_v12 = vmul.f32 %v1044_v9, %v1044_v9  ;;  %v292_v20 = vmul.f32 0.0078125, %v275_v18  ;;  %v323_v25 = vmul.f32 %v1047_v10, %v1047_v10  ;;  %784 = vmatpush3.msra.mxu0 %v491_v13  ;;  %848 = vmatpush3.msra.mxu1 %v491_v13  ;;  %v1104_v18 = vld [vmem:[%s1184_s2] ss:$0 sm:$0xff] }
  0xb6   : > { %785 = vmatprep.subr.mxu0 %v490_v27  ;;  %833 = vmatprep.subr.mxu1 %v490_v27 }
  0xb7   : > { %v1060_v23 = vsub.f32 %v969_v14, %v284_v19  ;;  %351 = vadd.xlane.f32.xlu1 %v322_v11  ;;  %337 = vadd.xlane.f32.xlu0 %v315_v12  ;;  %v1063_v24 = vsub.f32 %v971_v15, %v292_v20  ;;  %v489_v15 = vld [vmem:[%s1185_s3 + $0x30] sm:$0xff] }
  0xb8   : > { %786 = vmatpush3.msra.mxu0 %v490_v27  ;;  %849 = vmatpush3.msra.mxu1 %v490_v27 }
  0xb9   : > { %v316_v26 = vmul.f32 %v1060_v23, %v1060_v23  ;;  %v324_v14 = vmul.f32 %v1063_v24, %v1063_v24  ;;  %787 = vmatprep.subr.mxu0 %v489_v15  ;;  %834 = vmatprep.subr.mxu1 %v489_v15 }
  0xba   : > { %788 = vmatpush3.msra.mxu0 %v489_v15  ;;  %850 = vmatpush3.msra.mxu1 %v489_v15 }
  0xbb   : > { %353 = vadd.xlane.f32.xlu1 %v323_v25  ;;  %339 = vadd.xlane.f32.xlu0 %v316_v26 }
  0xbc   : > { %789 = vmatprep.subr.mxu0 %v488_v30  ;;  %835 = vmatprep.subr.mxu1 %v488_v30 }
  0xbd   : > { %790 = vmatpush3.msra.mxu0 %v488_v30  ;;  %851 = vmatpush3.msra.mxu1 %v488_v30 }
  0xbe   : > { %791 = vmatprep.subr.mxu0 %v487_v31  ;;  %836 = vmatprep.subr.mxu1 %v487_v31 }
  0xbf   : > { %355 = vadd.xlane.f32.xlu1 %v324_v14  ;;  %792 = vmatpush3.msra.mxu0 %v487_v31 }
  0xc0   : > { %793 = vmatprep.subr.mxu0 %v486_v32  ;;  %852 = vmatpush3.msra.mxu1 %v487_v31 }
  0xc1   : > { %794 = vmatpush3.msra.mxu0 %v486_v32  ;;  %837 = vmatprep.subr.mxu1 %v486_v32 }
  0xc2   : > { %795 = vmatprep.subr.mxu0 %v485_v33  ;;  %853 = vmatpush3.msra.mxu1 %v486_v32 }
  0xc3   : > { %796 = vmatpush3.msra.mxu0 %v485_v33  ;;  %838 = vmatprep.subr.mxu1 %v485_v33 }
  0xc4   : > { %797 = vmatprep.subr.mxu0 %v484_v34  ;;  %854 = vmatpush3.msra.mxu1 %v485_v33 }
  0xc5   : > { %798 = vmatpush3.msra.mxu0 %v484_v34  ;;  %839 = vmatprep.subr.mxu1 %v484_v34 }
  0xc6   : > { %799 = vmatprep.subr.mxu0 %v483_v35  ;;  %855 = vmatpush3.msra.mxu1 %v484_v34 }
  0xc7   : > { %800 = vmatpush3.msra.mxu0 %v483_v35  ;;  %840 = vmatprep.subr.mxu1 %v483_v35 }
  0xc8   : > { %856 = vmatpush3.msra.mxu1 %v483_v35 }
 0x128   : > { %v326_v38 = vpop.xlane.xlu0 %325 }
 0x129   : > { %v357_v39 = vmul.f32 0.0078125, %v326_v38 }
 0x12b   : > { %v373_v40 = vadd.f32 1e-05, %v357_v39 }
 0x12c   : > { %v342_v41 = vpop.xlane.xlu1 %341  ;;  %v328_v42 = vpop.xlane.xlu0 %327 }
 0x12d   : > { %865 = vrsqrt.f32 %v373_v40  ;;  %v365_v43 = vmul.f32 0.0078125, %v342_v41  ;;  %v358_v46 = vmul.f32 0.0078125, %v328_v42 }
 0x12f   : > { %v381_v47 = vadd.f32 1e-05, %v365_v43  ;;  %v374_v48 = vadd.f32 1e-05, %v358_v46 }
 0x130   : > { %v344_v49 = vpop.xlane.xlu1 %343  ;;  %v330_v50 = vpop.xlane.xlu0 %329 }
 0x131   : > { %867 = vrsqrt.f32 %v381_v47  ;;  %v366_v51 = vmul.f32 0.0078125, %v344_v49  ;;  %v359_v52 = vmul.f32 0.0078125, %v330_v50 }
 0x132   : > { %869 = vrsqrt.f32 %v374_v48 }
 0x133   : > { %v382_v53 = vadd.f32 1e-05, %v366_v51  ;;  %v375_v56 = vadd.f32 1e-05, %v359_v52 }
 0x134   : > { %v346_v57 = vpop.xlane.xlu1 %345  ;;  %v332_v58 = vpop.xlane.xlu0 %331 }
 0x135   : > { %871 = vrsqrt.f32 %v382_v53  ;;  %v367_v59 = vmul.f32 0.0078125, %v346_v57  ;;  %v360_v60 = vmul.f32 0.0078125, %v332_v58 }
 0x136   : > { %873 = vrsqrt.f32 %v375_v56 }
 0x137   : > { %v383_v61 = vadd.f32 1e-05, %v367_v59  ;;  %v376_v62 = vadd.f32 1e-05, %v360_v60 }
 0x138   : > { %v348_v1 = vpop.xlane.xlu1 %347  ;;  %v334_v2 = vpop.xlane.xlu0 %333 }
 0x139   : > { %875 = vrsqrt.f32 %v383_v61  ;;  %v368_v3 = vmul.f32 0.0078125, %v348_v1  ;;  %v361_v4 = vmul.f32 0.0078125, %v334_v2 }
 0x13a   : > { %v866_v5 = vpop.eup %865  ;;  %877 = vrsqrt.f32 %v376_v62 }
 0x13b   : > { %v384_v7 = vadd.f32 1e-05, %v368_v3  ;;  %v377_v8 = vadd.f32 1e-05, %v361_v4  ;;  %v405_v11 = vmul.f32 %v866_v5, %v978_v21 }
 0x13c   : > { %v350_v16 = vpop.xlane.xlu1 %349  ;;  %v336_v17 = vpop.xlane.xlu0 %335 }
 0x13d   : > { %879 = vrsqrt.f32 %v384_v7  ;;  %v369_v19 = vmul.f32 0.0078125, %v350_v16  ;;  %v362_v12 = vmul.f32 0.0078125, %v336_v17  ;;  %v428_v20 = vmul.f32 %v1098_v6, %v405_v11 }
 0x13e   : > { %v868_v13 = vpop.eup %867  ;;  %881 = vrsqrt.f32 %v377_v8 }
 0x13f   : > { %v870_v25 = vpop.eup %869  ;;  %v385_v26 = vadd.f32 1e-05, %v369_v19  ;;  %v378_v27 = vadd.f32 1e-05, %v362_v12  ;;  %v451_v14 = vadd.f32 %v1104_v18, %v428_v20  ;;  %v413_v21 = vmul.f32 %v868_v13, %v984_v28 }
 0x140   : > { %v352_v15 = vpop.xlane.xlu1 %351  ;;  %v338_v30 = vpop.xlane.xlu0 %337  ;;  %v406_v31 = vmul.f32 %v870_v25, %v980_v22 }
 0x141   : > { %883 = vrsqrt.f32 %v385_v26  ;;  %v370_v32 = vmul.f32 0.0078125, %v352_v15  ;;  %v363_v33 = vmul.f32 0.0078125, %v338_v30  ;;  %v467_v34 = vmax.f32 %v451_v14, 0.0 }
 0x142   : > { %v872_v35 = vpop.eup %871  ;;  %885 = vrsqrt.f32 %v378_v27  ;;  %v429_v38 = vmul.f32 %v1098_v6, %v406_v31  ;;  %v436_v39 = vmul.f32 %v1098_v6, %v413_v21 }
 0x143   : > { %v874_v40 = vpop.eup %873  ;;  %v386_v41 = vadd.f32 1e-05, %v370_v32  ;;  %v379_v42 = vadd.f32 1e-05, %v363_v33  ;;  %801 = vmatprep.mubr.f32.mxu0 %v467_v34  ;;  %v414_v28 = vmul.f32 %v872_v35, %v986_v29 }
 0x144   : > { %v354_v43 = vpop.xlane.xlu1 %353  ;;  %v340_v46 = vpop.xlane.xlu0 %339  ;;  %v452_v22 = vadd.f32 %v1104_v18, %v429_v38  ;;  %v459_v47 = vadd.f32 %v1104_v18, %v436_v39  ;;  %v407_v48 = vmul.f32 %v874_v40, %v992_v36 }
 0x145   : > { %887 = vrsqrt.f32 %v386_v41  ;;  %v371_v49 = vmul.f32 0.0078125, %v354_v43  ;;  %v364_v50 = vmul.f32 0.0078125, %v340_v46  ;;  %v437_v51 = vmul.f32 %v1098_v6, %v414_v28 }
 0x146   : > { %v876_v52 = vpop.eup %875  ;;  %889 = vrsqrt.f32 %v379_v42  ;;  %v468_v53 = vmax.f32 %v452_v22, 0.0  ;;  %v475_v56 = vmax.f32 %v459_v47, 0.0  ;;  %v430_v57 = vmul.f32 %v1098_v6, %v407_v48 }
 0x147   : > { %v878_v29 = vpop.eup %877  ;;  %v387_v58 = vadd.f32 1e-05, %v371_v49  ;;  %v380_v59 = vadd.f32 1e-05, %v364_v50  ;;  %v460_v60 = vadd.f32 %v1104_v18, %v437_v51  ;;  %v415_v61 = vmul.f32 %v876_v52, %v994_v37 }
 0x148   : > { %802 = vmatmul.mubr.f32.vlgmr.msra.gmra.mxu0 %v468_v53  ;;  %813 = vmatprep.mubr.f32.mxu1 %v475_v56  ;;  %v356_v36 = vpop.xlane.xlu1 %355  ;;  %v453_v62 = vadd.f32 %v1104_v18, %v430_v57  ;;  %v408_v1 = vmul.f32 %v878_v29, %v1000_v44 }
 0x149   : > { %891 = vrsqrt.f32 %v387_v58  ;;  %v372_v2 = vmul.f32 0.0078125, %v356_v36  ;;  %v476_v3 = vmax.f32 %v460_v60, 0.0  ;;  %v438_v4 = vmul.f32 %v1098_v6, %v415_v61 }
 0x14a   : > { %v880_v5 = vpop.eup %879  ;;  %893 = vrsqrt.f32 %v380_v59  ;;  %v469_v7 = vmax.f32 %v453_v62, 0.0  ;;  %v431_v8 = vmul.f32 %v1098_v6, %v408_v1  ;;  %v734_v59 = vld [vmem:[%s1186_s4] ss:$0 sm:$0xff] }
 0x14b   : > { %v882_v11 = vpop.eup %881  ;;  %v388_v16 = vadd.f32 1e-05, %v372_v2  ;;  %814 = vmatmul.mubr.f32.vlgmr.msra.gmra.mxu1 %v476_v3  ;;  %v461_v37 = vadd.f32 %v1104_v18, %v438_v4  ;;  %v416_v17 = vmul.f32 %v880_v5, %v1002_v45 }
 0x14c   : > { %804 = vmatprep.mubr.f32.mxu0 %v469_v7  ;;  %v454_v44 = vadd.f32 %v1104_v18, %v431_v8  ;;  %v409_v19 = vmul.f32 %v882_v11, %v1015_v54 }
 0x14d   : > { %895 = vrsqrt.f32 %v388_v16  ;;  %v477_v12 = vmax.f32 %v461_v37, 0.0  ;;  %v439_v20 = vmul.f32 %v1098_v6, %v416_v17 }
 0x14e   : > { %v884_v13 = vpop.eup %883  ;;  %v470_v25 = vmax.f32 %v454_v44, 0.0  ;;  %v432_v26 = vmul.f32 %v1098_v6, %v409_v19 }
 0x14f   : > { %v886_v27 = vpop.eup %885  ;;  %816 = vmatprep.mubr.f32.mxu1 %v477_v12  ;;  %v462_v14 = vadd.f32 %v1104_v18, %v439_v20  ;;  %v417_v21 = vmul.f32 %v884_v13, %v1018_v55 }
 0x150   : > { %805 = vmatmul.mubr.f32.gmra.mxu0 %v470_v25  ;;  %v455_v45 = vadd.f32 %v1104_v18, %v432_v26  ;;  %v410_v15 = vmul.f32 %v886_v27, %v1028_v63 }
 0x151   : > { %v478_v54 = vmax.f32 %v462_v14, 0.0  ;;  %v440_v30 = vmul.f32 %v1098_v6, %v417_v21 }
 0x152   : > { %v888_v31 = vpop.eup %887  ;;  %v471_v32 = vmax.f32 %v455_v45, 0.0  ;;  %v433_v33 = vmul.f32 %v1098_v6, %v410_v15 }
 0x153   : > { %v890_v34 = vpop.eup %889  ;;  %817 = vmatmul.mubr.f32.gmra.mxu1 %v478_v54  ;;  %v463_v35 = vadd.f32 %v1104_v18, %v440_v30  ;;  %v418_v38 = vmul.f32 %v888_v31, %v1031_v0 }
 0x154   : > { %807 = vmatprep.mubr.f32.mxu0 %v471_v32  ;;  %v456_v55 = vadd.f32 %v1104_v18, %v433_v33  ;;  %v411_v39 = vmul.f32 %v890_v34, %v1044_v9 }
 0x155   : > { %v479_v40 = vmax.f32 %v463_v35, 0.0  ;;  %v441_v63 = vmul.f32 %v1098_v6, %v418_v38 }
 0x156   : > { %v892_v41 = vpop.eup %891  ;;  %v472_v42 = vmax.f32 %v456_v55, 0.0  ;;  %v434_v28 = vmul.f32 %v1098_v6, %v411_v39 }
 0x157   : > { %v894_v43 = vpop.eup %893  ;;  %819 = vmatprep.mubr.f32.mxu1 %v479_v40  ;;  %v464_v46 = vadd.f32 %v1104_v18, %v441_v63  ;;  %v419_v22 = vmul.f32 %v892_v41, %v1047_v10 }
 0x158   : > { %808 = vmatmul.mubr.f32.gmra.mxu0 %v472_v42  ;;  %v457_v0 = vadd.f32 %v1104_v18, %v434_v28  ;;  %v412_v47 = vmul.f32 %v894_v43, %v1060_v23 }
 0x159   : > { %v480_v48 = vmax.f32 %v464_v46, 0.0  ;;  %v442_v9 = vmul.f32 %v1098_v6, %v419_v22 }
 0x15a   : > { %v896_v49 = vpop.eup %895  ;;  %v473_v50 = vmax.f32 %v457_v0, 0.0  ;;  %v435_v51 = vmul.f32 %v1098_v6, %v412_v47 }
 0x15b   : > { %820 = vmatmul.mubr.f32.gmra.mxu1 %v480_v48  ;;  %v465_v52 = vadd.f32 %v1104_v18, %v442_v9  ;;  %v420_v53 = vmul.f32 %v896_v49, %v1063_v24 }
 0x15c   : > { %810 = vmatprep.mubr.f32.mxu0 %v473_v50  ;;  %v458_v10 = vadd.f32 %v1104_v18, %v435_v51 }
 0x15d   : > { %v481_v56 = vmax.f32 %v465_v52, 0.0  ;;  %v443_v57 = vmul.f32 %v1098_v6, %v420_v53 }
 0x15e   : > { %v474_v23 = vmax.f32 %v458_v10, 0.0 }
 0x15f   : > { %822 = vmatprep.mubr.f32.mxu1 %v481_v56  ;;  %v466_v29 = vadd.f32 %v1104_v18, %v443_v57 }
 0x160   : > { %811 = vmatmul.mubr.f32.gmra.mxu0 %v474_v23 }
 0x161   : > { %v482_v58 = vmax.f32 %v466_v29, 0.0 }
 0x163   : > { %823 = vmatmul.mubr.f32.gmra.mxu1 %v482_v58 }
 0x208   : > { %v803_v24 = vpop.f32.mrf.mxu0 }
 0x209   : > { %v578_v6 = vadd.f32 %v803_v24, %v734_v59 }
 0x20a   : > { %v572_v18 = vpop.f32.mrf.mxu0 }
 0x20b   : > { %652 = vst [vmem:[%s1161_s19 + $0x8] sm:$0xff] %v578_v6  ;;  %v573_v60 = vadd.f32 %v734_v59, %v572_v18  ;;  %v815_v61 = vpop.f32.mrf.mxu1 }
 0x20c   : > { %v618_v36 = vadd.f32 %v815_v61, %v734_v59 }
 0x20d   : > { %651 = vst [vmem:[%s1161_s19] sm:$0xff] %v573_v60  ;;  %v612_v62 = vpop.f32.mrf.mxu1 }
 0x20e   : > { %660 = vst [vmem:[%s1161_s19 + $0x48] sm:$0xff] %v618_v36  ;;  %v613_v1 = vadd.f32 %v734_v59, %v612_v62 }
 0x210   : > { %659 = vst [vmem:[%s1161_s19 + $0x40] sm:$0xff] %v613_v1  ;;  %v806_v2 = vpop.f32.mrf.mxu0 }
 0x211   : > { %v588_v3 = vadd.f32 %v806_v2, %v734_v59 }
 0x212   : > { %v582_v4 = vpop.f32.mrf.mxu0 }
 0x213   : > { %654 = vst [vmem:[%s1161_s19 + $0x18] sm:$0xff] %v588_v3  ;;  %v583_v5 = vadd.f32 %v734_v59, %v582_v4  ;;  %v818_v7 = vpop.f32.mrf.mxu1 }
 0x214   : > { %v628_v8 = vadd.f32 %v818_v7, %v734_v59 }
 0x215   : > { %653 = vst [vmem:[%s1161_s19 + $0x10] sm:$0xff] %v583_v5  ;;  %v622_v11 = vpop.f32.mrf.mxu1 }
 0x216   : > { %662 = vst [vmem:[%s1161_s19 + $0x58] sm:$0xff] %v628_v8  ;;  %v623_v16 = vadd.f32 %v734_v59, %v622_v11 }
 0x218   : > { %661 = vst [vmem:[%s1161_s19 + $0x50] sm:$0xff] %v623_v16  ;;  %v809_v37 = vpop.f32.mrf.mxu0 }
 0x219   : > { %v598_v17 = vadd.f32 %v809_v37, %v734_v59 }
 0x21a   : > { %v592_v44 = vpop.f32.mrf.mxu0 }
 0x21b   : > { %656 = vst [vmem:[%s1161_s19 + $0x28] sm:$0xff] %v598_v17  ;;  %v593_v19 = vadd.f32 %v734_v59, %v592_v44  ;;  %v821_v12 = vpop.f32.mrf.mxu1 }
 0x21c   : > { %v638_v20 = vadd.f32 %v821_v12, %v734_v59 }
 0x21d   : > { %655 = vst [vmem:[%s1161_s19 + $0x20] sm:$0xff] %v593_v19  ;;  %v632_v13 = vpop.f32.mrf.mxu1 }
 0x21e   : > { %664 = vst [vmem:[%s1161_s19 + $0x68] sm:$0xff] %v638_v20  ;;  %v633_v25 = vadd.f32 %v734_v59, %v632_v13 }
 0x220   : > { %663 = vst [vmem:[%s1161_s19 + $0x60] sm:$0xff] %v633_v25  ;;  %v812_v26 = vpop.f32.mrf.mxu0 }
 0x221   : > { %v608_v27 = vadd.f32 %v812_v26, %v734_v59 }
 0x222   : > { %v602_v14 = vpop.f32.mrf.mxu0 }
 0x223   : > { %658 = vst [vmem:[%s1161_s19 + $0x38] sm:$0xff] %v608_v27  ;;  %v603_v21 = vadd.f32 %v734_v59, %v602_v14  ;;  %v824_v45 = vpop.f32.mrf.mxu1 }
 0x224   : > { %v648_v15 = vadd.f32 %v824_v45, %v734_v59 }
 0x225   : > { %657 = vst [vmem:[%s1161_s19 + $0x30] sm:$0xff] %v603_v21  ;;  %v642_v54 = vpop.f32.mrf.mxu1 }
 0x226   : > { %666 = vst [vmem:[%s1161_s19 + $0x78] sm:$0xff] %v648_v15  ;;  %v643_v30 = vadd.f32 %v734_v59, %v642_v54 }
 0x228   : > { %665 = vst [vmem:[%s1161_s19 + $0x70] sm:$0xff] %v643_v30 }
 0x229 PF: > { %s15_s18 = sadd.s32 1, %s903_s18  }
 0x22a   : > { %p12_p4 = scmp.ge.s32.totalorder %s15_s18, 4  }
 0x22c   :  { %14 = sbr.rel (!%p12_p4) target bundleno = 1 (0x1), region = 70 }

// kernel: deeper_gcn_forward.4
= control target key start
LH: loop header
LB: loop body
LE: loop exit
PB: predicated region body
PF: predicated region fallthrough
CT: control target
= control target key end

     0   :  { %s4467_s0 = inlined_call_operand.vmem [shape: s32[3], index: 0, kind: input, shape index: {}]   ;;  %s4468_s1 = inlined_call_operand.vmem [shape: f32[1280,128], index: 1, kind: input, shape index: {}]   ;;  %s4469_s2 = inlined_call_operand.vmem [shape: f32[1280,128], index: 2, kind: input, shape index: {}]   ;;  %s4470_s3 = inlined_call_operand.vmem [shape: s32[1,1280], index: 3, kind: input, shape index: {}]   ;;  %s4471_s4 = inlined_call_operand.vmem [shape: f32[256,128], index: 4, kind: input, shape index: {}]   ;;  %s4472_s5 = inlined_call_operand.vmem [shape: f32[128,128], index: 5, kind: input, shape index: {}]   ;;  %s4473_s6 = inlined_call_operand.vmem [shape: f32[1,128], index: 6, kind: input, shape index: {}]   ;;  %s4474_s8 = inlined_call_operand.vmem [shape: f32[256,128], index: 8, kind: output, shape index: {}]   ;;  %s4475_s7 = inlined_call_operand.<no memory space> [shape: f32[1,1], index: 7, kind: input, shape index: {}]  }
   0x1   :  { %4509 = sst [smem:[#allocation42_spill]] %s4471_s4  ;;  %s13_s29 = sshll.u32 %s4467_s0, 4  ;;  %v17_v0 = vstv %s4475_s7  ;;  %s14_s29 = int_to_ptr.vmem [resolvable:$true] %s13_s29 }
   0x2   :  { %18 = vst [vmem:[#allocation8] sm:$0x1] %v17_v0  ;;  %s3068_s10 = scalar_lea.vmem %s14_s29, 16  ;;  %p3073_p1 = scmp.lt.s32.totalorder %s14_s29, %s14_s29 }
   0x3   :  { %p3069_p0 = scmp.ne.s32.totalorder %s14_s29, %s3068_s10  ;;  %p3074_p2 = scmp.lt.s32.totalorder %s3068_s10, %s3068_s10 }
   0x5   :  { %p3075_p3 = por %p3074_p2, %p3073_p1 }
   0x7   :  { %p3076_p4 = pnand %p3075_p3, %p3069_p0 }
   0x9   :  { %3079 = shalt.err (!%p3076_p4)  }
   0xa   :  { %s3122_s11 = smov [#allocation7]  }
   0xb   :  { %16 = dma.vmem_to_smem %s14_s29, 16, %s3122_s11, [#allocation6] }
   0xc   :  { %3100 = dma.done.wait [#allocation6], 16 }
   0xd   :  { %3101 = vsyncadd [#allocation6], 4294967280 }
   0xe   :  { %20 = sfence }
   0xf   :  { %s3177_s12 = smov 0   ;;  %s3179_s0 = smov 0  }
  0x10   :  { %s3181_s13 = smov 0   ;;  %s3183_s7 = smov 0  }
  0x11   :  { %s3185_s14 = smov 0  }
  0x12 LB: > { %s35_s15 = sadd.s32 1, %s3112_s13  ;;  %s38_s16 = sadd.s32 1, %s3116_s7  ;;  %s3120_s14 = sphi %s3185_s14, %s26_s14   ;;  %s3116_s7 = sphi %s3183_s7, %s4610_s7   ;;  %s3112_s13 = sphi %s3181_s13, %s4609_s13   ;;  %s3108_s0 = sphi %s3179_s0, %s4608_s0   ;;  %s3104_s12 = sphi %s3177_s12, %s4607_s12  }
  0x13   : > { %p36_p5 = scmp.ge.s32.totalorder %s35_s15, 3  ;;  %p2422_p6 = scmp.ge.s32.totalorder %s3120_s14, 1 }
  0x14   : > { %p339_p7 = scmp.lt.s32.totalorder %s3120_s14, 7 }
  0x15   : > { %s4612_s15 = smov (%p36_p5, %s35_s15), 0  ;;  %s4614_s16 = smov (!%p36_p5, %s38_s16), %s3116_s7 }
  0x16   : > { %p340_p8 = pnand %p2422_p6, %p339_p7  ;;  %p40_p9 = scmp.ge.s32.totalorder %s4614_s16, 2 }
  0x17   : > { %s397_s17 = sld [smem:[#allocation7 + %s3108_s0]] (!%p340_p8)  ;;  %s2428_s18 = sshll.u32 (!%p340_p8), %s3108_s0, 4 }
  0x18   : > { %s4616_s16 = smov (%p40_p9, %s4614_s16), 0  ;;  %343 = sbr.rel (%p340_p8) target bundleno = 755 (0x2f3), region = 48 }
  0x19   : > { %4510 = sst [smem:[#allocation10_spill]] %s4616_s16  ;;  %p439_p10 = scmp.lt.s32.totalorder (!%p340_p8), %s2428_s18, 31 }
  0x1a   : > { %s411_s19 = sld [smem:[#allocation7 + %s3108_s0]] (!%p340_p8)  ;;  %s450_s21 = sadd.s32 (!%p340_p8), 1, %s3108_s0 }
  0x1b   : > { %s425_s20 = sld [smem:[#allocation7 + %s3108_s0]] (!%p340_p8)  ;;  %p2432_p3 = scmp.ne.s32.totalorder (!%p340_p8), %s3104_s12, 0 }
  0x1c   : > { %s3209_s22 = sld [smem:[#allocation7 + %s450_s21]] (!%p340_p8) }
  0x1d   : > { %s4618_s18 = smov (!%p439_p10, %s2428_s18), 31  ;;  %s3211_s24 = sld [smem:[#allocation7 + %s3108_s0]] }
  0x1e   : > { %s2429_s23 = sshll.u32 %s4618_s18, 3  ;;  %s398_s25 = sadd.s32 %s3104_s12, %s397_s17 }
  0x1f   : > { %s4511_s4 = sld [smem:[#allocation42_spill]]  ;;  %p399_p11 = scmp.lt.s32.totalorder %s398_s25, 4 }
  0x20   : > { %s412_s29 = sadd.s32 %s3104_s12, %s411_s19  ;;  %s3224_s17 = scalar_lea.vmem %s4474_s8, %s2429_s23 }
  0x21   : > { %p413_p12 = scmp.lt.s32.totalorder %s412_s29, 4  ;;  %s426_s30 = sadd.s32 %s3104_s12, %s425_s20 }
  0x22   : > { %s4620_s25 = smov (!%p399_p11, %s398_s25), 4  ;;  %p427_p13 = scmp.lt.s32.totalorder %s426_s30, 4 }
  0x23   : > { %s4622_s29 = smov (!%p413_p12, %s412_s29), 4  ;;  %s2423_s9 = sshll.u32 %s4620_s25, 5 }
  0x24   : > { %p402_p0 = scmp.lt.s32.totalorder %s2423_s9, 159  ;;  %s2425_s10 = sshll.u32 %s4622_s29, 5 }
  0x25   : > { %s3217_s28 = scalar_lea.vmem %s4511_s4, %s2429_s23  ;;  %p416_p1 = scmp.lt.s32.totalorder %s2425_s10, 159 }
  0x26   : > { %s4624_s9 = smov (!%p402_p0, %s2423_s9), 159  ;;  %s453_s21 = ssub.s32 %s3209_s22, %s3211_s24 }
  0x27   : > { %s4626_s10 = smov (!%p416_p1, %s2425_s10), 159  ;;  %s2424_s18 = sshll.u32 %s4624_s9, 3 }
  0x28   : > { %s3231_s20 = scalar_lea.vmem %s4468_s1, %s2424_s18  ;;  %s2426_s27 = sshll.u32 %s4626_s10, 3 }
  0x29   : > { %s3236_s29 = scalar_lea.vmem %s4469_s2, %s2426_s27  ;;  %s4628_s30 = smov (!%p427_p13, %s426_s30), 4 }
  0x2a   : > { %s2427_s16 = sshll.u32 %s4628_s30, 1  ;;  %457 = sbr.rel (%p2432_p3) target bundleno = 72 (0x48), region = 52 }
  0x2b   : > { %p430_p2 = scmp.lt.s32.totalorder %s2427_s16, 9 }
  0x2d   : > { %s4630_s16 = smov (!%p430_p2, %s2427_s16), 9 }
  0x2e   : > { %s432_s11 = scalar_lea.vmem %s4470_s3, %s4630_s16 }
  0x2f   : > { %v3123_v1 = vmov 0.0   ;;  %v3124_v2 = vmov -1e+30  }
  0x30   : > { %458 = vst [vmem:[#allocation2 + $0x30] sm:$0xff] %v3123_v1  ;;  %459 = vst [vmem:[#allocation2] sm:$0xff] %v3123_v1 }
  0x31   : > { %460 = vst [vmem:[#allocation2 + $0x58] sm:$0xff] %v3123_v1  ;;  %461 = vst [vmem:[#allocation2 + $0x18] sm:$0xff] %v3123_v1 }
  0x32   : > { %462 = vst [vmem:[#allocation2 + $0x50] sm:$0xff] %v3123_v1  ;;  %463 = vst [vmem:[#allocation2 + $0x68] sm:$0xff] %v3123_v1 }
  0x33   : > { %464 = vst [vmem:[#allocation2 + $0x8] sm:$0xff] %v3123_v1  ;;  %465 = vst [vmem:[#allocation2 + $0x48] sm:$0xff] %v3123_v1 }
  0x34   : > { %466 = vst [vmem:[#allocation2 + $0x40] sm:$0xff] %v3123_v1  ;;  %467 = vst [vmem:[#allocation2 + $0x20] sm:$0xff] %v3123_v1 }
  0x35   : > { %468 = vst [vmem:[#allocation2 + $0x10] sm:$0xff] %v3123_v1  ;;  %469 = vst [vmem:[#allocation2 + $0x38] sm:$0xff] %v3123_v1 }
  0x36   : > { %470 = vst [vmem:[#allocation2 + $0x60] sm:$0xff] %v3123_v1  ;;  %471 = vst [vmem:[#allocation2 + $0x70] sm:$0xff] %v3123_v1 }
  0x37   : > { %472 = vst [vmem:[#allocation2 + $0x78] sm:$0xff] %v3123_v1  ;;  %473 = vst [vmem:[#allocation2 + $0x28] sm:$0xff] %v3123_v1 }
  0x38   : > { %474 = vst [vmem:[#allocation3 + $0x28] sm:$0xff] %v3123_v1  ;;  %475 = vst [vmem:[#allocation3 + $0x68] sm:$0xff] %v3123_v1 }
  0x39   : > { %476 = vst [vmem:[#allocation3 + $0x10] sm:$0xff] %v3123_v1  ;;  %477 = vst [vmem:[#allocation3 + $0x40] sm:$0xff] %v3123_v1 }
  0x3a   : > { %478 = vst [vmem:[#allocation3 + $0x48] sm:$0xff] %v3123_v1  ;;  %479 = vst [vmem:[#allocation3 + $0x30] sm:$0xff] %v3123_v1 }
  0x3b   : > { %480 = vst [vmem:[#allocation3 + $0x70] sm:$0xff] %v3123_v1  ;;  %481 = vst [vmem:[#allocation3 + $0x38] sm:$0xff] %v3123_v1 }
  0x3c   : > { %482 = vst [vmem:[#allocation3 + $0x20] sm:$0xff] %v3123_v1  ;;  %483 = vst [vmem:[#allocation3 + $0x78] sm:$0xff] %v3123_v1 }
  0x3d   : > { %484 = vst [vmem:[#allocation3 + $0x18] sm:$0xff] %v3123_v1  ;;  %485 = vst [vmem:[#allocation3 + $0x58] sm:$0xff] %v3123_v1 }
  0x3e   : > { %486 = vst [vmem:[#allocation3] sm:$0xff] %v3123_v1  ;;  %487 = vst [vmem:[#allocation3 + $0x8] sm:$0xff] %v3123_v1 }
  0x3f   : > { %488 = vst [vmem:[#allocation3 + $0x60] sm:$0xff] %v3123_v1  ;;  %489 = vst [vmem:[#allocation3 + $0x50] sm:$0xff] %v3123_v1 }
  0x40   : > { %490 = vst [vmem:[#allocation4 + $0x8] sm:$0xff] %v3124_v2  ;;  %491 = vst [vmem:[#allocation4] sm:$0xff] %v3124_v2 }
  0x41   : > { %492 = vst [vmem:[#allocation4 + $0x48] sm:$0xff] %v3124_v2  ;;  %493 = vst [vmem:[#allocation4 + $0x60] sm:$0xff] %v3124_v2 }
  0x42   : > { %494 = vst [vmem:[#allocation4 + $0x68] sm:$0xff] %v3124_v2  ;;  %495 = vst [vmem:[#allocation4 + $0x18] sm:$0xff] %v3124_v2 }
  0x43   : > { %496 = vst [vmem:[#allocation4 + $0x10] sm:$0xff] %v3124_v2  ;;  %497 = vst [vmem:[#allocation4 + $0x38] sm:$0xff] %v3124_v2 }
  0x44   : > { %498 = vst [vmem:[#allocation4 + $0x40] sm:$0xff] %v3124_v2  ;;  %499 = vst [vmem:[#allocation4 + $0x28] sm:$0xff] %v3124_v2 }
  0x45   : > { %500 = vst [vmem:[#allocation4 + $0x70] sm:$0xff] %v3124_v2  ;;  %501 = vst [vmem:[#allocation4 + $0x20] sm:$0xff] %v3124_v2 }
  0x46   : > { %502 = vst [vmem:[#allocation4 + $0x58] sm:$0xff] %v3124_v2  ;;  %503 = vst [vmem:[#allocation4 + $0x30] sm:$0xff] %v3124_v2 }
  0x47   : > { %504 = vst [vmem:[#allocation4 + $0x50] sm:$0xff] %v3124_v2  ;;  %505 = vst [vmem:[#allocation4 + $0x78] sm:$0xff] %v3124_v2 }
  0x48 PF: > { %p2433_p4 = scmp.ge.s32.totalorder %s3104_s12, %s453_s21 }
  0x4a   : > { %509 = sbr.rel (%p2433_p4) target bundleno = 500 (0x1f4), region = 56 }
  0x4f   : > { %v510_v3 = vld [vmem:[#allocation8] sm:$0x1]  ;;  %v513_v5 = vld [vmem:[%s3231_s20 + $0x8] sm:$0xff]  ;;  %v514_v6 = vld [vmem:[%s3231_s20 + $0x10] sm:$0xff] }
  0x50   : > { %2814 = vpush %v510_v3  ;;  %v512_v4 = vld [vmem:[%s3231_s20] sm:$0xff]  ;;  %v515_v7 = vld [vmem:[%s3231_s20 + $0x18] sm:$0xff]  ;;  %v517_v10 = vld [vmem:[%s3231_s20 + $0x28] sm:$0xff] }
  0x51   : > { %v516_v8 = vld [vmem:[%s3231_s20 + $0x20] sm:$0xff]  ;;  %v518_v11 = vld [vmem:[%s3231_s20 + $0x30] sm:$0xff]  ;;  %v519_v12 = vld [vmem:[%s3231_s20 + $0x38] sm:$0xff] }
  0x52   : > { %v544_v9 = vld [vmem:[%s3236_s29] sm:$0xff]  ;;  %v545_v14 = vld [vmem:[%s3236_s29 + $0x8] sm:$0xff]  ;;  %v546_v15 = vld [vmem:[%s3236_s29 + $0x10] sm:$0xff] }
  0x53   : > { %v520_v13 = vld [vmem:[%s3231_s20 + $0x40] sm:$0xff]  ;;  %v521_v16 = vld [vmem:[%s3231_s20 + $0x48] sm:$0xff]  ;;  %v522_v17 = vld [vmem:[%s3231_s20 + $0x50] sm:$0xff]  ;;  %v3273_v28 = vadd.f32 %v544_v9, %v512_v4  ;;  %v3281_v35 = vadd.f32 %v545_v14, %v513_v5  ;;  %v3289_v42 = vadd.f32 %v546_v15, %v514_v6 }
  0x54   : > { %v523_v18 = vld [vmem:[%s3231_s20 + $0x58] sm:$0xff]  ;;  %v548_v20 = vld [vmem:[%s3236_s29 + $0x20] sm:$0xff]  ;;  %v549_v21 = vld [vmem:[%s3236_s29 + $0x28] sm:$0xff] }
  0x55   : > { %v547_v19 = vld [vmem:[%s3236_s29 + $0x18] sm:$0xff]  ;;  %v524_v22 = vld [vmem:[%s3231_s20 + $0x60] sm:$0xff]  ;;  %v525_v23 = vld [vmem:[%s3231_s20 + $0x68] sm:$0xff]  ;;  %v3293_v44 = vadd.f32 %v548_v20, %v516_v8  ;;  %v3301_v51 = vadd.f32 %v549_v21, %v517_v10  ;;  %v608_v0 = vmax.f32 %v3273_v28, 0.0  ;;  %v609_v10 = vmax.f32 %v3281_v35, 0.0 }
  0x56   : > { %v526_v24 = vld [vmem:[%s3231_s20 + $0x70] sm:$0xff]  ;;  %v551_v26 = vld [vmem:[%s3236_s29 + $0x38] sm:$0xff]  ;;  %v552_v27 = vld [vmem:[%s3236_s29 + $0x40] sm:$0xff]  ;;  %v3291_v43 = vadd.f32 %v547_v19, %v515_v7 }
  0x57   : > { %v550_v25 = vld [vmem:[%s3236_s29 + $0x30] sm:$0xff]  ;;  %v527_v29 = vld [vmem:[%s3231_s20 + $0x78] sm:$0xff]  ;;  %v528_v30 = vld [vmem:[%s3231_s20 + $0x80] sm:$0xff]  ;;  %v3305_v53 = vadd.f32 %v551_v26, %v519_v12  ;;  %v3307_v54 = vadd.f32 %v552_v27, %v520_v13 }
  0x58   : > { %v529_v31 = vld [vmem:[%s3231_s20 + $0x88] sm:$0xff]  ;;  %v554_v33 = vld [vmem:[%s3236_s29 + $0x50] sm:$0xff]  ;;  %v555_v34 = vld [vmem:[%s3236_s29 + $0x58] sm:$0xff]  ;;  %v3303_v52 = vadd.f32 %v550_v25, %v518_v11  ;;  %v611_v25 = vmax.f32 %v3291_v43, 0.0 }
  0x59   : > { %v553_v32 = vld [vmem:[%s3236_s29 + $0x48] sm:$0xff]  ;;  %v530_v36 = vld [vmem:[%s3231_s20 + $0x90] sm:$0xff]  ;;  %v531_v37 = vld [vmem:[%s3231_s20 + $0x98] sm:$0xff]  ;;  %v3317_v62 = vadd.f32 %v554_v33, %v522_v17  ;;  %v3319_v63 = vadd.f32 %v555_v34, %v523_v18  ;;  %v610_v18 = vmax.f32 %v3289_v42, 0.0  ;;  %v612_v33 = vmax.f32 %v3293_v44, 0.0 }
  0x5a   : > { %v532_v38 = vld [vmem:[%s3231_s20 + $0xa0] sm:$0xff]  ;;  %v557_v40 = vld [vmem:[%s3236_s29 + $0x68] sm:$0xff]  ;;  %v558_v41 = vld [vmem:[%s3236_s29 + $0x70] sm:$0xff]  ;;  %v3315_v61 = vadd.f32 %v553_v32, %v521_v16 }
  0x5b   : > { %v556_v39 = vld [vmem:[%s3236_s29 + $0x60] sm:$0xff]  ;;  %v533_v45 = vld [vmem:[%s3231_s20 + $0xa8] sm:$0xff]  ;;  %v534_v46 = vld [vmem:[%s3231_s20 + $0xb0] sm:$0xff]  ;;  %v3330_v8 = vadd.f32 %v557_v40, %v525_v23  ;;  %v3332_v9 = vadd.f32 %v558_v41, %v526_v24  ;;  %v618_v44 = vmax.f32 %v3317_v62, 0.0 }
  0x5c   : > { %v535_v47 = vld [vmem:[%s3231_s20 + $0xb8] sm:$0xff]  ;;  %v560_v49 = vld [vmem:[%s3236_s29 + $0x80] sm:$0xff]  ;;  %v561_v50 = vld [vmem:[%s3236_s29 + $0x88] sm:$0xff]  ;;  %v3328_v7 = vadd.f32 %v556_v39, %v524_v22 }
  0x5d   : > { %v559_v48 = vld [vmem:[%s3236_s29 + $0x78] sm:$0xff]  ;;  %v536_v55 = vld [vmem:[%s3231_s20 + $0xc0] sm:$0xff]  ;;  %v537_v56 = vld [vmem:[%s3231_s20 + $0xc8] sm:$0xff]  ;;  %v3341_v16 = vadd.f32 %v560_v49, %v528_v30  ;;  %v3343_v17 = vadd.f32 %v561_v50, %v529_v31  ;;  %v621_v50 = vmax.f32 %v3330_v8, 0.0  ;;  %v3385_v8 = vadd.f32 1e-07, %v610_v18 }
  0x5e   : > { %v538_v57 = vld [vmem:[%s3231_s20 + $0xd0] sm:$0xff]  ;;  %v563_v59 = vld [vmem:[%s3236_s29 + $0x98] sm:$0xff]  ;;  %v564_v60 = vld [vmem:[%s3236_s29 + $0xa0] sm:$0xff]  ;;  %v3339_v15 = vadd.f32 %v559_v48, %v527_v29  ;;  %v615_v48 = vmax.f32 %v3305_v53, 0.0  ;;  %v620_v49 = vmax.f32 %v3328_v7, 0.0 }
  0x5f   : > { %v562_v58 = vld [vmem:[%s3236_s29 + $0x90] sm:$0xff]  ;;  %v539_v1 = vld [vmem:[%s3231_s20 + $0xd8] sm:$0xff]  ;;  %v540_v2 = vld [vmem:[%s3231_s20 + $0xe0] sm:$0xff]  ;;  %v3351_v23 = vadd.f32 %v563_v59, %v531_v37  ;;  %v3353_v24 = vadd.f32 %v564_v60, %v532_v38  ;;  %v614_v38 = vmax.f32 %v3303_v52, 0.0  ;;  %v625_v53 = vmax.f32 %v3343_v17, 0.0 }
  0x60   : > { %v541_v3 = vld [vmem:[%s3231_s20 + $0xe8] sm:$0xff]  ;;  %v566_v5 = vld [vmem:[%s3236_s29 + $0xb0] sm:$0xff]  ;;  %v567_v6 = vld [vmem:[%s3236_s29 + $0xb8] sm:$0xff]  ;;  %v3349_v22 = vadd.f32 %v562_v58, %v530_v36  ;;  %v613_v36 = vmax.f32 %v3301_v51, 0.0  ;;  %v622_v51 = vmax.f32 %v3332_v9, 0.0  ;;  %v623_v52 = vmax.f32 %v3339_v15, 0.0 }
  0x61   : > { %v565_v4 = vld [vmem:[%s3236_s29 + $0xa8] sm:$0xff]  ;;  %v542_v11 = vld [vmem:[%s3231_s20 + $0xf0] sm:$0xff]  ;;  %v568_v12 = vld [vmem:[%s3236_s29 + $0xc0] sm:$0xff]  ;;  %v598_v32 = vadd.f32 %v566_v5, %v534_v46  ;;  %v599_v31 = vadd.f32 %v567_v6, %v535_v47  ;;  %v617_v46 = vmax.f32 %v3315_v61, 0.0  ;;  %v619_v47 = vmax.f32 %v3319_v63, 0.0 }
  0x62   : > { %v569_v13 = vld [vmem:[%s3236_s29 + $0xc8] sm:$0xff]  ;;  %v570_v14 = vld [vmem:[%s3236_s29 + $0xd0] sm:$0xff]  ;;  %v571_v19 = vld [vmem:[%s3236_s29 + $0xd8] sm:$0xff]  ;;  %v597_v30 = vadd.f32 %v565_v4, %v533_v45  ;;  %v600_v34 = vadd.f32 %v568_v12, %v536_v55  ;;  %v616_v45 = vmax.f32 %v3307_v54, 0.0  ;;  %v624_v55 = vmax.f32 %v3341_v16, 0.0 }
  0x63   : > { %v572_v20 = vld [vmem:[%s3236_s29 + $0xe0] sm:$0xff]  ;;  %v573_v21 = vld [vmem:[%s3236_s29 + $0xe8] sm:$0xff]  ;;  %v543_v26 = vld [vmem:[%s3231_s20 + $0xf8] sm:$0xff]  ;;  %v601_v35 = vadd.f32 %v569_v13, %v537_v56  ;;  %v602_v39 = vadd.f32 %v570_v14, %v538_v57  ;;  %v603_v40 = vadd.f32 %v571_v19, %v539_v1  ;;  %v626_v54 = vmax.f32 %v3349_v22, 0.0 }
  0x64   : > { %v574_v27 = vld [vmem:[%s3236_s29 + $0xf0] sm:$0xff]  ;;  %v575_v29 = vld [vmem:[%s3236_s29 + $0xf8] sm:$0xff]  ;;  %v604_v37 = vadd.f32 %v572_v20, %v540_v2  ;;  %v605_v41 = vadd.f32 %v573_v21, %v541_v3  ;;  %v627_v56 = vmax.f32 %v3351_v23, 0.0  ;;  %v628_v57 = vmax.f32 %v3353_v24, 0.0 }
  0x65   : > { %v606_v42 = vadd.f32 %v574_v27, %v542_v11  ;;  %v3362_v43 = vadd.f32 %v575_v29, %v543_v26  ;;  %v629_v58 = vmax.f32 %v597_v30, 0.0  ;;  %v630_v59 = vmax.f32 %v598_v32, 0.0 }
  0x66   : > { %v631_v60 = vmax.f32 %v599_v31, 0.0  ;;  %v632_v61 = vmax.f32 %v600_v34, 0.0  ;;  %v633_v62 = vmax.f32 %v601_v35, 0.0  ;;  %v634_v63 = vmax.f32 %v602_v39, 0.0 }
  0x67   : > { %v635_v1 = vmax.f32 %v603_v40, 0.0  ;;  %v636_v2 = vmax.f32 %v604_v37, 0.0  ;;  %v637_v3 = vmax.f32 %v605_v41, 0.0  ;;  %v638_v4 = vmax.f32 %v606_v42, 0.0 }
  0x68   : > { %v639_v5 = vmax.f32 %v3362_v43, 0.0  ;;  %v3381_v6 = vadd.f32 1e-07, %v608_v0  ;;  %v3383_v7 = vadd.f32 1e-07, %v609_v10 }
  0x69   : > { %v3387_v9 = vadd.f32 1e-07, %v611_v25  ;;  %v3389_v11 = vadd.f32 1e-07, %v612_v33  ;;  %v3391_v12 = vadd.f32 1e-07, %v613_v36 }
  0x6a   : > { %4512 = vst [vmem:[#allocation11_spill] sm:$0xff] %v3381_v6  ;;  %4513 = vst [vmem:[#allocation12_spill] sm:$0xff] %v3383_v7  ;;  %v3393_v13 = vadd.f32 1e-07, %v614_v38  ;;  %v3395_v14 = vadd.f32 1e-07, %v615_v48 }
  0x6b   : > { %4514 = vst [vmem:[#allocation13_spill] sm:$0xff] %v3389_v11  ;;  %4515 = vst [vmem:[#allocation14_spill] sm:$0xff] %v3391_v12  ;;  %v3397_v15 = vadd.f32 1e-07, %v616_v45  ;;  %v3399_v16 = vadd.f32 1e-07, %v617_v46 }
  0x6c   : > { %v3401_v28 = vadd.f32 1e-07, %v618_v44  ;;  %v3403_v0 = vadd.f32 1e-07, %v619_v47  ;;  %v3405_v10 = vadd.f32 1e-07, %v620_v49 }
  0x6d   : > { %4516 = vst [vmem:[#allocation15_spill] sm:$0xff] %v3397_v15  ;;  %4517 = vst [vmem:[#allocation16_spill] sm:$0xff] %v3399_v16  ;;  %v3407_v17 = vadd.f32 1e-07, %v621_v50  ;;  %v3409_v18 = vadd.f32 1e-07, %v622_v51 }
  0x6e   : > { %4518 = vst [vmem:[#allocation17_spill] sm:$0xff] %v3405_v10  ;;  %v3411_v19 = vadd.f32 1e-07, %v623_v52  ;;  %v3413_v20 = vadd.f32 1e-07, %v624_v55 }
  0x6f   : > { %4519 = vst [vmem:[#allocation18_spill] sm:$0xff] %v3407_v17  ;;  %v3415_v21 = vadd.f32 1e-07, %v625_v53  ;;  %v3417_v22 = vadd.f32 1e-07, %v626_v54 }
  0x70   : > { %4520 = vst [vmem:[#allocation19_spill] sm:$0xff] %v3413_v20  ;;  %v3419_v23 = vadd.f32 1e-07, %v627_v56  ;;  %v3421_v24 = vadd.f32 1e-07, %v628_v57 }
  0x71   : > { %4521 = vst [vmem:[#allocation20_spill] sm:$0xff] %v3415_v21  ;;  %v3423_v25 = vadd.f32 1e-07, %v629_v58  ;;  %v3425_v27 = vadd.f32 1e-07, %v630_v59 }
  0x72   : > { %4522 = vst [vmem:[#allocation21_spill] sm:$0xff] %v3421_v24  ;;  %v3427_v29 = vadd.f32 1e-07, %v631_v60  ;;  %v3429_v30 = vadd.f32 1e-07, %v632_v61 }
  0x73   : > { %4523 = vst [vmem:[#allocation22_spill] sm:$0xff] %v3423_v25  ;;  %v3431_v32 = vadd.f32 1e-07, %v633_v62  ;;  %v3433_v31 = vadd.f32 1e-07, %v634_v63 }
  0x74   : > { %4524 = vst [vmem:[#allocation23_spill] sm:$0xff] %v3429_v30  ;;  %v3435_v33 = vadd.f32 1e-07, %v635_v1  ;;  %v3437_v34 = vadd.f32 1e-07, %v636_v2 }
  0x75   : > { %4525 = vst [vmem:[#allocation24_spill] sm:$0xff] %v3431_v32  ;;  %4526 = vst [vmem:[#allocation25_spill] sm:$0xff] %v3433_v31  ;;  %v3439_v35 = vadd.f32 1e-07, %v637_v3  ;;  %v3441_v39 = vadd.f32 1e-07, %v638_v4 }
  0x76   : > { %4527 = vst [vmem:[#allocation26_spill] sm:$0xff] %v3435_v33  ;;  %4528 = vst [vmem:[#allocation27_spill] sm:$0xff] %v3437_v34  ;;  %v3467_v45 = vadd.f32 1e-07, %v639_v5 }
  0x77   : > { %4529 = vst [vmem:[#allocation28_spill] sm:$0xff] %v3439_v35  ;;  %4530 = vst [vmem:[#allocation29_spill] sm:$0xff] %v3441_v39 }
  0x78   : > { %4531 = vst [vmem:[#allocation30_spill] sm:$0xff] %v3467_v45 }
  0x81   : > { %s2815_s4 = spop %2814 }
  0x82   : > { %v672_v26 = vstv %s2815_s4 }
  0x83   : > { %v3444_v36 = vmul.f32 %v672_v26, %v3381_v6  ;;  %v3447_v40 = vmul.f32 %v672_v26, %v3383_v7  ;;  %v3450_v37 = vmul.f32 %v672_v26, %v3385_v8  ;;  %v3453_v41 = vmul.f32 %v672_v26, %v3387_v9 }
  0x84   : > { %v3456_v38 = vmul.f32 %v672_v26, %v3389_v11  ;;  %v3459_v42 = vmul.f32 %v672_v26, %v3391_v12  ;;  %v3462_v43 = vmul.f32 %v672_v26, %v3393_v13  ;;  %v3465_v48 = vmul.f32 %v672_v26, %v3395_v14 }
  0x85   : > { %v3470_v46 = vmul.f32 %v672_v26, %v3397_v15  ;;  %v3473_v44 = vmul.f32 %v672_v26, %v3399_v16  ;;  %v3476_v47 = vmul.f32 %v672_v26, %v3401_v28  ;;  %v3479_v49 = vmul.f32 %v672_v26, %v3403_v0 }
  0x86   : > { %v3482_v50 = vmul.f32 %v672_v26, %v3405_v10  ;;  %v3485_v51 = vmul.f32 %v672_v26, %v3407_v17  ;;  %v3488_v52 = vmul.f32 %v672_v26, %v3409_v18  ;;  %v3491_v55 = vmul.f32 %v672_v26, %v3411_v19 }
  0x87   : > { %v3494_v53 = vmul.f32 %v672_v26, %v3413_v20  ;;  %v3497_v54 = vmul.f32 %v672_v26, %v3415_v21  ;;  %v3500_v56 = vmul.f32 %v672_v26, %v3417_v22  ;;  %v705_v57 = vmax.f32 %v3444_v36, %v3456_v38 }
  0x88   : > { %v706_v58 = vmax.f32 %v3447_v40, %v3459_v42  ;;  %v707_v59 = vmax.f32 %v3450_v37, %v3462_v43  ;;  %v708_v60 = vmax.f32 %v3453_v41, %v3465_v48  ;;  %v3511_v61 = vmul.f32 %v672_v26, %v3419_v23 }
  0x89   : > { %v3514_v62 = vmul.f32 %v672_v26, %v3421_v24  ;;  %v3517_v63 = vmul.f32 %v672_v26, %v3423_v25  ;;  %v3520_v1 = vmul.f32 %v672_v26, %v3425_v27  ;;  %v709_v2 = vmax.f32 %v705_v57, %v3470_v46 }
  0x8a   : > { %v710_v3 = vmax.f32 %v706_v58, %v3473_v44  ;;  %v711_v4 = vmax.f32 %v707_v59, %v3476_v47  ;;  %v712_v5 = vmax.f32 %v708_v60, %v3479_v49  ;;  %v3527_v21 = vmul.f32 %v672_v26, %v3427_v29 }
  0x8b   : > { %v3530_v20 = vmul.f32 %v672_v26, %v3429_v30  ;;  %v3533_v25 = vmul.f32 %v672_v26, %v3431_v32  ;;  %v3536_v24 = vmul.f32 %v672_v26, %v3433_v31  ;;  %v713_v57 = vmax.f32 %v709_v2, %v3482_v50 }
  0x8c   : > { %v714_v58 = vmax.f32 %v710_v3, %v3485_v51  ;;  %v715_v59 = vmax.f32 %v711_v4, %v3488_v52  ;;  %v716_v60 = vmax.f32 %v712_v5, %v3491_v55  ;;  %v3543_v7 = vmul.f32 %v672_v26, %v3435_v33 }
  0x8d   : > { %v3546_v30 = vmul.f32 %v672_v26, %v3437_v34  ;;  %v3549_v32 = vmul.f32 %v672_v26, %v3439_v35  ;;  %v1319_v31 = vlaneseq  ;;  %v717_v6 = vmax.f32 %v713_v57, %v3494_v53 }
  0x8e   : > { %v718_v2 = vmax.f32 %v714_v58, %v3497_v54  ;;  %v719_v3 = vmax.f32 %v715_v59, %v3500_v56  ;;  %v720_v4 = vmax.f32 %v716_v60, %v3511_v61  ;;  %v3556_v5 = vmul.f32 %v672_v26, %v3441_v39  ;;  %v1318_v59 = vld [vmem:[%s432_s11] sm:$0x3] }
  0x8f   : > { %v3559_v33 = vmul.f32 %v672_v26, %v3467_v45  ;;  %v3561_v34 = vshrl.u32 %v1319_v31, 7  ;;  %v721_v35 = vmax.f32 %v717_v6, %v3514_v62 }
  0x90   : > { %v722_v12 = vmax.f32 %v718_v2, %v3517_v63  ;;  %v723_v57 = vmax.f32 %v719_v3, %v3520_v1  ;;  %v724_v58 = vmax.f32 %v720_v4, %v3527_v21 }
  0x91   : > { %v1321_v60 = vadd.s32 8, %v3561_v34  ;;  %v1338_v26 = vsub.s32 0, %v3561_v34  ;;  %v1342_v31 = vsub.s32 1, %v3561_v34  ;;  %v1328_v45 = vadd.s32 64, %v3561_v34 }
  0x92   : > { %v725_v6 = vmax.f32 %v721_v35, %v3530_v20  ;;  %v726_v2 = vmax.f32 %v722_v12, %v3533_v25  ;;  %v727_v3 = vmax.f32 %v723_v57, %v3536_v24  ;;  %v728_v4 = vmax.f32 %v724_v58, %v3543_v7 }
  0x93   : > { %v3580_v39 = vrot.slane %v1318_v59, %v1338_v26  ;;  %v3582_v11 = vrot.slane %v1318_v59, %v1342_v31  ;;  %v1329_v16 = vadd.s32 72, %v3561_v34  ;;  %v1322_v15 = vadd.s32 16, %v3561_v34 }
  0x94   : > { %v729_v17 = vmax.f32 %v725_v6, %v3546_v30  ;;  %v730_v10 = vmax.f32 %v726_v2, %v3549_v32  ;;  %v731_v35 = vmax.f32 %v727_v3, %v3556_v5  ;;  %v732_v12 = vmax.f32 %v728_v4, %v3559_v33 }
  0x95   : > { %vm1345_vm0 = vcmp.eq.s32.totalorder %v3561_v34, %v3582_v11  ;;  %vm1347_vm1 = vcmp.eq.s32.totalorder %v1321_v60, %v3582_v11  ;;  %vm1361_vm2 = vcmp.eq.s32.totalorder %v1328_v45, %v3582_v11  ;;  %vm1363_vm3 = vcmp.eq.s32.totalorder %v1329_v16, %v3582_v11 }
  0x96   : > { %v733_v57 = vmax.f32 %v729_v17, %v730_v10  ;;  %v734_v58 = vmax.f32 %v731_v35, %v732_v12  ;;  %vm2562_vm4 = vmpackc.low %vm1347_vm1, %vm1345_vm0  ;;  %vm1344_vm5 = vcmp.eq.s32.totalorder %v3561_v34, %v3580_v39  ;;  %vm1346_vm6 = vcmp.eq.s32.totalorder %v1321_v60, %v3580_v39 }
  0x97   : > { %v4496_v59 = vmov 1.0|1.0   ;;  %vm2578_vm7 = vmpackc.low %vm1363_vm3, %vm1361_vm2  ;;  %vm1360_vm8 = vcmp.eq.s32.totalorder %v1328_v45, %v3580_v39  ;;  %vm1362_vm9 = vcmp.eq.s32.totalorder %v1329_v16, %v3580_v39  ;;  %v1323_v26 = vadd.s32 24, %v3561_v34 }
  0x98   : > { %2563 = vmatprep.mubr.msk.bf16.mxu0 %vm2562_vm4, %v4496_v59  ;;  %vm1349_vm10 = vcmp.eq.s32.totalorder %v1322_v15, %v3582_v11  ;;  %v735_v10 = vmax.f32 %v733_v57, %v734_v58  ;;  %2579 = vmatprep.mubr.msk.bf16.mxu1 %vm2578_vm7, %v4496_v59  ;;  %vm3604_vm11 = vmpackc.low %vm1346_vm6, %vm1344_vm5  ;;  %v1330_v60 = vadd.s32 80, %v3561_v34  ;;  %v1331_v31 = vadd.s32 88, %v3561_v34 }
  0x99   : > { %vm1348_vm12 = vcmp.eq.s32.totalorder %v1322_v15, %v3580_v39  ;;  %vm3611_vm13 = vmpackc.low %vm1362_vm9, %vm1360_vm8  ;;  %vm1351_vm14 = vcmp.eq.s32.totalorder %v1323_v26, %v3582_v11  ;;  %vm1350_vm15 = vcmp.eq.s32.totalorder %v1323_v26, %v3580_v39  ;;  %v1324_v16 = vadd.s32 32, %v3561_v34 }
  0x9a   : > { %v1325_v6 = vadd.s32 40, %v3561_v34  ;;  %v736_v2 = vrot.slane %v735_v10, 4  ;;  %vm3619_vm0 = vmpackc.low %vm1351_vm14, %vm1349_vm10  ;;  %v4536_v3 = vmov 0  ;;  %vm1365_vm1 = vcmp.eq.s32.totalorder %v1330_v60, %v3582_v11 }
  0x9b   : > { %v4537_v3 = vsel %vm3619_vm0, 4294967295, %v4536_v3  ;;  %vm1367_vm2 = vcmp.eq.s32.totalorder %v1331_v31, %v3582_v11  ;;  %vm1364_vm3 = vcmp.eq.s32.totalorder %v1330_v60, %v3580_v39  ;;  %v4539_v4 = vmov 0  ;;  %vm3636_vm8 = vmpackc.low %vm1350_vm15, %vm1348_vm12 }
  0x9c   : > { %4538 = vst [vmem:[#allocation31_spill] sm:$0xff] %v4537_v3  ;;  %vm3626_vm4 = vmpackc.low %vm1367_vm2, %vm1365_vm1  ;;  %vm1366_vm5 = vcmp.eq.s32.totalorder %v1331_v31, %v3580_v39  ;;  %vm1353_vm6 = vcmp.eq.s32.totalorder %v1324_v16, %v3582_v11  ;;  %vm1355_vm7 = vcmp.eq.s32.totalorder %v1325_v6, %v3582_v11  ;;  %v1332_v35 = vadd.s32 96, %v3561_v34 }
  0x9d   : > { %v4540_v4 = vsel %vm3626_vm4, 4294967295, %v4539_v4  ;;  %v737_v12 = vmax.f32 %v735_v10, %v736_v2  ;;  %v4542_v57 = vmov 0  ;;  %v1333_v58 = vadd.s32 104, %v3561_v34  ;;  %vm3643_vm14 = vmpackc.low %vm1366_vm5, %vm1364_vm3 }
  0x9e   : > { %4541 = vst [vmem:[#allocation32_spill] sm:$0xff] %v4540_v4  ;;  %v4543_v57 = vsel %vm3636_vm8, 4294967295, %v4542_v57  ;;  %vm1352_vm9 = vcmp.eq.s32.totalorder %v1324_v16, %v3580_v39  ;;  %vm1354_vm10 = vcmp.eq.s32.totalorder %v1325_v6, %v3580_v39  ;;  %v4545_v26 = vmov 0  ;;  %vm3648_vm2 = vmpackc.low %vm1355_vm7, %vm1353_vm6 }
  0x9f   : > { %4544 = vst [vmem:[#allocation33_spill] sm:$0xff] %v4543_v57  ;;  %v4546_v26 = vsel %vm3643_vm14, 4294967295, %v4545_v26  ;;  %vm1369_vm1 = vcmp.eq.s32.totalorder %v1332_v35, %v3582_v11  ;;  %v738_v60 = vrot.slane %v737_v12, 2  ;;  %v4548_v10 = vmov 0  ;;  %vm3661_vm5 = vmpackc.low %vm1354_vm10, %vm1352_vm9 }
  0xa0   : > { %4547 = vst [vmem:[#allocation34_spill] sm:$0xff] %v4546_v26  ;;  %v4549_v10 = vsel %vm3648_vm2, 4294967295, %v4548_v10  ;;  %vm1371_vm12 = vcmp.eq.s32.totalorder %v1333_v58, %v3582_v11  ;;  %v4551_v15 = vmov 0  ;;  %vm1368_vm8 = vcmp.eq.s32.totalorder %v1332_v35, %v3580_v39 }
  0xa1   : > { %4550 = vst [vmem:[#allocation35_spill] sm:$0xff] %v4549_v10  ;;  %vm3653_vm15 = vmpackc.low %vm1371_vm12, %vm1369_vm1  ;;  %vm1370_vm3 = vcmp.eq.s32.totalorder %v1333_v58, %v3580_v39  ;;  %v1326_v31 = vadd.s32 48, %v3561_v34  ;;  %v1327_v16 = vadd.s32 56, %v3561_v34  ;;  %v739_v6 = vmax.f32 %v737_v12, %v738_v60 }
  0xa2   : > { %v4552_v15 = vsel %vm3653_vm15, 4294967295, %v4551_v15  ;;  %v4554_v2 = vmov 0  ;;  %v3666_v59 = vadd.s32 112, %v3561_v34  ;;  %v3669_v10 = vadd.s32 120, %v3561_v34  ;;  %vm3671_vm6 = vmpackc.low %vm1370_vm3, %vm1368_vm8 }
  0xa3   : > { %4553 = vst [vmem:[#allocation36_spill] sm:$0xff] %v4552_v15  ;;  %v4555_v2 = vsel %vm3661_vm5, 4294967295, %v4554_v2  ;;  %v4557_v15 = vmov 0  ;;  %vm1357_vm7 = vcmp.eq.s32.totalorder %v1326_v31, %v3582_v11  ;;  %vm1359_vm1 = vcmp.eq.s32.totalorder %v1327_v16, %v3582_v11 }
  0xa4   : > { %4556 = vst [vmem:[#allocation37_spill] sm:$0xff] %v4555_v2  ;;  %v4558_v15 = vsel %vm3671_vm6, 4294967295, %v4557_v15  ;;  %vm1356_vm12 = vcmp.eq.s32.totalorder %v1326_v31, %v3580_v39  ;;  %vm1358_vm9 = vcmp.eq.s32.totalorder %v1327_v16, %v3580_v39  ;;  %v740_v35 = vrot.slane %v739_v6, 1  ;;  %vm3679_vm10 = vmpackc.low %vm1359_vm1, %vm1357_vm7 }
  0xa5   : > { %4559 = vst [vmem:[#allocation38_spill] sm:$0xff] %v4558_v15  ;;  %v4560_v12 = vmov 0  ;;  %vm1373_vm5 = vcmp.eq.s32.totalorder %v3666_v59, %v3582_v11  ;;  %vm1375_vm8 = vcmp.eq.s32.totalorder %v3669_v10, %v3582_v11  ;;  %v4563_v34 = vmov 0  ;;  %vm3693_vm6 = vmpackc.low %vm1358_vm9, %vm1356_vm12 }
  0xa6   : > { %v4561_v12 = vsel %vm3679_vm10, 4294967295, %v4560_v12  ;;  %vm3687_vm3 = vmpackc.low %vm1375_vm8, %vm1373_vm5  ;;  %v3691_v58 = vmax.f32 %v739_v6, %v740_v35  ;;  %v4566_v60 = vmov 0  ;;  %vm1372_vm5 = vcmp.eq.s32.totalorder %v3666_v59, %v3580_v39 }
  0xa7   : > { %4562 = vst [vmem:[#allocation39_spill] sm:$0xff] %v4561_v12  ;;  %v4564_v34 = vsel %vm3687_vm3, 4294967295, %v4563_v34  ;;  %v4567_v60 = vsel %vm3693_vm6, 4294967295, %v4566_v60  ;;  %vm1374_vm7 = vcmp.eq.s32.totalorder %v3669_v10, %v3580_v39  ;;  %v4582_v39 = vld [vmem:[#allocation28_spill] sm:$0xff] }
  0xa8   : > { %4565 = vst [vmem:[#allocation40_spill] sm:$0xff] %v4564_v34  ;;  %4568 = vst [vmem:[#allocation41_spill] sm:$0xff] %v4567_v60  ;;  %v872_v31 = vsub.f32 %v3450_v37, %v3691_v58  ;;  %v873_v16 = vsub.f32 %v3453_v41, %v3691_v58  ;;  %v876_v12 = vsub.f32 %v3462_v43, %v3691_v58 }
  0xa9   : > { %v877_v11 = vsub.f32 %v3465_v48, %v3691_v58  ;;  %v880_v6 = vsub.f32 %v3476_v47, %v3691_v58  ;;  %v881_v35 = vsub.f32 %v3479_v49, %v3691_v58  ;;  %v884_v60 = vsub.f32 %v3488_v52, %v3691_v58  ;;  %vm3830_vm1 = vmpackc.low %vm1374_vm7, %vm1372_vm5 }
  0xaa   : > { %v885_v37 = vsub.f32 %v3491_v55, %v3691_v58  ;;  %v888_v41 = vsub.f32 %v3500_v56, %v3691_v58  ;;  %v889_v43 = vsub.f32 %v3511_v61, %v3691_v58  ;;  %v892_v48 = vsub.f32 %v3520_v1, %v3691_v58 }
  0xab   : > { %v893_v47 = vsub.f32 %v3527_v21, %v3691_v58  ;;  %v896_v49 = vsub.f32 %v3536_v24, %v3691_v58  ;;  %v897_v52 = vsub.f32 %v3543_v7, %v3691_v58  ;;  %v906_v34 = vmul.f32 1.442695, %v872_v31 }
  0xac   : > { %v908_v55 = vmul.f32 1.442695, %v873_v16  ;;  %v914_v15 = vmul.f32 1.442695, %v876_v12  ;;  %v916_v2 = vmul.f32 1.442695, %v877_v11  ;;  %v882_v61 = vsub.f32 %v3482_v50, %v3691_v58 }
  0xad   : > { %v922_v56 = vmul.f32 1.442695, %v880_v6  ;;  %2908 = vpow2.f32 %v906_v34  ;;  %v924_v26 = vmul.f32 1.442695, %v881_v35  ;;  %v930_v1 = vmul.f32 1.442695, %v884_v60 }
  0xae   : > { %v932_v57 = vmul.f32 1.442695, %v885_v37  ;;  %2910 = vpow2.f32 %v908_v55  ;;  %v938_v21 = vmul.f32 1.442695, %v888_v41  ;;  %v940_v4 = vmul.f32 1.442695, %v889_v43 }
  0xaf   : > { %v946_v3 = vmul.f32 1.442695, %v892_v48  ;;  %2912 = vpow2.f32 %v914_v15  ;;  %v948_v24 = vmul.f32 1.442695, %v893_v47  ;;  %v883_v7 = vsub.f32 %v3485_v51, %v3691_v58 }
  0xb0   : > { %v926_v31 = vmul.f32 1.442695, %v882_v61  ;;  %2914 = vpow2.f32 %v916_v2  ;;  %v878_v12 = vsub.f32 %v3470_v46, %v3691_v58  ;;  %v879_v50 = vsub.f32 %v3473_v44, %v3691_v58 }
  0xb1   : > { %v874_v34 = vsub.f32 %v3456_v38, %v3691_v58  ;;  %2916 = vpow2.f32 %v922_v56  ;;  %v928_v60 = vmul.f32 1.442695, %v883_v7  ;;  %v875_v15 = vsub.f32 %v3459_v42, %v3691_v58 }
  0xb2   : > { %v870_v16 = vsub.f32 %v3444_v36, %v3691_v58  ;;  %2918 = vpow2.f32 %v924_v26  ;;  %v918_v51 = vmul.f32 1.442695, %v878_v12  ;;  %v920_v2 = vmul.f32 1.442695, %v879_v50 }
  0xb3   : > { %v910_v11 = vmul.f32 1.442695, %v874_v34  ;;  %2920 = vpow2.f32 %v930_v1  ;;  %v912_v46 = vmul.f32 1.442695, %v875_v15  ;;  %v871_v44 = vsub.f32 %v3447_v40, %v3691_v58 }
  0xb4   : > { %v902_v6 = vmul.f32 1.442695, %v870_v16  ;;  %2922 = vpow2.f32 %v932_v57  ;;  %v900_v38 = vsub.f32 %v3556_v5, %v3691_v58  ;;  %v901_v42 = vsub.f32 %v3559_v33, %v3691_v58 }
  0xb5   : > { %v898_v36 = vsub.f32 %v3546_v30, %v3691_v58  ;;  %2924 = vpow2.f32 %v938_v21  ;;  %v904_v26 = vmul.f32 1.442695, %v871_v44  ;;  %v899_v35 = vsub.f32 %v3549_v32, %v3691_v58 }
  0xb6   : > { %v3749_v37 = vmul.f32 1.442695, %v896_v49  ;;  %2926 = vpow2.f32 %v940_v4  ;;  %v962_v40 = vmul.f32 1.442695, %v900_v38  ;;  %v3751_v41 = vmul.f32 1.442695, %v901_v42 }
  0xb7   : > { %v3753_v57 = vmul.f32 1.442695, %v898_v36  ;;  %2928 = vpow2.f32 %v946_v3  ;;  %v3755_v5 = vmul.f32 1.442695, %v899_v35  ;;  %v3757_v33 = vmul.f32 1.442695, %v897_v52 }
  0xb8   : > { %v894_v30 = vsub.f32 %v3530_v20, %v3691_v58  ;;  %2930 = vpow2.f32 %v948_v24  ;;  %v895_v32 = vsub.f32 %v3533_v25, %v3691_v58  ;;  %v890_v4 = vsub.f32 %v3514_v62, %v3691_v58 }
  0xb9   : > { %v891_v43 = vsub.f32 %v3517_v63, %v3691_v58  ;;  %2932 = vpow2.f32 %v926_v31  ;;  %v886_v3 = vsub.f32 %v3494_v53, %v3691_v58  ;;  %v887_v47 = vsub.f32 %v3497_v54, %v3691_v58 }
  0xba   : > { %v3767_v48 = vmul.f32 1.442695, %v894_v30  ;;  %v2909_v20 = vpop.eup %2908  ;;  %2934 = vpow2.f32 %v928_v60  ;;  %v3773_v49 = vmul.f32 1.442695, %v895_v32  ;;  %v3775_v25 = vmul.f32 1.442695, %v890_v4 }
  0xbb   : > { %v3777_v52 = vmul.f32 1.442695, %v891_v43  ;;  %v2911_v62 = vpop.eup %2910  ;;  %2936 = vpow2.f32 %v918_v51  ;;  %v968_v63 = vmul.f32 %v2909_v20, %v3385_v8  ;;  %v2632_v55 = vpack.c.bf16 %v2909_v20, %v2909_v20  ;;  %v4569_v20 = vld [vmem:[#allocation17_spill] sm:$0xff] }
  0xbc   : > { %v3780_v56 = vmul.f32 1.442695, %v886_v3  ;;  %v2913_v61 = vpop.eup %2912  ;;  %2938 = vpow2.f32 %v920_v2  ;;  %v969_v53 = vmul.f32 %v2911_v62, %v3387_v9  ;;  %v2633_v54 = vpack.c.bf16 %v2911_v62, %v2911_v62 }
  0xbd   : > { %v3783_v1 = vmul.f32 1.442695, %v887_v47  ;;  %v2915_v21 = vpop.eup %2914  ;;  %v972_v24 = vmul.f32 %v2913_v61, %v3393_v13  ;;  %v2636_v7 = vpack.c.bf16 %v2913_v61, %v2913_v61  ;;  %2940 = vpow2.f32 %v910_v11  ;;  %1288 = vst [vmem:[#allocation5 + $0x14] sm:$0xf] %v2632_v55  ;;  %v4570_v55 = vld [vmem:[#allocation18_spill] sm:$0xff] }
  0xbe   : > { %v2600_v31 = vpack.c.bf16 %v968_v63, %v968_v63  ;;  %v2917_v12 = vpop.eup %2916  ;;  %v973_v8 = vmul.f32 %v2915_v21, %v3395_v14  ;;  %v2637_v50 = vpack.c.bf16 %v2915_v21, %v2915_v21  ;;  %2942 = vpow2.f32 %v912_v46  ;;  %1289 = vst [vmem:[#allocation5 + $0x1c] sm:$0xf] %v2633_v54  ;;  %v4571_v21 = vld [vmem:[#allocation15_spill] sm:$0xff] }
  0xbf   : > { %v2601_v34 = vpack.c.bf16 %v969_v53, %v969_v53  ;;  %v2919_v60 = vpop.eup %2918  ;;  %v976_v9 = vmul.f32 %v2917_v12, %v3401_v28  ;;  %v2640_v15 = vpack.c.bf16 %v2917_v12, %v2917_v12  ;;  %v2604_v16 = vpack.c.bf16 %v972_v24, %v972_v24  ;;  %1292 = vst [vmem:[#allocation5 + $0x34] sm:$0xf] %v2636_v7  ;;  %v4572_v12 = vld [vmem:[#allocation16_spill] sm:$0xff] }
  0xc0   : > { %1128 = vst [vmem:[#allocation5 + $0x10] sm:$0xf] %v2600_v31  ;;  %2944 = vpow2.f32 %v902_v6  ;;  %v2921_v13 = vpop.eup %2920  ;;  %v977_v51 = vmul.f32 %v2919_v60, %v3403_v0  ;;  %v2641_v2 = vpack.c.bf16 %v2919_v60, %v2919_v60  ;;  %v2605_v11 = vpack.c.bf16 %v973_v8, %v973_v8  ;;  %1293 = vst [vmem:[#allocation5 + $0x3c] sm:$0xf] %v2637_v50  ;;  %v4573_v60 = vld [vmem:[#allocation13_spill] sm:$0xff] }
  0xc1   : > { %1129 = vst [vmem:[#allocation5 + $0x18] sm:$0xf] %v2601_v34  ;;  %2946 = vpow2.f32 %v904_v26  ;;  %v2923_v14 = vpop.eup %2922  ;;  %v980_v46 = vmul.f32 %v2921_v13, %v3409_v18  ;;  %v2644_v44 = vpack.c.bf16 %v2921_v13, %v2921_v13  ;;  %v2608_v38 = vpack.c.bf16 %v976_v9, %v976_v9  ;;  %1296 = vst [vmem:[#allocation5 + $0x54] sm:$0xf] %v2640_v15  ;;  %v4574_v13 = vld [vmem:[#allocation14_spill] sm:$0xff] }
  0xc2   : > { %1132 = vst [vmem:[#allocation5 + $0x30] sm:$0xf] %v2604_v16  ;;  %2948 = vpow2.f32 %v962_v40  ;;  %v2925_v28 = vpop.eup %2924  ;;  %v981_v42 = vmul.f32 %v2923_v14, %v3411_v19  ;;  %v2645_v6 = vpack.c.bf16 %v2923_v14, %v2923_v14  ;;  %v2609_v36 = vpack.c.bf16 %v977_v51, %v977_v51  ;;  %1297 = vst [vmem:[#allocation5 + $0x5c] sm:$0xf] %v2641_v2 }
  0xc3   : > { %1133 = vst [vmem:[#allocation5 + $0x38] sm:$0xf] %v2605_v11  ;;  %2950 = vpow2.f32 %v3751_v41  ;;  %v2927_v0 = vpop.eup %2926  ;;  %v2612_v35 = vpack.c.bf16 %v980_v46, %v980_v46  ;;  %1300 = vst [vmem:[#allocation5 + $0x74] sm:$0xf] %v2644_v44  ;;  %v984_v18 = vmul.f32 %v2925_v28, %v3417_v22  ;;  %v2648_v26 = vpack.c.bf16 %v2925_v28, %v2925_v28  ;;  %v4575_v44 = vld [vmem:[#allocation11_spill] sm:$0xff] }
  0xc4   : > { %1136 = vst [vmem:[#allocation5 + $0x50] sm:$0xf] %v2608_v38  ;;  %2952 = vpow2.f32 %v3753_v57  ;;  %v2929_v30 = vpop.eup %2928  ;;  %v2613_v40 = vpack.c.bf16 %v981_v42, %v981_v42  ;;  %1301 = vst [vmem:[#allocation5 + $0x7c] sm:$0xf] %v2645_v6  ;;  %v985_v19 = vmul.f32 %v2927_v0, %v3419_v23  ;;  %v2649_v32 = vpack.c.bf16 %v2927_v0, %v2927_v0  ;;  %v4576_v6 = vld [vmem:[#allocation12_spill] sm:$0xff] }
  0xc5   : > { %1137 = vst [vmem:[#allocation5 + $0x58] sm:$0xf] %v2609_v36  ;;  %2954 = vpow2.f32 %v3755_v5  ;;  %v2931_v4 = vpop.eup %2930  ;;  %1140 = vst [vmem:[#allocation5 + $0x70] sm:$0xf] %v2612_v35  ;;  %v988_v41 = vmul.f32 %v2929_v30, %v3425_v27  ;;  %v2652_v43 = vpack.c.bf16 %v2929_v30, %v2929_v30  ;;  %v2616_v57 = vpack.c.bf16 %v984_v18, %v984_v18 }
  0xc6   : > { %2956 = vpow2.f32 %v3749_v37  ;;  %1304 = vst [vmem:[#allocation5 + $0x94] sm:$0xf] %v2648_v26  ;;  %v2933_v22 = vpop.eup %2932  ;;  %1141 = vst [vmem:[#allocation5 + $0x78] sm:$0xf] %v2613_v40  ;;  %v989_v3 = vmul.f32 %v2931_v4, %v3427_v29  ;;  %v2653_v47 = vpack.c.bf16 %v2931_v4, %v2931_v4  ;;  %v2617_v5 = vpack.c.bf16 %v985_v19, %v985_v19  ;;  %v4577_v26 = vld [vmem:[#allocation29_spill] sm:$0xff]  ;;  %v3821_v19 = vld [vmem:[#allocation4 + $0x40] sm:$0xff] }
  0xc7   : > { %2958 = vpow2.f32 %v3757_v33  ;;  %1305 = vst [vmem:[#allocation5 + $0x9c] sm:$0xf] %v2649_v32  ;;  %v2935_v23 = vpop.eup %2934  ;;  %v978_v62 = vmul.f32 %v2933_v22, %v4569_v20  ;;  %v2642_v63 = vpack.c.bf16 %v2933_v22, %v2933_v22  ;;  %v2620_v37 = vpack.c.bf16 %v988_v41, %v988_v41  ;;  %1308 = vst [vmem:[#allocation5 + $0xb4] sm:$0xf] %v2652_v43  ;;  %v4578_v41 = vld [vmem:[#allocation30_spill] sm:$0xff] }
  0xc8   : > { %2960 = vpow2.f32 %v3767_v48  ;;  %1144 = vst [vmem:[#allocation5 + $0x90] sm:$0xf] %v2616_v57  ;;  %v2937_v27 = vpop.eup %2936  ;;  %v979_v61 = vmul.f32 %v2935_v23, %v4570_v55  ;;  %v2643_v53 = vpack.c.bf16 %v2935_v23, %v2935_v23  ;;  %v2621_v33 = vpack.c.bf16 %v989_v3, %v989_v3  ;;  %1309 = vst [vmem:[#allocation5 + $0xbc] sm:$0xf] %v2653_v47 }
  0xc9   : > { %2962 = vpow2.f32 %v3773_v49  ;;  %1145 = vst [vmem:[#allocation5 + $0x98] sm:$0xf] %v2617_v5  ;;  %v2939_v29 = vpop.eup %2938  ;;  %v2610_v54 = vpack.c.bf16 %v978_v62, %v978_v62  ;;  %1298 = vst [vmem:[#allocation5 + $0x64] sm:$0xf] %v2642_v63  ;;  %v974_v24 = vmul.f32 %v2937_v27, %v4571_v21  ;;  %v2638_v7 = vpack.c.bf16 %v2937_v27, %v2937_v27  ;;  %v4581_v5 = vld [vmem:[#allocation27_spill] sm:$0xff] }
  0xca   : > { %1148 = vst [vmem:[#allocation5 + $0xb0] sm:$0xf] %v2620_v37  ;;  %2964 = vpow2.f32 %v3775_v25  ;;  %v2941_v48 = vpop.eup %2940  ;;  %v2611_v31 = vpack.c.bf16 %v979_v61, %v979_v61  ;;  %1299 = vst [vmem:[#allocation5 + $0x6c] sm:$0xf] %v2643_v53  ;;  %v975_v8 = vmul.f32 %v2939_v29, %v4572_v12  ;;  %v2639_v50 = vpack.c.bf16 %v2939_v29, %v2939_v29 }
  0xcb   : > { %1149 = vst [vmem:[#allocation5 + $0xb8] sm:$0xf] %v2621_v33  ;;  %2966 = vpow2.f32 %v3777_v52  ;;  %v2943_v49 = vpop.eup %2942  ;;  %1138 = vst [vmem:[#allocation5 + $0x60] sm:$0xf] %v2610_v54  ;;  %v2606_v34 = vpack.c.bf16 %v974_v24, %v974_v24  ;;  %v970_v9 = vmul.f32 %v2941_v48, %v4573_v60  ;;  %v2634_v15 = vpack.c.bf16 %v2941_v48, %v2941_v48  ;;  %v2860_v52 = vld [vmem:[#allocation5 + $0x74] ss:$8 sps:$4 sm:$0xff]  }
  0xcc   : > { %1294 = vst [vmem:[#allocation5 + $0x44] sm:$0xf] %v2638_v7  ;;  %2968 = vpow2.f32 %v3780_v56  ;;  %1139 = vst [vmem:[#allocation5 + $0x68] sm:$0xf] %v2611_v31  ;;  %v2607_v25 = vpack.c.bf16 %v975_v8, %v975_v8  ;;  %v971_v51 = vmul.f32 %v2943_v49, %v4574_v13  ;;  %v2635_v2 = vpack.c.bf16 %v2943_v49, %v2943_v49  ;;  %v4583_v33 = vld [vmem:[#allocation25_spill] sm:$0xff]  ;;  %v4584_v31 = vld [vmem:[#allocation26_spill] sm:$0xff] }
  0xcd   : > { %v2945_v16 = vpop.eup %2944  ;;  %1295 = vst [vmem:[#allocation5 + $0x4c] sm:$0xf] %v2639_v50  ;;  %2970 = vpow2.f32 %v3783_v1  ;;  %v2862_v14 = vld [vmem:[#allocation5 + $0x70] ss:$8 sps:$4 sm:$0xff]   ;;  %1134 = vst [vmem:[#allocation5 + $0x40] sm:$0xf] %v2606_v34  ;;  %v2602_v46 = vpack.c.bf16 %v970_v9, %v970_v9  ;;  %1648 = vmatprep.subr.bf16.mxu0 %v2860_v52  ;;  %2750 = vmatprep.subr.bf16.mxu1 %v2860_v52  ;;  %v3842_v27 = vmax.f32 %v3821_v19, %v3691_v58 }
  0xce   : > { %v2947_v11 = vpop.eup %2946  ;;  %1290 = vst [vmem:[#allocation5 + $0x24] sm:$0xf] %v2634_v15  ;;  %v966_v38 = vmul.f32 %v2945_v16, %v4575_v44  ;;  %v2630_v28 = vpack.c.bf16 %v2945_v16, %v2945_v16  ;;  %1135 = vst [vmem:[#allocation5 + $0x48] sm:$0xf] %v2607_v25  ;;  %v2603_v42 = vpack.c.bf16 %v971_v51, %v971_v51  ;;  %v3818_v1 = vld [vmem:[#allocation4 + $0x8] sm:$0xff]  ;;  %1649 = vmatpush1.bf16.msra.mxu0 %v2862_v14 }
  0xcf   : > { %v2949_v56 = vpop.eup %2948  ;;  %1291 = vst [vmem:[#allocation5 + $0x2c] sm:$0xf] %v2635_v2  ;;  %v967_v36 = vmul.f32 %v2947_v11, %v4576_v6  ;;  %v2631_v0 = vpack.c.bf16 %v2947_v11, %v2947_v11  ;;  %1130 = vst [vmem:[#allocation5 + $0x20] sm:$0xf] %v2602_v46  ;;  %2766 = vmatpush1.bf16.msra.mxu1 %v2862_v14  ;;  %v3837_v62 = vmax.f32 %v3818_v1, %v3691_v58  ;;  %v2866_v49 = vld [vmem:[#allocation5 + $0x54] ss:$8 sps:$4 sm:$0xff]  }
  0xd0   : > { %v2951_v35 = vpop.eup %2950  ;;  %v2598_v18 = vpack.c.bf16 %v966_v38, %v966_v38  ;;  %1286 = vst [vmem:[#allocation5 + $0x4] sm:$0xf] %v2630_v28  ;;  %v996_v30 = vmul.f32 %v2949_v56, %v4577_v26  ;;  %v2660_v40 = vpack.c.bf16 %v2949_v56, %v2949_v56  ;;  %1131 = vst [vmem:[#allocation5 + $0x28] sm:$0xf] %v2603_v42  ;;  %v4585_v60 = vld [vmem:[#allocation23_spill] sm:$0xff]  ;;  %v4586_v13 = vld [vmem:[#allocation24_spill] sm:$0xff] }
  0xd1   : > { %v2953_v32 = vpop.eup %2952  ;;  %v2599_v4 = vpack.c.bf16 %v967_v36, %v967_v36  ;;  %1287 = vst [vmem:[#allocation5 + $0xc] sm:$0xf] %v2631_v0  ;;  %v997_v43 = vmul.f32 %v2951_v35, %v4578_v41  ;;  %v2661_v57 = vpack.c.bf16 %v2951_v35, %v2951_v35  ;;  %v2863_v61 = vld [vmem:[#allocation5 + $0x64] ss:$8 sps:$4 sm:$0xff]   ;;  %v774_v21 = vsub.f32 %v3818_v1, %v3837_v62  ;;  %v4587_v14 = vld [vmem:[#allocation21_spill] sm:$0xff]  ;;  %v4588_v42 = vld [vmem:[#allocation22_spill] sm:$0xff] }
  0xd2   : > { %v2955_v3 = vpop.eup %2954  ;;  %1126 = vst [vmem:[#allocation5] sm:$0xf] %v2598_v18  ;;  %v2628_v47 = vpack.c.bf16 %v996_v30, %v996_v30  ;;  %1316 = vst [vmem:[#allocation5 + $0xf4] sm:$0xf] %v2660_v40  ;;  %v994_v23 = vmul.f32 %v2953_v32, %v4581_v5  ;;  %v2658_v20 = vpack.c.bf16 %v2953_v32, %v2953_v32  ;;  %1650 = vmatprep.subr.bf16.mxu0 %v2863_v61  ;;  %v2868_v28 = vld [vmem:[#allocation5 + $0x50] ss:$8 sps:$4 sm:$0xff]  }
  0xd3   : > { %v2957_v63 = vpop.eup %2956  ;;  %1127 = vst [vmem:[#allocation5 + $0x8] sm:$0xf] %v2599_v4  ;;  %v2629_v59 = vpack.c.bf16 %v997_v43, %v997_v43  ;;  %1317 = vst [vmem:[#allocation5 + $0xfc] sm:$0xf] %v2661_v57  ;;  %v995_v10 = vmul.f32 %v2955_v3, %v4582_v39  ;;  %v2659_v37 = vpack.c.bf16 %v2955_v3, %v2955_v3  ;;  %v2865_v7 = vld [vmem:[#allocation5 + $0x60] ss:$8 sps:$4 sm:$0xff]   ;;  %2751 = vmatprep.subr.bf16.mxu1 %v2863_v61 }
  0xd4   : > { %v2959_v55 = vpop.eup %2958  ;;  %1156 = vst [vmem:[#allocation5 + $0xf0] sm:$0xf] %v2628_v47  ;;  %v2626_v53 = vpack.c.bf16 %v994_v23, %v994_v23  ;;  %1314 = vst [vmem:[#allocation5 + $0xe4] sm:$0xf] %v2658_v20  ;;  %v992_v29 = vmul.f32 %v2957_v63, %v4583_v33  ;;  %v2656_v54 = vpack.c.bf16 %v2957_v63, %v2957_v63  ;;  %1651 = vmatpush1.bf16.msra.mxu0 %v2865_v7  ;;  %v3854_v0 = vld [vmem:[#allocation4] sm:$0xff]  ;;  %v3859_v41 = vld [vmem:[#allocation4 + $0x28] sm:$0xff] }
  0xd5   : > { %1921 = vst [vmem:[#allocation4 + $0x8] sm:$0xff] %v3837_v62  ;;  %v2961_v24 = vpop.eup %2960  ;;  %1157 = vst [vmem:[#allocation5 + $0xf8] sm:$0xf] %v2629_v59  ;;  %v2627_v48 = vpack.c.bf16 %v995_v10, %v995_v10  ;;  %v993_v12 = vmul.f32 %v2959_v55, %v4584_v31  ;;  %v2657_v8 = vpack.c.bf16 %v2959_v55, %v2959_v55  ;;  %2767 = vmatpush1.bf16.msra.mxu1 %v2865_v7  ;;  %v2869_v18 = vld [vmem:[#allocation5 + $0x44] ss:$8 sps:$4 sm:$0xff]   ;;  %v3864_v23 = vld [vmem:[#allocation4 + $0x70] sm:$0xff] }
  0xd6   : > { %1315 = vst [vmem:[#allocation5 + $0xec] sm:$0xf] %v2659_v37  ;;  %1929 = vst [vmem:[#allocation4 + $0x40] sm:$0xff] %v3842_v27  ;;  %v2963_v50 = vpop.eup %2962  ;;  %v2624_v34 = vpack.c.bf16 %v992_v29, %v992_v29  ;;  %v990_v9 = vmul.f32 %v2961_v24, %v4585_v60  ;;  %v2654_v15 = vpack.c.bf16 %v2961_v24, %v2961_v24  ;;  %1652 = vmatprep.subr.bf16.mxu0 %v2866_v49  ;;  %v4589_v30 = vld [vmem:[#allocation19_spill] sm:$0xff]  ;;  %v4590_v57 = vld [vmem:[#allocation20_spill] sm:$0xff] }
  0xd7   : > { %1154 = vst [vmem:[#allocation5 + $0xe0] sm:$0xf] %v2626_v53  ;;  %1312 = vst [vmem:[#allocation5 + $0xd4] sm:$0xf] %v2656_v54  ;;  %v2965_v16 = vpop.eup %2964  ;;  %v2625_v25 = vpack.c.bf16 %v993_v12, %v993_v12  ;;  %v991_v51 = vmul.f32 %v2963_v50, %v4586_v13  ;;  %v2655_v2 = vpack.c.bf16 %v2963_v50, %v2963_v50  ;;  %2752 = vmatprep.subr.bf16.mxu1 %v2866_v49  ;;  %v3862_v5 = vld [vmem:[#allocation4 + $0x48] sm:$0xff]  ;;  %v3874_v37 = vld [vmem:[#allocation4 + $0x60] sm:$0xff] }
  0xd8   : > { %1155 = vst [vmem:[#allocation5 + $0xe8] sm:$0xf] %v2627_v48  ;;  %1313 = vst [vmem:[#allocation5 + $0xdc] sm:$0xf] %v2657_v8  ;;  %v2967_v11 = vpop.eup %2966  ;;  %v2622_v52 = vpack.c.bf16 %v990_v9, %v990_v9  ;;  %v986_v46 = vmul.f32 %v2965_v16, %v4587_v14  ;;  %v2650_v44 = vpack.c.bf16 %v2965_v16, %v2965_v16  ;;  %1653 = vmatpush1.bf16.msra.mxu0 %v2868_v28  ;;  %v2871_v59 = vld [vmem:[#allocation5 + $0x40] ss:$8 sps:$4 sm:$0xff]  }
  0xd9   : > { %1152 = vst [vmem:[#allocation5 + $0xd0] sm:$0xf] %v2624_v34  ;;  %1310 = vst [vmem:[#allocation5 + $0xc4] sm:$0xf] %v2654_v15  ;;  %v2969_v38 = vpop.eup %2968  ;;  %v2623_v56 = vpack.c.bf16 %v991_v51, %v991_v51  ;;  %v987_v6 = vmul.f32 %v2967_v11, %v4588_v42  ;;  %v2651_v36 = vpack.c.bf16 %v2967_v11, %v2967_v11  ;;  %2768 = vmatpush1.bf16.msra.mxu1 %v2868_v28  ;;  %v2872_v55 = vld [vmem:[#allocation5 + $0x34] ss:$8 sps:$4 sm:$0xff]  }
  0xda   : > { %1153 = vst [vmem:[#allocation5 + $0xd8] sm:$0xf] %v2625_v25  ;;  %1311 = vst [vmem:[#allocation5 + $0xcc] sm:$0xf] %v2655_v2  ;;  %v2971_v35 = vpop.eup %2970  ;;  %v2618_v26 = vpack.c.bf16 %v986_v46, %v986_v46  ;;  %v982_v40 = vmul.f32 %v2969_v38, %v4589_v30  ;;  %v2646_v32 = vpack.c.bf16 %v2969_v38, %v2969_v38  ;;  %1654 = vmatprep.subr.bf16.mxu0 %v2869_v18  ;;  %v3887_v29 = vld [vmem:[#allocation4 + $0x20] sm:$0xff]  ;;  %v3892_v24 = vld [vmem:[#allocation4 + $0x68] sm:$0xff] }
  0xdb   : > { %1150 = vst [vmem:[#allocation5 + $0xc0] sm:$0xf] %v2622_v52  ;;  %1306 = vst [vmem:[#allocation5 + $0xa4] sm:$0xf] %v2650_v44  ;;  %v782_v4 = vsub.f32 %v3821_v19, %v3842_v27  ;;  %v2619_v43 = vpack.c.bf16 %v987_v6, %v987_v6  ;;  %v983_v3 = vmul.f32 %v2971_v35, %v4590_v57  ;;  %2753 = vmatprep.subr.bf16.mxu1 %v2869_v18  ;;  %v3894_v7 = vld [vmem:[#allocation4 + $0x58] sm:$0xff]  ;;  %v3937_v52 = vld [vmem:[#allocation4 + $0x30] sm:$0xff] }
  0xdc   : > { %1151 = vst [vmem:[#allocation5 + $0xc8] sm:$0xf] %v2623_v56  ;;  %1307 = vst [vmem:[#allocation5 + $0xac] sm:$0xf] %v2651_v36  ;;  %v2647_v47 = vpack.c.bf16 %v2971_v35, %v2971_v35  ;;  %v2614_v20 = vpack.c.bf16 %v982_v40, %v982_v40  ;;  %v3868_v63 = vmax.f32 %v3854_v0, %v3691_v58  ;;  %1655 = vmatpush1.bf16.msra.mxu0 %v2871_v59  ;;  %v3902_v12 = vld [vmem:[#allocation4 + $0x18] sm:$0xff]  ;;  %v3939_v46 = vld [vmem:[#allocation4 + $0x10] sm:$0xff] }
  0xdd   : > { %1146 = vst [vmem:[#allocation5 + $0xa0] sm:$0xf] %v2618_v26  ;;  %1302 = vst [vmem:[#allocation5 + $0x84] sm:$0xf] %v2646_v32  ;;  %v2615_v39 = vpack.c.bf16 %v983_v3, %v983_v3  ;;  %v3872_v10 = vmax.f32 %v3859_v41, %v3691_v58  ;;  %v3881_v53 = vmax.f32 %v3862_v5, %v3691_v58  ;;  %2769 = vmatpush1.bf16.msra.mxu1 %v2871_v59  ;;  %v2874_v8 = vld [vmem:[#allocation5 + $0x30] ss:$8 sps:$4 sm:$0xff]  }
  0xde   : > { %1147 = vst [vmem:[#allocation5 + $0xa8] sm:$0xf] %v2619_v43  ;;  %1303 = vst [vmem:[#allocation5 + $0x8c] sm:$0xf] %v2647_v47  ;;  %v775_v61 = vsub.f32 %v3854_v0, %v3868_v63  ;;  %v3885_v33 = vmax.f32 %v3864_v23, %v3691_v58  ;;  %1656 = vmatprep.subr.bf16.mxu0 %v2872_v55  ;;  %2754 = vmatprep.subr.bf16.mxu1 %v2872_v55  ;;  %v2875_v50 = vld [vmem:[#allocation5 + $0x24] ss:$8 sps:$4 sm:$0xff]  }
  0xdf   : > { %1142 = vst [vmem:[#allocation5 + $0x80] sm:$0xf] %v2614_v20  ;;  %1922 = vst [vmem:[#allocation4] sm:$0xff] %v3868_v63  ;;  %v783_v54 = vsub.f32 %v3859_v41, %v3872_v10  ;;  %v776_v48 = vsub.f32 %v3862_v5, %v3881_v53  ;;  %v3906_v49 = vmax.f32 %v3874_v37, %v3691_v58  ;;  %v2877_v13 = vld [vmem:[#allocation5 + $0x20] ss:$8 sps:$4 sm:$0xff]   ;;  %v3941_v44 = vld [vmem:[#allocation4 + $0x50] sm:$0xff] }
  0xe0   : > { %1143 = vst [vmem:[#allocation5 + $0x88] sm:$0xf] %v2615_v39  ;;  %1930 = vst [vmem:[#allocation4 + $0x28] sm:$0xff] %v3872_v10  ;;  %v784_v31 = vsub.f32 %v3864_v23, %v3885_v33  ;;  %v3910_v34 = vmax.f32 %v3887_v29, %v3691_v58  ;;  %v3914_v60 = vmax.f32 %v3892_v24, %v3691_v58  ;;  %1657 = vmatpush1.bf16.msra.mxu0 %v2874_v8  ;;  %v2878_v51 = vld [vmem:[#allocation5 + $0x14] ss:$8 sps:$4 sm:$0xff]  }
  0xe1   : > { %1923 = vst [vmem:[#allocation4 + $0x48] sm:$0xff] %v3881_v53  ;;  %1931 = vst [vmem:[#allocation4 + $0x70] sm:$0xff] %v3885_v33  ;;  %v3918_v9 = vmax.f32 %v3894_v7, %v3691_v58  ;;  %2770 = vmatpush1.bf16.msra.mxu1 %v2874_v8  ;;  %v3922_v15 = vmax.f32 %v3902_v12, %v3691_v58  ;;  %1658 = vmatprep.subr.bf16.mxu0 %v2875_v50  ;;  %v2880_v14 = vld [vmem:[#allocation5 + $0x10] ss:$8 sps:$4 sm:$0xff]   ;;  %v2881_v38 = vld [vmem:[#allocation5 + $0x4] ss:$8 sps:$4 sm:$0xff]  }
  0xe2   : > { %2755 = vmatprep.subr.bf16.mxu1 %v2875_v50  ;;  %v777_v16 = vsub.f32 %v3874_v37, %v3906_v49  ;;  %1924 = vst [vmem:[#allocation4 + $0x60] sm:$0xff] %v3906_v49  ;;  %v785_v25 = vsub.f32 %v3887_v29, %v3910_v34  ;;  %1932 = vst [vmem:[#allocation4 + $0x20] sm:$0xff] %v3910_v34  ;;  %v778_v2 = vsub.f32 %v3892_v24, %v3914_v60  ;;  %v2883_v36 = vld [vmem:[#allocation5] ss:$8 sps:$4 sm:$0xff]   ;;  %v2884_v35 = vld [vmem:[#allocation5 + $0xf4] ss:$8 sps:$4 sm:$0xff]  }
  0xe3   : > { %1925 = vst [vmem:[#allocation4 + $0x68] sm:$0xff] %v3914_v60  ;;  %1933 = vst [vmem:[#allocation4 + $0x58] sm:$0xff] %v3918_v9  ;;  %v786_v11 = vsub.f32 %v3894_v7, %v3918_v9  ;;  %v779_v28 = vsub.f32 %v3902_v12, %v3922_v15  ;;  %v3947_v56 = vmax.f32 %v3937_v52, %v3691_v58  ;;  %v3966_v40 = vld [vmem:[#allocation4 + $0x38] sm:$0xff]  ;;  %v2887_v57 = vld [vmem:[#allocation5 + $0xe4] ss:$8 sps:$4 sm:$0xff]  }
  0xe4   : > { %1926 = vst [vmem:[#allocation4 + $0x18] sm:$0xff] %v3922_v15  ;;  %1659 = vmatpush1.bf16.msra.mxu0 %v2877_v13  ;;  %v3951_v42 = vmax.f32 %v3939_v46, %v3691_v58  ;;  %v3955_v6 = vmax.f32 %v3941_v44, %v3691_v58  ;;  %v2886_v32 = vld [vmem:[#allocation5 + $0xf0] ss:$8 sps:$4 sm:$0xff]   ;;  %v3972_v3 = vmax.f32 %v3966_v40, %v3691_v58  ;;  %v2889_v20 = vld [vmem:[#allocation5 + $0xe0] ss:$8 sps:$4 sm:$0xff]  }
  0xe5   : > { %2771 = vmatpush1.bf16.msra.mxu1 %v2877_v13  ;;  %1660 = vmatprep.subr.bf16.mxu0 %v2878_v51  ;;  %1934 = vst [vmem:[#allocation4 + $0x30] sm:$0xff] %v3947_v56  ;;  %v787_v18 = vsub.f32 %v3937_v52, %v3947_v56  ;;  %v3968_v43 = vld [vmem:[#allocation4 + $0x78] sm:$0xff]  ;;  %v2893_v50 = vld [vmem:[#allocation5 + $0xc4] ss:$8 sps:$4 sm:$0xff]   ;;  %v2895_v13 = vld [vmem:[#allocation5 + $0xc0] ss:$8 sps:$4 sm:$0xff]  }
  0xe6   : > { %2756 = vmatprep.subr.bf16.mxu1 %v2878_v51  ;;  %1927 = vst [vmem:[#allocation4 + $0x10] sm:$0xff] %v3951_v42  ;;  %1935 = vst [vmem:[#allocation4 + $0x50] sm:$0xff] %v3955_v6  ;;  %v780_v26 = vsub.f32 %v3939_v46, %v3951_v42  ;;  %v788_v30 = vsub.f32 %v3941_v44, %v3955_v6  ;;  %v3976_v47 = vmax.f32 %v3968_v43, %v3691_v58  ;;  %v2890_v39 = vld [vmem:[#allocation5 + $0xd4] ss:$8 sps:$4 sm:$0xff]   ;;  %v2892_v8 = vld [vmem:[#allocation5 + $0xd0] ss:$8 sps:$4 sm:$0xff]  }
  0xe7   : > { %v781_v59 = vsub.f32 %v3966_v40, %v3972_v3  ;;  %1928 = vst [vmem:[#allocation4 + $0x38] sm:$0xff] %v3972_v3  ;;  %v2896_v51 = vld [vmem:[#allocation5 + $0xb4] ss:$8 sps:$4 sm:$0xff]   ;;  %v792_v17 = vmul.f32 1.442695, %v775_v61  ;;  %v833_v61 = vsub.f32 %v3691_v58, %v3910_v34 }
  0xe8   : > { %1661 = vmatpush1.bf16.msra.mxu0 %v2880_v14  ;;  %v789_v55 = vsub.f32 %v3968_v43, %v3976_v47  ;;  %1936 = vst [vmem:[#allocation4 + $0x78] sm:$0xff] %v3976_v47  ;;  %v808_v19 = vmul.f32 1.442695, %v783_v54  ;;  %v794_v0 = vmul.f32 1.442695, %v776_v48  ;;  %v826_v54 = vsub.f32 %v3691_v58, %v3914_v60 }
  0xe9   : > { %2772 = vmatpush1.bf16.msra.mxu1 %v2880_v14  ;;  %1662 = vmatprep.subr.bf16.mxu0 %v2881_v38  ;;  %v2898_v14 = vld [vmem:[#allocation5 + $0xb0] ss:$8 sps:$4 sm:$0xff]   ;;  %v810_v41 = vmul.f32 1.442695, %v784_v31  ;;  %v796_v5 = vmul.f32 1.442695, %v777_v16  ;;  %v834_v48 = vsub.f32 %v3691_v58, %v3918_v9  ;;  %v827_v16 = vsub.f32 %v3691_v58, %v3922_v15 }
  0xea   : > { %2757 = vmatprep.subr.bf16.mxu1 %v2881_v38  ;;  %v2899_v38 = vld [vmem:[#allocation5 + $0xa4] ss:$8 sps:$4 sm:$0xff]   ;;  %v812_v23 = vmul.f32 1.442695, %v785_v25  ;;  %v798_v37 = vmul.f32 1.442695, %v778_v2 }
  0xeb   : > { %v814_v29 = vmul.f32 1.442695, %v786_v11  ;;  %v862_v25 = vmul.f32 1.442695, %v834_v48  ;;  %v800_v60 = vmul.f32 1.442695, %v779_v28 }
  0xec   : > { %1663 = vmatpush1.bf16.msra.mxu0 %v2883_v36  ;;  %v816_v9 = vmul.f32 1.442695, %v787_v18  ;;  %v1769_v15 = vld [vmem:[#allocation2 + $0x40] sm:$0xff]  ;;  %v1841_v28 = vld [vmem:[#allocation3 + $0x28] sm:$0xff] }
  0xed   : > { %2773 = vmatpush1.bf16.msra.mxu1 %v2883_v36  ;;  %1664 = vmatprep.subr.bf16.mxu0 %v2884_v35  ;;  %v2901_v36 = vld [vmem:[#allocation5 + $0xa0] ss:$8 sps:$4 sm:$0xff]  }
  0xee   : > { %2758 = vmatprep.subr.bf16.mxu1 %v2884_v35  ;;  %v2902_v35 = vld [vmem:[#allocation5 + $0x94] ss:$8 sps:$4 sm:$0xff]  }
  0xf0   : > { %1665 = vmatpush2.bf16.msra.mxu0 %v2886_v32 }
  0xf1   : > { %2774 = vmatpush2.bf16.msra.mxu1 %v2886_v32  ;;  %1666 = vmatprep.subr.bf16.mxu0 %v2887_v57  ;;  %v2904_v32 = vld [vmem:[#allocation5 + $0x90] ss:$8 sps:$4 sm:$0xff]  }
  0xf2   : > { %2759 = vmatprep.subr.bf16.mxu1 %v2887_v57  ;;  %v2905_v57 = vld [vmem:[#allocation5 + $0x84] ss:$8 sps:$4 sm:$0xff]  }
  0xf4   : > { %1667 = vmatpush2.bf16.msra.mxu0 %v2889_v20 }
  0xf5   : > { %2775 = vmatpush2.bf16.msra.mxu1 %v2889_v20  ;;  %1668 = vmatprep.subr.bf16.mxu0 %v2890_v39  ;;  %v2907_v20 = vld [vmem:[#allocation5 + $0x80] ss:$8 sps:$4 sm:$0xff]  }
  0xf6   : > { %2760 = vmatprep.subr.bf16.mxu1 %v2890_v39  ;;  %v4591_v39 = vmov 1.0|1.0  }
  0xf8   : > { %1669 = vmatpush2.bf16.msra.mxu0 %v2892_v8 }
  0xf9   : > { %2776 = vmatpush2.bf16.msra.mxu1 %v2892_v8  ;;  %1670 = vmatprep.subr.bf16.mxu0 %v2893_v50  ;;  %v790_v8 = vmul.f32 1.442695, %v774_v21  ;;  %v832_v21 = vsub.f32 %v3691_v58, %v3885_v33  ;;  %v860_v33 = vmul.f32 1.442695, %v833_v61  ;;  %v829_v61 = vsub.f32 %v3691_v58, %v3972_v3 }
  0xfa   : > { %2761 = vmatprep.subr.bf16.mxu1 %v2893_v50  ;;  %v837_v3 = vsub.f32 %v3691_v58, %v3976_v47 }
  0xfb   : > { %2972 = vpow2.f32 %v790_v8  ;;  %v1849_v8 = vld [vmem:[#allocation3 + $0x20] sm:$0xff]  ;;  %v852_v40 = vmul.f32 1.442695, %v829_v61 }
  0xfc   : > { %1671 = vmatpush2.bf16.msra.mxu0 %v2895_v13  ;;  %v868_v47 = vmul.f32 1.442695, %v837_v3 }
  0xfd   : > { %2777 = vmatpush2.bf16.msra.mxu1 %v2895_v13  ;;  %1672 = vmatprep.subr.bf16.mxu0 %v2896_v51  ;;  %v4594_v13 = vld [vmem:[#allocation33_spill] sm:$0xff] }
  0xfe   : > { %2762 = vmatprep.subr.bf16.mxu1 %v2896_v51  ;;  %vm4595_vm12 = vnez %v4594_v13  ;;  %v823_v13 = vsub.f32 %v3691_v58, %v3868_v63  ;;  %v806_v51 = vmul.f32 1.442695, %v782_v4  ;;  %v825_v63 = vsub.f32 %v3691_v58, %v3906_v49 }
  0xff   : > { %v846_v49 = vmul.f32 1.442695, %v826_v54  ;;  %v1850_v54 = vld [vmem:[#allocation3 + $0x78] sm:$0xff] }
 0x100   : > { %1673 = vmatpush2.bf16.msra.mxu0 %v2898_v14  ;;  %v840_v1 = vmul.f32 1.442695, %v823_v13  ;;  %v1762_v13 = vld [vmem:[#allocation2] sm:$0xff] }
 0x101   : > { %2778 = vmatpush2.bf16.msra.mxu1 %v2898_v14  ;;  %1674 = vmatprep.subr.bf16.mxu0 %v2899_v38  ;;  %v4599_v14 = vld [vmem:[#allocation37_spill] sm:$0xff] }
 0x102   : > { %2763 = vmatprep.subr.bf16.mxu1 %v2899_v38  ;;  %v4601_v38 = vld [vmem:[#allocation38_spill] sm:$0xff] }
 0x104   : > { %1675 = vmatpush2.bf16.msra.mxu0 %v2901_v36 }
 0x105   : > { %2779 = vmatpush2.bf16.msra.mxu1 %v2901_v36  ;;  %1676 = vmatprep.subr.bf16.mxu0 %v2902_v35  ;;  %v828_v36 = vsub.f32 %v3691_v58, %v3951_v42  ;;  %v818_v42 = vmul.f32 1.442695, %v788_v30 }
 0x106   : > { %2764 = vmatprep.subr.bf16.mxu1 %v2902_v35  ;;  %v1761_v35 = vld [vmem:[#allocation2 + $0x30] sm:$0xff] }
 0x107   : > { %v850_v52 = vmul.f32 1.442695, %v828_v36 }
 0x108   : > { %1677 = vmatpush2.bf16.msra.mxu0 %v2904_v32  ;;  %v2973_v31 = vpop.eup %2972 }
 0x109   : > { %2780 = vmatpush2.bf16.msra.mxu1 %v2904_v32  ;;  %1678 = vmatprep.subr.bf16.mxu0 %v2905_v57  ;;  %v1857_v46 = vmul.f32 %v2973_v31, %v1841_v28  ;;  %v1843_v28 = vld [vmem:[#allocation3 + $0x10] sm:$0xff] }
 0x10a   : > { %2765 = vmatprep.subr.bf16.mxu1 %v2905_v57  ;;  %v822_v57 = vsub.f32 %v3691_v58, %v3837_v62  ;;  %v824_v62 = vsub.f32 %v3691_v58, %v3881_v53  ;;  %v844_v53 = vmul.f32 1.442695, %v825_v63 }
 0x10c   : > { %1679 = vmatpush2.bf16.msra.mxu0 %v2907_v20  ;;  %v838_v50 = vmul.f32 1.442695, %v822_v57  ;;  %v842_v4 = vmul.f32 1.442695, %v824_v62  ;;  %v802_v57 = vmul.f32 1.442695, %v780_v26 }
 0x10d   : > { %2781 = vmatpush2.bf16.msra.mxu1 %v2907_v20  ;;  %v830_v20 = vsub.f32 %v3691_v58, %v3842_v27 }
 0x10e   : > { %2974 = vpow2.f32 %v838_v50  ;;  %v1777_v50 = vmul.f32 %v2973_v31, %v1761_v35 }
 0x10f   : > { %2565 = vmatmul.mubr.msk.bf16.vlgmr.msra.gmra.mxu0 %vm3604_vm11, %v4591_v39  ;;  %vm4600_vm11 = vnez %v4599_v14  ;;  %v854_v22 = vmul.f32 1.442695, %v830_v20  ;;  %2976 = vpow2.f32 %v806_v51  ;;  %v835_v14 = vsub.f32 %v3691_v58, %v3947_v56 }
 0x110   : > { %2581 = vmatmul.mubr.msk.bf16.vlgmr.msra.gmra.mxu1 %vm3611_vm13, %v4591_v39  ;;  %2567 = vmatprep.mubr.msk.bf16.mxu0 %vm3619_vm0, %v4591_v39  ;;  %vm4602_vm13 = vnez %v4601_v38  ;;  %v848_v38 = vmul.f32 1.442695, %v827_v16  ;;  %v836_v56 = vsub.f32 %v3691_v58, %v3955_v6 }
 0x111   : > { %2583 = vmatprep.mubr.msk.bf16.mxu1 %vm3626_vm4, %v4591_v39  ;;  %2978 = vpow2.f32 %v854_v22  ;;  %v864_v32 = vmul.f32 1.442695, %v835_v14  ;;  %v1763_v14 = vld [vmem:[#allocation2 + $0x58] sm:$0xff] }
 0x112   : > { %2980 = vpow2.f32 %v792_v17 }
 0x113   : > { %2982 = vpow2.f32 %v840_v1 }
 0x114   : > { %2984 = vpow2.f32 %v808_v19 }
 0x117   : > { %2569 = vmatmul.mubr.msk.bf16.gmra.mxu0 %vm4595_vm12, %v4591_v39 }
 0x118   : > { %2585 = vmatmul.mubr.msk.bf16.gmra.mxu1 %vm3643_vm14, %v4591_v39  ;;  %2571 = vmatprep.mubr.msk.bf16.mxu0 %vm3648_vm2, %v4591_v39 }
 0x119   : > { %2587 = vmatprep.mubr.msk.bf16.mxu1 %vm3653_vm15, %v4591_v39 }
 0x11b   : > { %v2975_v45 = vpop.eup %2974 }
 0x11c   : > { %v2977_v34 = vpop.eup %2976 }
 0x11d   : > { %v1785_v17 = vmul.f32 %v2977_v34, %v1769_v15  ;;  %v1865_v19 = vmul.f32 %v2977_v34, %v1849_v8 }
 0x11e   : > { %v2979_v24 = vpop.eup %2978 }
 0x11f   : > { %2573 = vmatmul.mubr.msk.bf16.gmra.mxu0 %vm4600_vm11, %v4591_v39  ;;  %v2981_v2 = vpop.eup %2980 }
 0x120   : > { %2589 = vmatmul.mubr.msk.bf16.gmra.mxu1 %vm4602_vm13, %v4591_v39  ;;  %2575 = vmatprep.mubr.msk.bf16.mxu0 %vm3679_vm10, %v4591_v39  ;;  %v4085_v7 = vpop.eup %2982 }
 0x121   : > { %2591 = vmatprep.mubr.msk.bf16.mxu1 %vm3687_vm3, %v4591_v39  ;;  %v4090_v11 = vpop.eup %2984 }
 0x122   : > { %v1866_v36 = vmul.f32 %v4090_v11, %v1850_v54 }
 0x127   : > { %2577 = vmatmul.mubr.msk.bf16.gmra.mxu0 %vm3693_vm6, %v4591_v39 }
 0x128   : > { %2593 = vmatmul.mubr.msk.bf16.gmra.mxu1 %vm3830_vm1, %v4591_v39  ;;  %v831_v39 = vsub.f32 %v3691_v58, %v3872_v10  ;;  %v858_v10 = vmul.f32 1.442695, %v832_v21  ;;  %v1842_v21 = vld [vmem:[#allocation3 + $0x68] sm:$0xff] }
 0x129   : > { %v1858_v31 = vmul.f32 %v2981_v2, %v1842_v21 }
 0x12a   : > { %v856_v27 = vmul.f32 1.442695, %v831_v39 }
 0x12c   : > { %2986 = vpow2.f32 %v856_v27  ;;  %v1770_v27 = vld [vmem:[#allocation2 + $0x20] sm:$0xff] }
 0x12d   : > { %2988 = vpow2.f32 %v794_v0 }
 0x12e   : > { %2990 = vpow2.f32 %v842_v4 }
 0x12f   : > { %2992 = vpow2.f32 %v810_v41  ;;  %v1778_v41 = vmul.f32 %v2981_v2, %v1762_v13 }
 0x130   : > { %2994 = vpow2.f32 %v858_v10  ;;  %v866_v10 = vmul.f32 1.442695, %v836_v56 }
 0x131   : > { %2996 = vpow2.f32 %v796_v5 }
 0x132   : > { %2998 = vpow2.f32 %v844_v53 }
 0x133   : > { %3000 = vpow2.f32 %v812_v23 }
 0x134   : > { %3002 = vpow2.f32 %v860_v33 }
 0x135   : > { %3004 = vpow2.f32 %v798_v37  ;;  %v1786_v37 = vmul.f32 %v4090_v11, %v1770_v27 }
 0x136   : > { %3006 = vpow2.f32 %v846_v49  ;;  %v804_v49 = vmul.f32 1.442695, %v781_v59 }
 0x137   : > { %3008 = vpow2.f32 %v814_v29 }
 0x138   : > { %3010 = vpow2.f32 %v862_v25 }
 0x139   : > { %v4092_v12 = vpop.eup %2986  ;;  %3012 = vpow2.f32 %v800_v60 }
 0x13a   : > { %v4097_v20 = vpop.eup %2988  ;;  %3014 = vpow2.f32 %v848_v38 }
 0x13b   : > { %v4101_v18 = vpop.eup %2990  ;;  %3016 = vpow2.f32 %v816_v9 }
 0x13c   : > { %v4103_v51 = vpop.eup %2992  ;;  %3018 = vpow2.f32 %v864_v32 }
 0x13d   : > { %v4108_v26 = vpop.eup %2994  ;;  %3020 = vpow2.f32 %v802_v57  ;;  %v1851_v57 = vld [vmem:[#allocation3 + $0x18] sm:$0xff] }
 0x13e   : > { %v4110_v0 = vpop.eup %2996  ;;  %3022 = vpow2.f32 %v850_v52  ;;  %v1779_v52 = vmul.f32 %v4097_v20, %v1763_v14  ;;  %v1867_v43 = vmul.f32 %v4103_v51, %v1851_v57 }
 0x13f   : > { %v4114_v44 = vpop.eup %2998  ;;  %3024 = vpow2.f32 %v818_v42 }
 0x140   : > { %v4116_v23 = vpop.eup %3000  ;;  %3026 = vpow2.f32 %v866_v10  ;;  %v1852_v10 = vld [vmem:[#allocation3 + $0x58] sm:$0xff] }
 0x141   : > { %v4122_v16 = vpop.eup %3002  ;;  %3028 = vpow2.f32 %v804_v49 }
 0x142   : > { %v4126_v60 = vpop.eup %3004  ;;  %3030 = vpow2.f32 %v852_v40 }
 0x143   : > { %v4131_v59 = vpop.eup %3006 }
 0x144   : > { %v4135_v8 = vpop.eup %3008 }
 0x145   : > { %v4142_v13 = vpop.eup %3010 }
 0x146   : > { %v4146_v42 = vpop.eup %3012 }
 0x1cf   : > { %v1682_v22 = vpop.f32.mrf.mxu0 }
 0x1d0   : > { %v1722_v39 = vpop.f32.mrf.mxu1  ;;  %v1793_v1 = vmul.f32 %v2975_v45, %v1682_v22 }
 0x1d1   : > { %v1801_v62 = vmul.f32 %v2979_v24, %v1722_v39  ;;  %v1684_v4 = vpop.f32.mrf.mxu0 }
 0x1d2   : > { %v1724_v63 = vpop.f32.mrf.mxu1  ;;  %v1809_v6 = vadd.f32 %v1793_v1, %v1777_v50  ;;  %v1873_v5 = vmul.f32 %v2975_v45, %v1684_v4  ;;  %v820_v50 = vmul.f32 1.442695, %v789_v55  ;;  %v4150_v55 = vpop.eup %3014 }
 0x1d3   : > { %v1817_v30 = vadd.f32 %v1801_v62, %v1785_v17  ;;  %v1881_v53 = vmul.f32 %v2979_v24, %v1724_v63  ;;  %v1686_v33 = vpop.f32.mrf.mxu0  ;;  %v1771_v24 = vld [vmem:[#allocation2 + $0x10] sm:$0xff]  ;;  %v1764_v17 = vld [vmem:[#allocation2 + $0x18] sm:$0xff]  ;;  %v1859_v62 = vmul.f32 %v4097_v20, %v1843_v28  ;;  %v4154_v61 = vpop.eup %3016  ;;  %v1766_v28 = vld [vmem:[#allocation2 + $0x68] sm:$0xff] }
 0x1d4   : > { %v1726_v48 = vpop.f32.mrf.mxu1  ;;  %1825 = vst [vmem:[#allocation2 + $0x30] sm:$0xff] %v1809_v6  ;;  %v1889_v29 = vadd.f32 %v1873_v5, %v1857_v46  ;;  %v1794_v34 = vmul.f32 %v4085_v7, %v1686_v33  ;;  %v1787_v58 = vmul.f32 %v4103_v51, %v1771_v24  ;;  %v1772_v46 = vld [vmem:[#allocation2 + $0x38] sm:$0xff]  ;;  %v1780_v6 = vmul.f32 %v4110_v0, %v1764_v17  ;;  %v4158_v5 = vpop.eup %3018  ;;  %v1765_v33 = vld [vmem:[#allocation2 + $0x50] sm:$0xff]  ;;  %v1854_v17 = vld [vmem:[#allocation3 + $0x8] sm:$0xff] }
 0x1d5   : > { %1833 = vst [vmem:[#allocation2 + $0x40] sm:$0xff] %v1817_v30  ;;  %v1897_v45 = vadd.f32 %v1881_v53, %v1865_v19  ;;  %v1802_v25 = vmul.f32 %v4092_v12, %v1726_v48  ;;  %v1688_v2 = vpop.f32.mrf.mxu0  ;;  %v1788_v30 = vmul.f32 %v4116_v23, %v1772_v46  ;;  %3032 = vpow2.f32 %v820_v50  ;;  %v1773_v48 = vld [vmem:[#allocation2 + $0x60] sm:$0xff] }
 0x1d6   : > { %v1728_v38 = vpop.f32.mrf.mxu1  ;;  %1905 = vst [vmem:[#allocation3 + $0x28] sm:$0xff] %v1889_v29  ;;  %v1810_v9 = vadd.f32 %v1794_v34, %v1778_v41  ;;  %v1874_v32 = vmul.f32 %v4085_v7, %v1688_v2  ;;  %v1844_v41 = vld [vmem:[#allocation3 + $0x40] sm:$0xff]  ;;  %3034 = vpow2.f32 %v868_v47  ;;  %v1781_v3 = vmul.f32 %v4126_v60, %v1765_v33 }
 0x1d7   : > { %1913 = vst [vmem:[#allocation3 + $0x20] sm:$0xff] %v1897_v45  ;;  %v1818_v35 = vadd.f32 %v1802_v25, %v1786_v37  ;;  %v1882_v15 = vmul.f32 %v4092_v12, %v1728_v38  ;;  %v1692_v11 = vpop.f32.mrf.mxu0  ;;  %v4162_v37 = vpop.eup %3020  ;;  %v1860_v49 = vmul.f32 %v4110_v0, %v1844_v41  ;;  %v1868_v45 = vmul.f32 %v4116_v23, %v1852_v10  ;;  %v1845_v38 = vld [vmem:[#allocation3 + $0x48] sm:$0xff] }
 0x1d8   : > { %v1732_v56 = vpop.f32.mrf.mxu1  ;;  %1826 = vst [vmem:[#allocation2] sm:$0xff] %v1810_v9  ;;  %v1890_v7 = vadd.f32 %v1874_v32, %v1858_v31  ;;  %v1795_v22 = vmul.f32 %v4101_v18, %v1692_v11  ;;  %v4166_v34 = vpop.eup %3022  ;;  %v1789_v9 = vmul.f32 %v4135_v8, %v1773_v48  ;;  %v1861_v11 = vmul.f32 %v4126_v60, %v1845_v38 }
 0x1d9   : > { %1834 = vst [vmem:[#allocation2 + $0x20] sm:$0xff] %v1818_v35  ;;  %v1898_v12 = vadd.f32 %v1882_v15, %v1866_v36  ;;  %v1803_v39 = vmul.f32 %v4108_v26, %v1732_v56  ;;  %v1694_v1 = vpop.f32.mrf.mxu0  ;;  %v1853_v36 = vld [vmem:[#allocation3] sm:$0xff]  ;;  %v4172_v23 = vpop.eup %3024  ;;  %v1870_v41 = vmul.f32 %v4154_v61, %v1854_v17 }
 0x1da   : > { %v1734_v19 = vpop.f32.mrf.mxu1  ;;  %1906 = vst [vmem:[#allocation3 + $0x68] sm:$0xff] %v1890_v7  ;;  %v1811_v27 = vadd.f32 %v1795_v22, %v1779_v52  ;;  %v1875_v4 = vmul.f32 %v4101_v18, %v1694_v1  ;;  %v1869_v56 = vmul.f32 %v4135_v8, %v1853_v36  ;;  %v1782_v1 = vmul.f32 %v4146_v42, %v1766_v28 }
 0x1db   : > { %1914 = vst [vmem:[#allocation3 + $0x78] sm:$0xff] %v1898_v12  ;;  %v1819_v21 = vadd.f32 %v1803_v39, %v1787_v58  ;;  %v1883_v63 = vmul.f32 %v4108_v26, %v1734_v19  ;;  %v1696_v20 = vpop.f32.mrf.mxu0  ;;  %v3027_v58 = vpop.eup %3026  ;;  %v1846_v39 = vld [vmem:[#allocation3 + $0x30] sm:$0xff] }
 0x1dc   : > { %v1736_v51 = vpop.f32.mrf.mxu1  ;;  %1827 = vst [vmem:[#allocation2 + $0x58] sm:$0xff] %v1811_v27  ;;  %v1891_v53 = vadd.f32 %v1875_v4, %v1859_v62  ;;  %v1796_v18 = vmul.f32 %v4114_v44, %v1696_v20  ;;  %v3029_v19 = vpop.eup %3028  ;;  %v1862_v4 = vmul.f32 %v4146_v42, %v1846_v39 }
 0x1dd   : > { %1835 = vst [vmem:[#allocation2 + $0x10] sm:$0xff] %v1819_v21  ;;  %v1899_v54 = vadd.f32 %v1883_v63, %v1867_v43  ;;  %v1804_v26 = vmul.f32 %v4122_v16, %v1736_v51  ;;  %v1698_v31 = vpop.f32.mrf.mxu0  ;;  %v1775_v21 = vld [vmem:[#allocation2 + $0x78] sm:$0xff]  ;;  %v3031_v10 = vpop.eup %3030 }
 0x1de   : > { %v1738_v29 = vpop.f32.mrf.mxu1  ;;  %1907 = vst [vmem:[#allocation3 + $0x10] sm:$0xff] %v1891_v53  ;;  %v1812_v25 = vadd.f32 %v1796_v18, %v1780_v6  ;;  %v1876_v24 = vmul.f32 %v4114_v44, %v1698_v31  ;;  %v1847_v53 = vld [vmem:[#allocation3 + $0x70] sm:$0xff]  ;;  %v1791_v42 = vmul.f32 %v4172_v23, %v1775_v21 }
 0x1df   : > { %1915 = vst [vmem:[#allocation3 + $0x18] sm:$0xff] %v1899_v54  ;;  %v1820_v14 = vadd.f32 %v1804_v26, %v1788_v30  ;;  %v1884_v2 = vmul.f32 %v4122_v16, %v1738_v29  ;;  %v1702_v40 = vpop.f32.mrf.mxu0  ;;  %v1774_v16 = vld [vmem:[#allocation2 + $0x70] sm:$0xff]  ;;  %v1855_v54 = vld [vmem:[#allocation3 + $0x60] sm:$0xff] }
 0x1e0   : > { %v1742_v0 = vpop.f32.mrf.mxu1  ;;  %1828 = vst [vmem:[#allocation2 + $0x18] sm:$0xff] %v1812_v25  ;;  %v1892_v35 = vadd.f32 %v1876_v24, %v1860_v49  ;;  %v1797_v15 = vmul.f32 %v4131_v59, %v1702_v40  ;;  %v1790_v60 = vmul.f32 %v4154_v61, %v1774_v16  ;;  %v1871_v24 = vmul.f32 %v4172_v23, %v1855_v54 }
 0x1e1   : > { %1836 = vst [vmem:[#allocation2 + $0x38] sm:$0xff] %v1820_v14  ;;  %v1900_v32 = vadd.f32 %v1884_v2, %v1868_v45  ;;  %v1805_v44 = vmul.f32 %v4142_v13, %v1742_v0  ;;  %v1704_v57 = vpop.f32.mrf.mxu0  ;;  %v1768_v45 = vld [vmem:[#allocation2 + $0x48] sm:$0xff]  ;;  %v1848_v0 = vld [vmem:[#allocation3 + $0x38] sm:$0xff] }
 0x1e2   : > { %v1744_v52 = vpop.f32.mrf.mxu1  ;;  %1908 = vst [vmem:[#allocation3 + $0x40] sm:$0xff] %v1892_v35  ;;  %v1813_v50 = vadd.f32 %v1797_v15, %v1781_v3  ;;  %v1877_v12 = vmul.f32 %v4131_v59, %v1704_v57  ;;  %v1767_v59 = vld [vmem:[#allocation2 + $0x8] sm:$0xff]  ;;  %v3033_v48 = vpop.eup %3032 }
 0x1e3   : > { %1916 = vst [vmem:[#allocation3 + $0x58] sm:$0xff] %v1900_v32  ;;  %v1821_v7 = vadd.f32 %v1805_v44, %v1789_v9  ;;  %v1885_v22 = vmul.f32 %v4142_v13, %v1744_v52  ;;  %v1706_v46 = vpop.f32.mrf.mxu0  ;;  %v1783_v26 = vmul.f32 %v4162_v37, %v1767_v59  ;;  %v3035_v2 = vpop.eup %3034  ;;  %v1856_v9 = vld [vmem:[#allocation3 + $0x50] sm:$0xff]  ;;  %v1784_v32 = vmul.f32 %v3029_v19, %v1768_v45 }
 0x1e4   : > { %v1746_v62 = vpop.f32.mrf.mxu1  ;;  %1829 = vst [vmem:[#allocation2 + $0x50] sm:$0xff] %v1813_v50  ;;  %v1893_v8 = vadd.f32 %v1877_v12, %v1861_v11  ;;  %v1798_v47 = vmul.f32 %v4150_v55, %v1706_v46  ;;  %v1864_v11 = vmul.f32 %v3029_v19, %v1848_v0 }
 0x1e5   : > { %1837 = vst [vmem:[#allocation2 + $0x60] sm:$0xff] %v1821_v7  ;;  %v1901_v43 = vadd.f32 %v1885_v22, %v1869_v56  ;;  %v1806_v27 = vmul.f32 %v4158_v5, %v1746_v62  ;;  %v1708_v13 = vpop.f32.mrf.mxu0  ;;  %v1872_v56 = vmul.f32 %v3033_v48, %v1856_v9 }
 0x1e6   : > { %v1748_v63 = vpop.f32.mrf.mxu1  ;;  %1909 = vst [vmem:[#allocation3 + $0x48] sm:$0xff] %v1893_v8  ;;  %v1814_v20 = vadd.f32 %v1798_v47, %v1782_v1  ;;  %v1878_v51 = vmul.f32 %v4150_v55, %v1708_v13  ;;  %v1776_v55 = vld [vmem:[#allocation2 + $0x28] sm:$0xff] }
 0x1e7   : > { %1917 = vst [vmem:[#allocation3] sm:$0xff] %v1901_v43  ;;  %v1822_v6 = vadd.f32 %v1806_v27, %v1790_v60  ;;  %v1886_v30 = vmul.f32 %v4158_v5, %v1748_v63  ;;  %v1712_v18 = vpop.f32.mrf.mxu0  ;;  %v1863_v5 = vmul.f32 %v4162_v37, %v1847_v53  ;;  %v1792_v44 = vmul.f32 %v3033_v48, %v1776_v55 }
 0x1e8   : > { %v1752_v33 = vpop.f32.mrf.mxu1  ;;  %1830 = vst [vmem:[#allocation2 + $0x68] sm:$0xff] %v1814_v20  ;;  %v1894_v61 = vadd.f32 %v1878_v51, %v1862_v4  ;;  %v1799_v49 = vmul.f32 %v4166_v34, %v1712_v18 }
 0x1e9   : > { %1838 = vst [vmem:[#allocation2 + $0x70] sm:$0xff] %v1822_v6  ;;  %v1902_v31 = vadd.f32 %v1886_v30, %v1870_v41  ;;  %v1807_v29 = vmul.f32 %v3027_v58, %v1752_v33  ;;  %v1714_v25 = vpop.f32.mrf.mxu0 }
 0x1ea   : > { %v1754_v14 = vpop.f32.mrf.mxu1  ;;  %1910 = vst [vmem:[#allocation3 + $0x30] sm:$0xff] %v1894_v61  ;;  %v1815_v38 = vadd.f32 %v1799_v49, %v1783_v26  ;;  %v1879_v40 = vmul.f32 %v4166_v34, %v1714_v25 }
 0x1eb   : > { %1918 = vst [vmem:[#allocation3 + $0x8] sm:$0xff] %v1902_v31  ;;  %v1823_v36 = vadd.f32 %v1807_v29, %v1791_v42  ;;  %v1887_v3 = vmul.f32 %v3027_v58, %v1754_v14  ;;  %v1716_v35 = vpop.f32.mrf.mxu0 }
 0x1ec   : > { %v1756_v15 = vpop.f32.mrf.mxu1  ;;  %1831 = vst [vmem:[#allocation2 + $0x8] sm:$0xff] %v1815_v38  ;;  %v1895_v37 = vadd.f32 %v1879_v40, %v1863_v5  ;;  %v1800_v16 = vmul.f32 %v3031_v10, %v1716_v35 }
 0x1ed   : > { %1839 = vst [vmem:[#allocation2 + $0x78] sm:$0xff] %v1823_v36  ;;  %v1903_v28 = vadd.f32 %v1887_v3, %v1871_v24  ;;  %v1808_v23 = vmul.f32 %v3035_v2, %v1756_v15  ;;  %v1718_v57 = vpop.f32.mrf.mxu0 }
 0x1ee   : > { %v1758_v52 = vpop.f32.mrf.mxu1  ;;  %1911 = vst [vmem:[#allocation3 + $0x70] sm:$0xff] %v1895_v37  ;;  %v1816_v34 = vadd.f32 %v1800_v16, %v1784_v32  ;;  %v1880_v50 = vmul.f32 %v3031_v10, %v1718_v57 }
 0x1ef   : > { %1919 = vst [vmem:[#allocation3 + $0x60] sm:$0xff] %v1903_v28  ;;  %v1824_v58 = vadd.f32 %v1808_v23, %v1792_v44  ;;  %v1888_v7 = vmul.f32 %v3035_v2, %v1758_v52 }
 0x1f0   : > { %1832 = vst [vmem:[#allocation2 + $0x48] sm:$0xff] %v1816_v34  ;;  %v1896_v12 = vadd.f32 %v1880_v50, %v1864_v11 }
 0x1f1   : > { %1840 = vst [vmem:[#allocation2 + $0x28] sm:$0xff] %v1824_v58  ;;  %v1904_v22 = vadd.f32 %v1888_v7, %v1872_v56 }
 0x1f2   : > { %1912 = vst [vmem:[#allocation3 + $0x38] sm:$0xff] %v1896_v12 }
 0x1f3   : > { %1920 = vst [vmem:[#allocation3 + $0x50] sm:$0xff] %v1904_v22 }
 0x1f4 PF: > { %p2594_p5 = scmp.ne.s32.totalorder %s3104_s12, 2 }
 0x1f6   : > { %1940 = sbr.rel (%p2594_p5) target bundleno = 755 (0x2f3), region = 60 }
 0x1fb   : > { %v2148_v39 = vld [vmem:[%s4472_s5 + $0x78] sm:$0xff]  ;;  %v2147_v17 = vld [vmem:[%s4472_s5 + $0x70] sm:$0xff]  ;;  %v2146_v46 = vld [vmem:[%s4472_s5 + $0x68] sm:$0xff] }
 0x1fc   : > { %2694 = vmatprep.subr.mxu0 %v2148_v39  ;;  %2782 = vmatprep.subr.mxu1 %v2148_v39  ;;  %v2145_v1 = vld [vmem:[%s4472_s5 + $0x60] sm:$0xff]  ;;  %v4207_v62 = vld [vmem:[#allocation3 + $0x28] sm:$0xff]  ;;  %v2144_v60 = vld [vmem:[%s4472_s5 + $0x58] sm:$0xff] }
 0x1fd   : > { %2695 = vmatpush3.msra.mxu0 %v2148_v39  ;;  %2798 = vmatpush3.msra.mxu1 %v2148_v39  ;;  %v1957_v19 = vmax.f32 %v4207_v62, 1e-30  ;;  %v4213_v8 = vld [vmem:[#allocation3 + $0x20] sm:$0xff]  ;;  %v4216_v47 = vld [vmem:[#allocation3 + $0x68] sm:$0xff]  ;;  %v2143_v27 = vld [vmem:[%s4472_s5 + $0x50] sm:$0xff]  ;;  %vm2037_vm0 = vcmp.gt.f32.partialorder %v4207_v62, 0.0 }
 0x1fe   : > { %2696 = vmatprep.subr.mxu0 %v2147_v17  ;;  %2783 = vmatprep.subr.mxu1 %v2147_v17  ;;  %v1965_v43 = vmax.f32 %v4213_v8, 1e-30  ;;  %v1958_v59 = vmax.f32 %v4216_v47, 1e-30  ;;  %v4224_v21 = vld [vmem:[#allocation3 + $0x78] sm:$0xff]  ;;  %v4229_v4 = vld [vmem:[#allocation3 + $0x10] sm:$0xff] }
 0x1ff   : > { %2697 = vmatpush3.msra.mxu0 %v2147_v17  ;;  %2799 = vmatpush3.msra.mxu1 %v2147_v17  ;;  %3036 = vrcp.f32 %v1957_v19  ;;  %v1966_v13 = vmax.f32 %v4224_v21, 1e-30  ;;  %v2142_v63 = vld [vmem:[%s4472_s5 + $0x48] sm:$0xff]  ;;  %v1959_v41 = vmax.f32 %v4229_v4, 1e-30  ;;  %v4237_v10 = vld [vmem:[#allocation3 + $0x18] sm:$0xff] }
 0x200   : > { %2698 = vmatprep.subr.mxu0 %v2146_v46  ;;  %2784 = vmatprep.subr.mxu1 %v2146_v46  ;;  %3038 = vrcp.f32 %v1965_v43  ;;  %v1967_v20 = vmax.f32 %v4237_v10, 1e-30  ;;  %v4242_v6 = vld [vmem:[#allocation3 + $0x40] sm:$0xff]  ;;  %v4250_v53 = vld [vmem:[#allocation3 + $0x58] sm:$0xff]  ;;  %v4255_v18 = vld [vmem:[#allocation3 + $0x48] sm:$0xff]  ;;  %vm2045_vm4 = vcmp.gt.f32.partialorder %v4213_v8, 0.0 }
 0x201   : > { %2699 = vmatpush3.msra.mxu0 %v2146_v46  ;;  %2800 = vmatpush3.msra.mxu1 %v2146_v46  ;;  %3040 = vrcp.f32 %v1958_v59  ;;  %v2141_v51 = vld [vmem:[%s4472_s5 + $0x40] sm:$0xff]  ;;  %v1960_v30 = vmax.f32 %v4242_v6, 1e-30  ;;  %v1968_v54 = vmax.f32 %v4250_v53, 1e-30  ;;  %v2140_v26 = vld [vmem:[%s4472_s5 + $0x38] sm:$0xff] }
 0x202   : > { %2700 = vmatprep.subr.mxu0 %v2145_v1  ;;  %2785 = vmatprep.subr.mxu1 %v2145_v1  ;;  %3042 = vrcp.f32 %v1966_v13  ;;  %v1961_v33 = vmax.f32 %v4255_v18, 1e-30  ;;  %v4263_v42 = vld [vmem:[#allocation3] sm:$0xff]  ;;  %v4268_v61 = vld [vmem:[#allocation3 + $0x30] sm:$0xff]  ;;  %v4274_v29 = vld [vmem:[#allocation3 + $0x8] sm:$0xff]  ;;  %vm2038_vm14 = vcmp.gt.f32.partialorder %v4216_v47, 0.0 }
 0x203   : > { %2701 = vmatpush3.msra.mxu0 %v2145_v1  ;;  %2801 = vmatpush3.msra.mxu1 %v2145_v1  ;;  %3044 = vrcp.f32 %v1959_v41  ;;  %v1969_v48 = vmax.f32 %v4263_v42, 1e-30  ;;  %v2139_v31 = vld [vmem:[%s4472_s5 + $0x30] sm:$0xff]  ;;  %v1962_v49 = vmax.f32 %v4268_v61, 1e-30  ;;  %v2138_v25 = vld [vmem:[%s4472_s5 + $0x28] sm:$0xff] }
 0x204   : > { %2702 = vmatprep.subr.mxu0 %v2144_v60  ;;  %2786 = vmatprep.subr.mxu1 %v2144_v60  ;;  %3046 = vrcp.f32 %v1967_v20  ;;  %v1970_v45 = vmax.f32 %v4274_v29, 1e-30  ;;  %v4279_v55 = vld [vmem:[#allocation3 + $0x70] sm:$0xff]  ;;  %v4287_v14 = vld [vmem:[#allocation3 + $0x60] sm:$0xff]  ;;  %v4292_v2 = vld [vmem:[#allocation3 + $0x38] sm:$0xff]  ;;  %vm2046_vm2 = vcmp.gt.f32.partialorder %v4224_v21, 0.0 }
 0x205   : > { %2703 = vmatpush3.msra.mxu0 %v2144_v60  ;;  %2802 = vmatpush3.msra.mxu1 %v2144_v60  ;;  %3048 = vrcp.f32 %v1960_v30  ;;  %v1963_v5 = vmax.f32 %v4279_v55, 1e-30  ;;  %v1971_v24 = vmax.f32 %v4287_v14, 1e-30  ;;  %v2137_v38 = vld [vmem:[%s4472_s5 + $0x20] sm:$0xff]  ;;  %v4300_v40 = vld [vmem:[#allocation3 + $0x50] sm:$0xff] }
 0x206   : > { %2704 = vmatprep.subr.mxu0 %v2143_v27  ;;  %2787 = vmatprep.subr.mxu1 %v2143_v27  ;;  %3050 = vrcp.f32 %v1968_v54  ;;  %v1964_v36 = vmax.f32 %v4292_v2, 1e-30  ;;  %v2136_v9 = vld [vmem:[%s4472_s5 + $0x18] sm:$0xff]  ;;  %v1972_v32 = vmax.f32 %v4300_v40, 1e-30  ;;  %v2135_v28 = vld [vmem:[%s4472_s5 + $0x10] sm:$0xff] }
 0x207   : > { %2705 = vmatpush3.msra.mxu0 %v2143_v27  ;;  %2803 = vmatpush3.msra.mxu1 %v2143_v27  ;;  %3052 = vrcp.f32 %v1961_v33  ;;  %v2053_v11 = vld [vmem:[#allocation2 + $0x30] sm:$0xff]  ;;  %vm2039_vm15 = vcmp.gt.f32.partialorder %v4229_v4, 0.0  ;;  %vm2047_vm6 = vcmp.gt.f32.partialorder %v4237_v10, 0.0  ;;  %v2134_v58 = vld [vmem:[%s4472_s5 + $0x8] sm:$0xff]  ;;  %v2061_v7 = vld [vmem:[#allocation2 + $0x40] sm:$0xff]  ;;  %vm2040_vm9 = vcmp.gt.f32.partialorder %v4242_v6, 0.0 }
 0x208   : > { %2706 = vmatprep.subr.mxu0 %v2142_v63  ;;  %2788 = vmatprep.subr.mxu1 %v2142_v63  ;;  %3054 = vrcp.f32 %v1969_v48  ;;  %v2054_v46 = vld [vmem:[#allocation2] sm:$0xff]  ;;  %vm2048_vm10 = vcmp.gt.f32.partialorder %v4250_v53, 0.0  ;;  %vm2041_vm8 = vcmp.gt.f32.partialorder %v4255_v18, 0.0  ;;  %vm2049_vm3 = vcmp.gt.f32.partialorder %v4263_v42, 0.0  ;;  %v2115_v42 = vld [vmem:[%s3217_s28 + $0x70] sm:$0xff] }
 0x209   : > { %2707 = vmatpush3.msra.mxu0 %v2142_v63  ;;  %2804 = vmatpush3.msra.mxu1 %v2142_v63  ;;  %3056 = vrcp.f32 %v1962_v49  ;;  %v2062_v63 = vld [vmem:[#allocation2 + $0x20] sm:$0xff]  ;;  %vm2042_vm5 = vcmp.gt.f32.partialorder %v4268_v61, 0.0  ;;  %vm2050_vm7 = vcmp.gt.f32.partialorder %v4274_v29, 0.0  ;;  %vm2043_vm1 = vcmp.gt.f32.partialorder %v4279_v55, 0.0  ;;  %v2108_v61 = vld [vmem:[%s3217_s28 + $0x38] sm:$0xff] }
 0x20a   : > { %2708 = vmatprep.subr.mxu0 %v2141_v51  ;;  %2789 = vmatprep.subr.mxu1 %v2141_v51  ;;  %3058 = vrcp.f32 %v1970_v45  ;;  %vm2051_vm12 = vcmp.gt.f32.partialorder %v4287_v14, 0.0  ;;  %vm2044_vm11 = vcmp.gt.f32.partialorder %v4292_v2, 0.0  ;;  %vm2052_vm13 = vcmp.gt.f32.partialorder %v4300_v40, 0.0  ;;  %v2595_v2 = vld [vmem:[%s4473_s6] ss:$0 sm:$0xff] }
 0x20b   : > { %2709 = vmatpush3.msra.mxu0 %v2141_v51  ;;  %2805 = vmatpush3.msra.mxu1 %v2141_v51  ;;  %3060 = vrcp.f32 %v1963_v5 }
 0x20c   : > { %2710 = vmatprep.subr.mxu0 %v2140_v26  ;;  %2790 = vmatprep.subr.mxu1 %v2140_v26  ;;  %v3037_v3 = vpop.eup %3036  ;;  %3062 = vrcp.f32 %v1971_v24 }
 0x20d   : > { %2711 = vmatpush3.msra.mxu0 %v2140_v26  ;;  %2806 = vmatpush3.msra.mxu1 %v2140_v26  ;;  %v3039_v0 = vpop.eup %3038  ;;  %v1989_v35 = vmul.f32 %v3037_v3, %v1957_v19  ;;  %3064 = vrcp.f32 %v1964_v36  ;;  %v2109_v26 = vld [vmem:[%s3217_s28 + $0x40] sm:$0xff] }
 0x20e   : > { %2712 = vmatprep.subr.mxu0 %v2139_v31  ;;  %2791 = vmatprep.subr.mxu1 %v2139_v31  ;;  %v3041_v15 = vpop.eup %3040  ;;  %v1997_v44 = vmul.f32 %v3039_v0, %v1965_v43  ;;  %3066 = vrcp.f32 %v1972_v32  ;;  %v2133_v43 = vld [vmem:[%s4472_s5] sm:$0xff] }
 0x20f   : > { %2713 = vmatpush3.msra.mxu0 %v2139_v31  ;;  %2807 = vmatpush3.msra.mxu1 %v2139_v31  ;;  %v3043_v37 = vpop.eup %3042  ;;  %v2005_v16 = vsub.f32 2.0, %v1989_v35  ;;  %v1990_v23 = vmul.f32 %v3041_v15, %v1958_v59  ;;  %v2101_v59 = vld [vmem:[%s3217_s28] sm:$0xff]  ;;  %v2102_v35 = vld [vmem:[%s3217_s28 + $0x8] sm:$0xff] }
 0x210   : > { %2714 = vmatprep.subr.mxu0 %v2138_v25  ;;  %2792 = vmatprep.subr.mxu1 %v2138_v25  ;;  %v3045_v57 = vpop.eup %3044  ;;  %v2013_v52 = vsub.f32 2.0, %v1997_v44  ;;  %v1998_v56 = vmul.f32 %v3043_v37, %v1966_v13  ;;  %v2063_v44 = vld [vmem:[#allocation2 + $0x10] sm:$0xff] }
 0x211   : > { %2715 = vmatpush3.msra.mxu0 %v2138_v25  ;;  %2808 = vmatpush3.msra.mxu1 %v2138_v25  ;;  %v3047_v34 = vpop.eup %3046  ;;  %v2021_v50 = vmul.f32 %v3037_v3, %v2005_v16  ;;  %v2006_v12 = vsub.f32 2.0, %v1990_v23  ;;  %v1991_v22 = vmul.f32 %v3045_v57, %v1959_v41  ;;  %v2055_v25 = vld [vmem:[#allocation2 + $0x58] sm:$0xff] }
 0x212   : > { %2716 = vmatprep.subr.mxu0 %v2137_v38  ;;  %2793 = vmatprep.subr.mxu1 %v2137_v38  ;;  %v3049_v39 = vpop.eup %3048  ;;  %v2029_v17 = vmul.f32 %v3039_v0, %v2013_v52  ;;  %v2014_v1 = vsub.f32 2.0, %v1998_v56  ;;  %v1999_v60 = vmul.f32 %v3047_v34, %v1967_v20  ;;  %v2056_v56 = vld [vmem:[#allocation2 + $0x18] sm:$0xff] }
 0x213   : > { %2717 = vmatpush3.msra.mxu0 %v2137_v38  ;;  %2809 = vmatpush3.msra.mxu1 %v2137_v38  ;;  %v4339_v19 = vpop.eup %3050  ;;  %v2069_v27 = vmul.f32 %v2053_v11, %v2021_v50  ;;  %v2022_v13 = vmul.f32 %v3041_v15, %v2006_v12  ;;  %v2007_v41 = vsub.f32 2.0, %v1991_v22  ;;  %v1992_v20 = vmul.f32 %v3049_v39, %v1960_v30  ;;  %v2110_v11 = vld [vmem:[%s3217_s28 + $0x48] sm:$0xff] }
 0x214   : > { %2718 = vmatprep.subr.mxu0 %v2136_v9  ;;  %2794 = vmatprep.subr.mxu1 %v2136_v9  ;;  %v2077_v51 = vmul.f32 %v2061_v7, %v2029_v17  ;;  %v2030_v31 = vmul.f32 %v3043_v37, %v2014_v1  ;;  %v2015_v38 = vsub.f32 2.0, %v1999_v60  ;;  %v2000_v3 = vmul.f32 %v4339_v19, %v1968_v54  ;;  %v4352_v0 = vpop.eup %3052  ;;  %v2103_v7 = vld [vmem:[%s3217_s28 + $0x10] sm:$0xff] }
 0x215   : > { %2719 = vmatpush3.msra.mxu0 %v2136_v9  ;;  %2810 = vmatpush3.msra.mxu1 %v2136_v9  ;;  %v2085_v30 = vsel %vm2037_vm0, %v2069_v27, 0.0  ;;  %v2070_v9 = vmul.f32 %v2054_v46, %v2022_v13  ;;  %v2023_v15 = vmul.f32 %v3045_v57, %v2007_v41  ;;  %v4357_v37 = vpop.eup %3054  ;;  %v2111_v46 = vld [vmem:[%s3217_s28 + $0x50] sm:$0xff]  ;;  %v2104_v27 = vld [vmem:[%s3217_s28 + $0x18] sm:$0xff]  ;;  %v1993_v13 = vmul.f32 %v4352_v0, %v1961_v33 }
 0x216   : > { %2720 = vmatprep.subr.mxu0 %v2135_v28  ;;  %2795 = vmatprep.subr.mxu1 %v2135_v28  ;;  %v2117_v16 = vadd.f32 %v2101_v59, %v2085_v30  ;;  %v2093_v54 = vsel %vm2045_vm4, %v2077_v51, 0.0  ;;  %v2078_v23 = vmul.f32 %v2062_v63, %v2030_v31  ;;  %v2031_v52 = vmul.f32 %v3047_v34, %v2015_v38  ;;  %v4363_v62 = vpop.eup %3056  ;;  %v2064_v59 = vld [vmem:[#allocation2 + $0x38] sm:$0xff] }
 0x217   : > { %2721 = vmatpush3.msra.mxu0 %v2135_v28  ;;  %2811 = vmatpush3.msra.mxu1 %v2135_v28  ;;  %v2008_v28 = vsub.f32 2.0, %v1992_v20  ;;  %v2125_v57 = vadd.f32 %v2109_v26, %v2093_v54  ;;  %v2071_v50 = vmul.f32 %v2055_v25, %v2023_v15  ;;  %v3059_v12 = vpop.eup %3058  ;;  %v2016_v1 = vsub.f32 2.0, %v2000_v3  ;;  %v2112_v38 = vld [vmem:[%s3217_s28 + $0x58] sm:$0xff] }
 0x218   : > { %2722 = vmatprep.subr.mxu0 %v2134_v58  ;;  %2796 = vmatprep.subr.mxu1 %v2134_v58  ;;  %v2094_v22 = vsel %vm2046_vm2, %v2078_v23, 0.0  ;;  %v2079_v17 = vmul.f32 %v2063_v44, %v2031_v52  ;;  %v3061_v60 = vpop.eup %3060  ;;  %v2001_v4 = vmul.f32 %v4357_v37, %v1969_v48  ;;  %v2009_v31 = vsub.f32 2.0, %v1993_v13  ;;  %v2057_v48 = vld [vmem:[#allocation2 + $0x50] sm:$0xff] }
 0x219   : > { %2723 = vmatpush3.msra.mxu0 %v2134_v58  ;;  %2812 = vmatpush3.msra.mxu1 %v2134_v58  ;;  %v2086_v58 = vsel %vm2038_vm14, %v2070_v9, 0.0  ;;  %v2024_v8 = vmul.f32 %v3049_v39, %v2008_v28  ;;  %v2126_v47 = vadd.f32 %v2110_v11, %v2094_v22  ;;  %v3063_v21 = vpop.eup %3062  ;;  %v2032_v20 = vmul.f32 %v4339_v19, %v2016_v1  ;;  %v2065_v9 = vld [vmem:[#allocation2 + $0x60] sm:$0xff] }
 0x21a   : > { %2724 = vmatprep.subr.mxu0 %v2133_v43  ;;  %2797 = vmatprep.subr.mxu1 %v2133_v43  ;;  %v2118_v34 = vadd.f32 %v2102_v35, %v2086_v58  ;;  %v2095_v41 = vsel %vm2047_vm6, %v2079_v17, 0.0  ;;  %v3065_v51 = vpop.eup %3064  ;;  %v1994_v10 = vmul.f32 %v4363_v62, %v1962_v49  ;;  %v2017_v3 = vsub.f32 2.0, %v2001_v4  ;;  %v2113_v58 = vld [vmem:[%s3217_s28 + $0x60] sm:$0xff]  ;;  %v2067_v17 = vld [vmem:[#allocation2 + $0x78] sm:$0xff] }
 0x21b   : > { %2725 = vmatpush3.msra.mxu0 %v2133_v43  ;;  %2813 = vmatpush3.msra.mxu1 %v2133_v43  ;;  %v2087_v43 = vsel %vm2039_vm15, %v2071_v50, 0.0  ;;  %v2072_v39 = vmul.f32 %v2056_v56, %v2024_v8  ;;  %v2127_v33 = vadd.f32 %v2111_v46, %v2095_v41  ;;  %v2080_v25 = vmul.f32 %v2064_v59, %v2032_v20  ;;  %v3067_v44 = vpop.eup %3066  ;;  %v2066_v56 = vld [vmem:[#allocation2 + $0x70] sm:$0xff]  ;;  %v2059_v50 = vld [vmem:[#allocation2 + $0x8] sm:$0xff] }
 0x21c   : > { %2726 = vmatprep.mubr.f32.mxu0 %v2117_v16  ;;  %2738 = vmatprep.mubr.f32.mxu1 %v2125_v57  ;;  %v2119_v63 = vadd.f32 %v2103_v7, %v2087_v43  ;;  %v2002_v30 = vmul.f32 %v3059_v12, %v1970_v45  ;;  %v2025_v6 = vmul.f32 %v4352_v0, %v2009_v31  ;;  %v2010_v35 = vsub.f32 2.0, %v1994_v10  ;;  %v2058_v16 = vld [vmem:[#allocation2 + $0x68] sm:$0xff] }
 0x21d   : > { %2727 = vmatmul.mubr.f32.vlgmr.msra.gmra.mxu0 %v2118_v34  ;;  %2739 = vmatmul.mubr.f32.vlgmr.msra.gmra.mxu1 %v2126_v47  ;;  %v2088_v26 = vsel %vm2040_vm9, %v2072_v39, 0.0  ;;  %v1995_v49 = vmul.f32 %v3061_v60, %v1963_v5  ;;  %v2003_v15 = vmul.f32 %v3063_v21, %v1971_v24  ;;  %v2096_v45 = vsel %vm2048_vm10, %v2080_v25, 0.0  ;;  %v2105_v5 = vld [vmem:[%s3217_s28 + $0x20] sm:$0xff]  ;;  %v2106_v34 = vld [vmem:[%s3217_s28 + $0x28] sm:$0xff] }
 0x21e   : > { %2729 = vmatprep.mubr.f32.mxu0 %v2119_v63  ;;  %v2120_v19 = vadd.f32 %v2104_v27, %v2088_v26  ;;  %2741 = vmatprep.mubr.f32.mxu1 %v2127_v33  ;;  %v2033_v28 = vmul.f32 %v4357_v37, %v2017_v3  ;;  %v2018_v54 = vsub.f32 2.0, %v2002_v30  ;;  %v1996_v0 = vmul.f32 %v3065_v51, %v1964_v36  ;;  %v2114_v47 = vld [vmem:[%s3217_s28 + $0x68] sm:$0xff] }
 0x21f   : > { %v2128_v23 = vadd.f32 %v2112_v38, %v2096_v45  ;;  %v2073_v11 = vmul.f32 %v2057_v48, %v2025_v6  ;;  %v2026_v52 = vmul.f32 %v4363_v62, %v2010_v35  ;;  %v2011_v24 = vsub.f32 2.0, %v1995_v49  ;;  %v2060_v39 = vld [vmem:[#allocation2 + $0x48] sm:$0xff]  ;;  %v2116_v38 = vld [vmem:[%s3217_s28 + $0x78] sm:$0xff] }
 0x220   : > { %v2081_v57 = vmul.f32 %v2065_v9, %v2033_v28  ;;  %v2034_v53 = vmul.f32 %v3059_v12, %v2018_v54  ;;  %v2019_v7 = vsub.f32 2.0, %v2003_v15  ;;  %v2012_v37 = vsub.f32 2.0, %v1996_v0  ;;  %v2068_v26 = vld [vmem:[#allocation2 + $0x28] sm:$0xff] }
 0x221   : > { %2730 = vmatmul.mubr.f32.gmra.mxu0 %v2120_v19  ;;  %2742 = vmatmul.mubr.f32.gmra.mxu1 %v2128_v23  ;;  %v2089_v36 = vsel %vm2041_vm8, %v2073_v11, 0.0  ;;  %v2074_v8 = vmul.f32 %v2058_v16, %v2026_v52  ;;  %v2027_v22 = vmul.f32 %v3061_v60, %v2011_v24  ;;  %v2004_v62 = vmul.f32 %v3067_v44, %v1972_v32  ;;  %v2107_v60 = vld [vmem:[%s3217_s28 + $0x30] sm:$0xff] }
 0x222   : > { %v2121_v46 = vadd.f32 %v2105_v5, %v2089_v36  ;;  %v2097_v12 = vsel %vm2049_vm3, %v2081_v57, 0.0  ;;  %v2082_v1 = vmul.f32 %v2066_v56, %v2034_v53  ;;  %v2035_v43 = vmul.f32 %v3063_v21, %v2019_v7 }
 0x223   : > { %v2129_v18 = vadd.f32 %v2113_v58, %v2097_v12  ;;  %v2090_v27 = vsel %vm2042_vm5, %v2074_v8, 0.0  ;;  %v2075_v59 = vmul.f32 %v2059_v50, %v2027_v22  ;;  %v2028_v13 = vmul.f32 %v3065_v51, %v2012_v37 }
 0x224   : > { %2732 = vmatprep.mubr.f32.mxu0 %v2121_v46  ;;  %v2122_v63 = vadd.f32 %v2106_v34, %v2090_v27  ;;  %v2098_v32 = vsel %vm2050_vm7, %v2082_v1, 0.0  ;;  %v2083_v41 = vmul.f32 %v2067_v17, %v2035_v43  ;;  %v2020_v20 = vsub.f32 2.0, %v2004_v62 }
 0x225   : > { %2744 = vmatprep.mubr.f32.mxu1 %v2129_v18  ;;  %v2130_v4 = vadd.f32 %v2114_v47, %v2098_v32  ;;  %v2091_v21 = vsel %vm2043_vm1, %v2075_v59, 0.0  ;;  %v2076_v33 = vmul.f32 %v2060_v39, %v2028_v13 }
 0x226   : > { %2733 = vmatmul.mubr.f32.gmra.mxu0 %v2122_v63  ;;  %v2123_v31 = vadd.f32 %v2107_v60, %v2091_v21  ;;  %v2099_v51 = vsel %vm2051_vm12, %v2083_v41, 0.0  ;;  %v2036_v10 = vmul.f32 %v3067_v44, %v2020_v20 }
 0x227   : > { %2745 = vmatmul.mubr.f32.gmra.mxu1 %v2130_v4  ;;  %v2131_v29 = vadd.f32 %v2115_v42, %v2099_v51  ;;  %v2092_v19 = vsel %vm2044_vm11, %v2076_v33, 0.0 }
 0x228   : > { %2735 = vmatprep.mubr.f32.mxu0 %v2123_v31  ;;  %v2124_v55 = vadd.f32 %v2108_v61, %v2092_v19  ;;  %v2084_v25 = vmul.f32 %v2068_v26, %v2036_v10 }
 0x229   : > { %2747 = vmatprep.mubr.f32.mxu1 %v2131_v29 }
 0x22a   : > { %2736 = vmatmul.mubr.f32.gmra.mxu0 %v2124_v55  ;;  %v2100_v48 = vsel %vm2052_vm13, %v2084_v25, 0.0 }
 0x22b   : > { %v2132_v14 = vadd.f32 %v2116_v38, %v2100_v48 }
 0x22d   : > { %2748 = vmatmul.mubr.f32.gmra.mxu1 %v2132_v14 }
 0x2dd   : > { %v2728_v3 = vpop.f32.mrf.mxu0  ;;  %v2740_v30 = vpop.f32.mrf.mxu1 }
 0x2de   : > { %v2228_v40 = vadd.f32 %v2728_v3, %v2595_v2  ;;  %v2268_v6 = vadd.f32 %v2740_v30, %v2595_v2 }
 0x2df   : > { %v2222_v9 = vpop.f32.mrf.mxu0  ;;  %v2262_v49 = vpop.f32.mrf.mxu1 }
 0x2e0   : > { %2302 = vst [vmem:[%s3224_s17 + $0x8] sm:$0xff] %v2228_v40  ;;  %v2223_v35 = vadd.f32 %v2595_v2, %v2222_v9  ;;  %2310 = vst [vmem:[%s3224_s17 + $0x48] sm:$0xff] %v2268_v6  ;;  %v2263_v15 = vadd.f32 %v2595_v2, %v2262_v49 }
 0x2e1   : > { %v2731_v44 = vpop.f32.mrf.mxu0  ;;  %v2743_v16 = vpop.f32.mrf.mxu1 }
 0x2e2   : > { %2301 = vst [vmem:[%s3224_s17] sm:$0xff] %v2223_v35  ;;  %v2238_v45 = vadd.f32 %v2731_v44, %v2595_v2  ;;  %2309 = vst [vmem:[%s3224_s17 + $0x40] sm:$0xff] %v2263_v15  ;;  %v2278_v0 = vadd.f32 %v2743_v16, %v2595_v2 }
 0x2e3   : > { %v2232_v28 = vpop.f32.mrf.mxu0  ;;  %v2272_v23 = vpop.f32.mrf.mxu1 }
 0x2e4   : > { %2304 = vst [vmem:[%s3224_s17 + $0x18] sm:$0xff] %v2238_v45  ;;  %v2233_v54 = vadd.f32 %v2595_v2, %v2232_v28  ;;  %2312 = vst [vmem:[%s3224_s17 + $0x58] sm:$0xff] %v2278_v0  ;;  %v2273_v11 = vadd.f32 %v2595_v2, %v2272_v23 }
 0x2e6   : > { %2303 = vst [vmem:[%s3224_s17 + $0x10] sm:$0xff] %v2233_v54  ;;  %2311 = vst [vmem:[%s3224_s17 + $0x50] sm:$0xff] %v2273_v11  ;;  %v2734_v5 = vpop.f32.mrf.mxu0 }
 0x2e7   : > { %v2248_v52 = vadd.f32 %v2734_v5, %v2595_v2  ;;  %v2746_v56 = vpop.f32.mrf.mxu1 }
 0x2e8   : > { %v2288_v24 = vadd.f32 %v2746_v56, %v2595_v2  ;;  %v2242_v57 = vpop.f32.mrf.mxu0 }
 0x2e9   : > { %2306 = vst [vmem:[%s3224_s17 + $0x28] sm:$0xff] %v2248_v52  ;;  %v2243_v58 = vadd.f32 %v2595_v2, %v2242_v57  ;;  %v2282_v53 = vpop.f32.mrf.mxu1 }
 0x2ea   : > { %2314 = vst [vmem:[%s3224_s17 + $0x68] sm:$0xff] %v2288_v24  ;;  %v2283_v50 = vadd.f32 %v2595_v2, %v2282_v53  ;;  %v2737_v7 = vpop.f32.mrf.mxu0 }
 0x2eb   : > { %2305 = vst [vmem:[%s3224_s17 + $0x20] sm:$0xff] %v2243_v58  ;;  %v2258_v37 = vadd.f32 %v2737_v7, %v2595_v2 }
 0x2ec   : > { %2313 = vst [vmem:[%s3224_s17 + $0x60] sm:$0xff] %v2283_v50  ;;  %v2252_v36 = vpop.f32.mrf.mxu0 }
 0x2ed   : > { %2308 = vst [vmem:[%s3224_s17 + $0x38] sm:$0xff] %v2258_v37  ;;  %v2749_v8 = vpop.f32.mrf.mxu1  ;;  %v2253_v34 = vadd.f32 %v2595_v2, %v2252_v36 }
 0x2ee   : > { %v2298_v22 = vadd.f32 %v2749_v8, %v2595_v2 }
 0x2ef   : > { %2307 = vst [vmem:[%s3224_s17 + $0x30] sm:$0xff] %v2253_v34  ;;  %v2292_v17 = vpop.f32.mrf.mxu1 }
 0x2f0   : > { %2316 = vst [vmem:[%s3224_s17 + $0x78] sm:$0xff] %v2298_v22  ;;  %v2293_v62 = vadd.f32 %v2595_v2, %v2292_v17 }
 0x2f2   : > { %2315 = vst [vmem:[%s3224_s17 + $0x70] sm:$0xff] %v2293_v62 }
 0x2f3 PF: > { %s26_s14 = sadd.s32 1, %s3120_s14   ;;  %s4606_s28 = sld [smem:[#allocation10_spill]] }
 0x2f4   : > { %p23_p6 = scmp.ge.s32.totalorder %s26_s14, 8   ;;  %s4607_s12 = smov %s3112_s13 }
 0x2f5   : > { %s4608_s0 = smov %s3116_s7  ;;  %s4609_s13 = smov %s4612_s15 }
 0x2f6   :  { %25 = sbr.rel (!%p23_p6) target bundleno = 18 (0x12), region = 99 }
 0x2f9   : > { %s4610_s7 = smov %s4606_s28 }

</bundles_post_ra>
